<compile_context>
chip_gen: v7x
topology: tpu7x:2x2x1
jax: 0.10.0
libtpu: 0.0.40
codegen_flags: <defaults>
</compile_context>

<pallas_src>
import jax
import jax.numpy as jnp
from jax.experimental import pallas as pl
from jax.experimental.pallas import tpu as pltpu


def make_textcnn_kernel(k_max):
    def kernel(mu_ref, sig_ref, w1mu_ref, vsig_ref, csig_ref, w2_ref, b2_ref,
               wconv_ref, bconv_ref, pmask_ref, whead_ref, bhead_ref, out_ref):
        BB, L, D = mu_ref.shape
        R = BB * L

        mu = mu_ref[...].reshape(R, D)            # (R, D) bf16
        sig = sig_ref[...].reshape(R, 1)          # (R, 1) f32

        # intermediate_layer with the sigma branch folded algebraically:
        #   Linear(2D, D) over [mu | sigma_embedding(sig)]
        #     = mu @ w1mu + sig * (wsig @ w1sig) + (bsig @ w1sig + b1)
        # (Dropouts are identities in eval mode.)
        h1 = (jnp.dot(mu, w1mu_ref[...], preferred_element_type=jnp.float32)
              + sig * vsig_ref[...] + csig_ref[...])
        h1 = jnp.maximum(h1, 0.0)
        h = (jnp.dot(h1.astype(jnp.bfloat16), w2_ref[...],
                     preferred_element_type=jnp.float32)
             + b2_ref[...])                                              # (R, D) f32

        # im2col slab: column block j holds h shifted up by j rows
        # (pltpu.roll with shift = R - j  ==  jnp.roll(h, -j, axis=0)).
        # Each shifted piece is cast to bf16 before the lane concatenate.
        # Wrap-around / cross-sequence rows only land at conv positions that
        # the pooling mask zeroes, or at zero wconv columns (shifts j >= k_i),
        # so they never affect the result.
        pieces = [h.astype(jnp.bfloat16)]
        for j in range(1, k_max):
            pieces.append(
                pltpu.roll(h, shift=R - j, axis=0).astype(jnp.bfloat16))
        slab = jnp.concatenate(pieces, axis=-1)                          # (R, k_max*D)

        # all conv branches fused into one wide matmul (zero-padded weight)
        conv = (jnp.dot(slab, wconv_ref[...],
                        preferred_element_type=jnp.float32)
                + bconv_ref[...])
        conv = jnp.maximum(conv, 0.0)                                    # (R, n_k*F)

        # masked mean pool over the valid conv positions of each sequence;
        # pmask carries 1/T_k for valid positions and 0 elsewhere.
        nkF = conv.shape[-1]
        pooled = jnp.sum(conv.reshape(BB, L, nkF) * pmask_ref[...][None, :, :],
                         axis=1)                                         # (BB, n_k*F)

        # head (output width padded to 128 lanes; sliced in the wrapper)
        out_ref[...] = (jnp.dot(pooled.astype(jnp.bfloat16), whead_ref[...],
                                preferred_element_type=jnp.float32)
                        + bhead_ref[...])

    return kernel


def textcnn_forward(mu_emb, sigmas, params, kernel_sizes, block_b=None):
    kernel_sizes = tuple(kernel_sizes)
    B, L, D = mu_emb.shape
    F = params["bc"][0].shape[-1]
    C = params["bhead"].shape[-1]
    n_k = len(kernel_sizes)
    k_max = max(kernel_sizes)
    # Guard: each conv branch must have at least one valid position (otherwise
    # the pooling-mask 1/(L-k+1) constant is ill-defined).
    assert all(1 <= k <= L for k in kernel_sizes), (kernel_sizes, L)
    C_pad = pl.cdiv(C, 128) * 128

    # Batch block: R = bb*L >= 256 keeps the MXU M dimension full and
    # amortizes per-step pipeline overhead.  Capped at 128 so per-step VMEM
    # intermediates stay well under the default scoped VMEM on v7x; raise
    # vmem_limit_bytes if pushing bb higher on v6e.  Prefer B >= 2*bb so the
    # "parallel" grid axis has >= 2 steps (pipelining / v7x 2-TC split).
    if block_b is None:
        block_b = min(max(8, pl.cdiv(256, L)), 128)
    bb = max(1, min(block_b, B))
    B_pad = pl.cdiv(B, bb) * bb

    mu_in = mu_emb.astype(jnp.bfloat16)
    sig_in = sigmas.reshape(B, L, 1).astype(jnp.float32)
    if B_pad != B:
        mu_in = jnp.pad(mu_in, ((0, B_pad - B), (0, 0), (0, 0)))
        sig_in = jnp.pad(sig_in, ((0, B_pad - B), (0, 0), (0, 0)))

    # ---- host-side parameter packing --------------------------------------
    f32 = jnp.float32
    # Sigma branch folded into a rank-1 update (exact, f32):
    #   sig_emb @ w1sig = sig * (wsig @ w1sig) + bsig @ w1sig
    vsig = params["wsig"].astype(f32) @ params["w1sig"].astype(f32)       # (1, D)
    csig = (params["bsig"].astype(f32) @ params["w1sig"].astype(f32)
            + params["b1"].astype(f32))                                   # (1, D)

    # Conv weights: (k, D, F) per branch -> one zero-padded (k_max*D, n_k*F).
    wconv = jnp.zeros((k_max * D, n_k * F), f32)
    for i, k in enumerate(kernel_sizes):
        wconv = wconv.at[:k * D, i * F:(i + 1) * F].set(
            params["wc"][i].reshape(k * D, F))
    bconv = jnp.concatenate([params["bc"][i] for i in range(n_k)], axis=-1)

    # Pooling mask with 1/T folded in: pmask[t, i*F:(i+1)*F] = 1/T_i if t < T_i.
    t = jnp.arange(L, dtype=f32)[:, None]
    pmask = jnp.concatenate(
        [jnp.where(t <= float(L - k), 1.0 / float(L - k + 1), 0.0)
         * jnp.ones((1, F), f32) for k in kernel_sizes],
        axis=-1)                                                         # (L, n_k*F)

    whead = jnp.zeros((n_k * F, C_pad), f32).at[:, :C].set(params["whead"])
    bhead = jnp.zeros((1, C_pad), f32).at[:, :C].set(params["bhead"])

    inputs = [
        mu_in, sig_in,
        params["w1mu"].astype(jnp.bfloat16),
        vsig, csig,
        params["w2"].astype(jnp.bfloat16), params["b2"].astype(f32),
        wconv.astype(jnp.bfloat16), bconv.astype(f32),
        pmask,
        whead.astype(jnp.bfloat16), bhead.astype(f32),
    ]

    def const_spec(a):
        zeros = (0,) * a.ndim
        return pl.BlockSpec(a.shape, lambda b, _z=zeros: _z)

    in_specs = [pl.BlockSpec((bb, L, D), lambda b: (b, 0, 0)),
                pl.BlockSpec((bb, L, 1), lambda b: (b, 0, 0))]
    in_specs += [const_spec(a) for a in inputs[2:]]

    out = pl.pallas_call(
        make_textcnn_kernel(k_max),
        out_shape=jax.ShapeDtypeStruct((B_pad, C_pad), jnp.float32),
        grid=(B_pad // bb,),
        in_specs=in_specs,
        out_specs=pl.BlockSpec((bb, C_pad), lambda b: (b, 0)),
        compiler_params=pltpu.CompilerParams(
            dimension_semantics=("parallel",)),
    )(*inputs)
    return out[:B, :C]


def reference(mus, sigmas, emb_table, params, kernel_sizes):
    """Pure-JAX f32 reference matching the PyTorch forward (eval mode)."""
    idx = jnp.clip(jnp.round(mus).astype(jnp.int32), 0, emb_table.shape[0] - 1)
    mu = emb_table[idx]                                            # (B, L, D)
    sig = sigmas[..., None] * params["wsig"][0] + params["bsig"][0]
    h1 = mu @ params["w1mu"] + sig @ params["w1sig"] + params["b1"][0]
    h1 = jnp.maximum(h1, 0.0)
    h = h1 @ params["w2"] + params["b2"][0]                        # (B, L, D)
    B, L, _ = h.shape
    feats = []
    for i, k in enumerate(kernel_sizes):
        T = L - k + 1
        f_dim = params["bc"][i].shape[-1]
        conv = jnp.zeros((B, T, f_dim), jnp.float32)
        for j in range(k):
            conv = conv + jnp.einsum("btd,df->btf", h[:, j:j + T, :],
                                     params["wc"][i][j])
        conv = jnp.maximum(conv + params["bc"][i][0], 0.0)
        feats.append(jnp.mean(conv, axis=1))                       # (B, F)
    feat = jnp.concatenate(feats, axis=-1)
    return feat @ params["whead"] + params["bhead"][0]


if __name__ == "__main__":
    # Small, module-consistent shapes (B=32 so the default bb=16 gives a
    # 2-step "parallel" grid -> one step per v7x TensorCore, R=256 rows/step).
    B, L = 32, 16                 # batch, sequence length
    D = 128                       # token_dim
    F = 128                       # num_filters
    KS = [3, 4, 5, 6]             # kernel_sizes
    C = 30                        # n_classes
    VOCAB = 64                    # (module uses 4000; small synthetic table)

    key = jax.random.PRNGKey(0)
    ks = jax.random.split(key, 16)
    s = 0.05

    emb_table = s * jax.random.normal(ks[0], (VOCAB, D), jnp.float32)
    emb_table = emb_table.at[0].set(0.0)          # padding_idx=0 -> zero row

    params = {
        "wsig":  s * jax.random.normal(ks[1], (1, D), jnp.float32),
        "bsig":  s * jax.random.normal(ks[2], (1, D), jnp.float32),
        "w1mu":  s * jax.random.normal(ks[3], (D, D), jnp.float32),
        "w1sig": s * jax.random.normal(ks[4], (D, D), jnp.float32),
        "b1":    s * jax.random.normal(ks[5], (1, D), jnp.float32),
        "w2":    s * jax.random.normal(ks[6], (D, D), jnp.float32),
        "b2":    s * jax.random.normal(ks[7], (1, D), jnp.float32),
        "wc":    [s * jax.random.normal(ks[8 + i], (k, D, F), jnp.float32)
                  for i, k in enumerate(KS)],
        "bc":    [s * jax.random.normal(ks[12 + i % 2], (1, F), jnp.float32)
                  for i in range(len(KS))],
        "whead": s * jax.random.normal(ks[14], (len(KS) * F, C), jnp.float32),
        "bhead": s * jax.random.normal(ks[15], (1, C), jnp.float32),
    }

    dkey = jax.random.split(jax.random.PRNGKey(0), 2)
    mus = jax.random.uniform(dkey[0], (B, L), jnp.float32, 0.0, VOCAB - 1.0)
    sigmas = jax.random.normal(dkey[1], (B, L), jnp.float32)

    # Embedding gather kept on the host (data-dependent indexing).
    idx = jnp.clip(jnp.round(mus).astype(jnp.int32), 0, VOCAB - 1)
    mu_emb = emb_table[idx]                                        # (B, L, D)

    out = textcnn_forward(mu_emb, sigmas, params, KS)
    out = jax.block_until_ready(out)

    ref = reference(mus, sigmas, emb_table, params, KS)
    assert out.shape == (B, C), out.shape
    # bf16 matmul operands (f32 accumulate) -> slightly looser tolerance.
    assert jnp.allclose(out, ref, rtol=1e-2, atol=1e-2), (
        float(jnp.max(jnp.abs(out - ref))))

    print("KERNEL_OK")
</pallas_src>

<mosaic_0001>
module attributes {stable_mosaic.version = 11 : i64} {
  func.func @kernel(%arg0: i32, %arg1: memref<16x16x128xbf16, #tpu.memory_space<vmem>>, %arg2: memref<16x16x1xf32, #tpu.memory_space<vmem>>, %arg3: memref<128x128xbf16, #tpu.memory_space<vmem>>, %arg4: memref<1x128xf32, #tpu.memory_space<vmem>>, %arg5: memref<1x128xf32, #tpu.memory_space<vmem>>, %arg6: memref<128x128xbf16, #tpu.memory_space<vmem>>, %arg7: memref<1x128xf32, #tpu.memory_space<vmem>>, %arg8: memref<768x512xbf16, #tpu.memory_space<vmem>>, %arg9: memref<1x512xf32, #tpu.memory_space<vmem>>, %arg10: memref<16x512xf32, #tpu.memory_space<vmem>>, %arg11: memref<512x128xbf16, #tpu.memory_space<vmem>>, %arg12: memref<1x128xf32, #tpu.memory_space<vmem>>, %arg13: memref<16x128xf32, #tpu.memory_space<vmem>>) attributes {dimension_semantics = [#tpu.dimension_semantics<parallel>], iteration_bounds = array<i64: 2>, scalar_prefetch = 0 : i64, scratch_operands = 0 : i64, tpu.core_type = #tpu.core_type<tc>, window_params = [{transform_indices = @transform_0, window_bounds = array<i64: 16, 16, 128>}, {transform_indices = @transform_1, window_bounds = array<i64: 16, 16, 1>}, {pipeline_mode = #tpu.pipeline_mode<synchronous>, transform_indices = @transform_2, window_bounds = array<i64: 128, 128>}, {pipeline_mode = #tpu.pipeline_mode<synchronous>, transform_indices = @transform_3, window_bounds = array<i64: 1, 128>}, {pipeline_mode = #tpu.pipeline_mode<synchronous>, transform_indices = @transform_4, window_bounds = array<i64: 1, 128>}, {pipeline_mode = #tpu.pipeline_mode<synchronous>, transform_indices = @transform_5, window_bounds = array<i64: 128, 128>}, {pipeline_mode = #tpu.pipeline_mode<synchronous>, transform_indices = @transform_6, window_bounds = array<i64: 1, 128>}, {pipeline_mode = #tpu.pipeline_mode<synchronous>, transform_indices = @transform_7, window_bounds = array<i64: 768, 512>}, {pipeline_mode = #tpu.pipeline_mode<synchronous>, transform_indices = @transform_8, window_bounds = array<i64: 1, 512>}, {pipeline_mode = #tpu.pipeline_mode<synchronous>, transform_indices = @transform_9, window_bounds = array<i64: 16, 512>}, {pipeline_mode = #tpu.pipeline_mode<synchronous>, transform_indices = @transform_10, window_bounds = array<i64: 512, 128>}, {pipeline_mode = #tpu.pipeline_mode<synchronous>, transform_indices = @transform_11, window_bounds = array<i64: 1, 128>}, {transform_indices = @transform_12, window_bounds = array<i64: 16, 128>}]} {
    %c0 = arith.constant 0 : index
    %c0_0 = arith.constant 0 : index
    %c0_1 = arith.constant 0 : index
    %0 = vector.load %arg1[%c0, %c0_0, %c0_1] : memref<16x16x128xbf16, #tpu.memory_space<vmem>>, vector<16x16x128xbf16>
    %1 = vector.shape_cast %0 : vector<16x16x128xbf16> to vector<256x128xbf16>
    %c0_2 = arith.constant 0 : index
    %c0_3 = arith.constant 0 : index
    %c0_4 = arith.constant 0 : index
    %2 = vector.load %arg2[%c0_2, %c0_3, %c0_4] : memref<16x16x1xf32, #tpu.memory_space<vmem>>, vector<16x16x1xf32>
    %3 = vector.shape_cast %2 : vector<16x16x1xf32> to vector<256x1xf32>
    %c0_5 = arith.constant 0 : index
    %c0_6 = arith.constant 0 : index
    %4 = vector.load %arg3[%c0_5, %c0_6] : memref<128x128xbf16, #tpu.memory_space<vmem>>, vector<128x128xbf16>
    %cst = arith.constant dense<0.000000e+00> : vector<256x128xf32>
    %5 = tpu.matmul %1, %4, %cst {dimension_numbers = #tpu.dot_dimension_numbers<[1], [0], [0], [1], [0, 0, 1, 1], [], []>} : vector<256x128xbf16>, vector<128x128xbf16>, vector<256x128xf32> -> vector<256x128xf32>
    %c0_7 = arith.constant 0 : index
    %c0_8 = arith.constant 0 : index
    %6 = vector.load %arg4[%c0_7, %c0_8] : memref<1x128xf32, #tpu.memory_space<vmem>>, vector<1x128xf32>
    %7 = vector.broadcast %3 : vector<256x1xf32> to vector<256x128xf32>
    %8 = vector.broadcast %6 : vector<1x128xf32> to vector<256x128xf32>
    %9 = arith.mulf %7, %8 : vector<256x128xf32>
    %10 = arith.addf %5, %9 : vector<256x128xf32>
    %c0_9 = arith.constant 0 : index
    %c0_10 = arith.constant 0 : index
    %11 = vector.load %arg5[%c0_9, %c0_10] : memref<1x128xf32, #tpu.memory_space<vmem>>, vector<1x128xf32>
    %12 = vector.broadcast %11 : vector<1x128xf32> to vector<256x128xf32>
    %13 = arith.addf %10, %12 : vector<256x128xf32>
    %cst_11 = arith.constant 0.000000e+00 : f32
    %14 = vector.broadcast %cst_11 : f32 to vector<256x128xf32>
    %15 = arith.maximumf %13, %14 : vector<256x128xf32>
    %16 = arith.truncf %15 : vector<256x128xf32> to vector<256x128xbf16>
    %c0_12 = arith.constant 0 : index
    %c0_13 = arith.constant 0 : index
    %17 = vector.load %arg6[%c0_12, %c0_13] : memref<128x128xbf16, #tpu.memory_space<vmem>>, vector<128x128xbf16>
    %cst_14 = arith.constant dense<0.000000e+00> : vector<256x128xf32>
    %18 = tpu.matmul %16, %17, %cst_14 {dimension_numbers = #tpu.dot_dimension_numbers<[1], [0], [0], [1], [0, 0, 1, 1], [], []>} : vector<256x128xbf16>, vector<128x128xbf16>, vector<256x128xf32> -> vector<256x128xf32>
    %c0_15 = arith.constant 0 : index
    %c0_16 = arith.constant 0 : index
    %19 = vector.load %arg7[%c0_15, %c0_16] : memref<1x128xf32, #tpu.memory_space<vmem>>, vector<1x128xf32>
    %20 = vector.broadcast %19 : vector<1x128xf32> to vector<256x128xf32>
    %21 = arith.addf %18, %20 : vector<256x128xf32>
    %22 = arith.truncf %21 : vector<256x128xf32> to vector<256x128xbf16>
    %c255_i32 = arith.constant 255 : i32
    %23 = tpu.dynamic_rotate %21 by %c255_i32 dim 0 : vector<256x128xf32>, i32 -> vector<256x128xf32>
    %24 = arith.truncf %23 : vector<256x128xf32> to vector<256x128xbf16>
    %c254_i32 = arith.constant 254 : i32
    %25 = tpu.dynamic_rotate %21 by %c254_i32 dim 0 : vector<256x128xf32>, i32 -> vector<256x128xf32>
    %26 = arith.truncf %25 : vector<256x128xf32> to vector<256x128xbf16>
    %c253_i32 = arith.constant 253 : i32
    %27 = tpu.dynamic_rotate %21 by %c253_i32 dim 0 : vector<256x128xf32>, i32 -> vector<256x128xf32>
    %28 = arith.truncf %27 : vector<256x128xf32> to vector<256x128xbf16>
    %c252_i32 = arith.constant 252 : i32
    %29 = tpu.dynamic_rotate %21 by %c252_i32 dim 0 : vector<256x128xf32>, i32 -> vector<256x128xf32>
    %30 = arith.truncf %29 : vector<256x128xf32> to vector<256x128xbf16>
    %c251_i32 = arith.constant 251 : i32
    %31 = tpu.dynamic_rotate %21 by %c251_i32 dim 0 : vector<256x128xf32>, i32 -> vector<256x128xf32>
    %32 = arith.truncf %31 : vector<256x128xf32> to vector<256x128xbf16>
    %33 = tpu.concatenate %22, %24, %26, %28, %30, %32 in 1 : vector<256x128xbf16>, vector<256x128xbf16>, vector<256x128xbf16>, vector<256x128xbf16>, vector<256x128xbf16>, vector<256x128xbf16> -> vector<256x768xbf16>
    %c0_17 = arith.constant 0 : index
    %c0_18 = arith.constant 0 : index
    %34 = vector.load %arg8[%c0_17, %c0_18] : memref<768x512xbf16, #tpu.memory_space<vmem>>, vector<768x512xbf16>
    %cst_19 = arith.constant dense<0.000000e+00> : vector<256x512xf32>
    %35 = tpu.matmul %33, %34, %cst_19 {dimension_numbers = #tpu.dot_dimension_numbers<[1], [0], [0], [1], [0, 0, 1, 1], [], []>} : vector<256x768xbf16>, vector<768x512xbf16>, vector<256x512xf32> -> vector<256x512xf32>
    %c0_20 = arith.constant 0 : index
    %c0_21 = arith.constant 0 : index
    %36 = vector.load %arg9[%c0_20, %c0_21] : memref<1x512xf32, #tpu.memory_space<vmem>>, vector<1x512xf32>
    %37 = vector.broadcast %36 : vector<1x512xf32> to vector<256x512xf32>
    %38 = arith.addf %35, %37 : vector<256x512xf32>
    %cst_22 = arith.constant 0.000000e+00 : f32
    %39 = vector.broadcast %cst_22 : f32 to vector<256x512xf32>
    %40 = arith.maximumf %38, %39 : vector<256x512xf32>
    %41 = vector.shape_cast %40 : vector<256x512xf32> to vector<16x16x512xf32>
    %c0_23 = arith.constant 0 : index
    %c0_24 = arith.constant 0 : index
    %42 = vector.load %arg10[%c0_23, %c0_24] : memref<16x512xf32, #tpu.memory_space<vmem>>, vector<16x512xf32>
    %43 = vector.shape_cast %42 : vector<16x512xf32> to vector<1x16x512xf32>
    %44 = vector.broadcast %43 : vector<1x16x512xf32> to vector<16x16x512xf32>
    %45 = arith.mulf %41, %44 : vector<16x16x512xf32>
    %cst_25 = arith.constant dense<0.000000e+00> : vector<16x512xf32>
    %46 = vector.multi_reduction <add>, %45, %cst_25 [1] : vector<16x16x512xf32> to vector<16x512xf32>
    %47 = arith.truncf %46 : vector<16x512xf32> to vector<16x512xbf16>
    %c0_26 = arith.constant 0 : index
    %c0_27 = arith.constant 0 : index
    %48 = vector.load %arg11[%c0_26, %c0_27] : memref<512x128xbf16, #tpu.memory_space<vmem>>, vector<512x128xbf16>
    %cst_28 = arith.constant dense<0.000000e+00> : vector<16x128xf32>
    %49 = tpu.matmul %47, %48, %cst_28 {dimension_numbers = #tpu.dot_dimension_numbers<[1], [0], [0], [1], [0, 0, 1, 1], [], []>} : vector<16x512xbf16>, vector<512x128xbf16>, vector<16x128xf32> -> vector<16x128xf32>
    %c0_29 = arith.constant 0 : index
    %c0_30 = arith.constant 0 : index
    %50 = vector.load %arg12[%c0_29, %c0_30] : memref<1x128xf32, #tpu.memory_space<vmem>>, vector<1x128xf32>
    %51 = vector.broadcast %50 : vector<1x128xf32> to vector<16x128xf32>
    %52 = arith.addf %49, %51 : vector<16x128xf32>
    %c0_31 = arith.constant 0 : index
    %c0_32 = arith.constant 0 : index
    %53 = vector.load %arg13[%c0_31, %c0_32] : memref<16x128xf32, #tpu.memory_space<vmem>>, vector<16x128xf32>
    tpu.vector_store %arg13[%c0_31, %c0_32], %52 {strides = array<i32>} : memref<16x128xf32, #tpu.memory_space<vmem>>, vector<16x128xf32>,
    return
  }
  func.func @transform_0(%arg0: i32) -> (i32, i32, i32) {
    %c0_i32 = arith.constant 0 : i32
    %c0_i32_0 = arith.constant 0 : i32
    %c0_i32_1 = arith.constant 0 : i32
    return %arg0, %c0_i32, %c0_i32_0 : i32, i32, i32
  }
  func.func @transform_1(%arg0: i32) -> (i32, i32, i32) {
    %c0_i32 = arith.constant 0 : i32
    %c0_i32_0 = arith.constant 0 : i32
    %c0_i32_1 = arith.constant 0 : i32
    return %arg0, %c0_i32, %c0_i32_0 : i32, i32, i32
  }
  func.func @transform_2(%arg0: i32) -> (i32, i32) {
    %c0_i32 = arith.constant 0 : i32
    %c0_i32_0 = arith.constant 0 : i32
    %c0_i32_1 = arith.constant 0 : i32
    return %c0_i32, %c0_i32_0 : i32, i32
  }
  func.func @transform_3(%arg0: i32) -> (i32, i32) {
    %c0_i32 = arith.constant 0 : i32
    %c0_i32_0 = arith.constant 0 : i32
    %c0_i32_1 = arith.constant 0 : i32
    return %c0_i32, %c0_i32_0 : i32, i32
  }
  func.func @transform_4(%arg0: i32) -> (i32, i32) {
    %c0_i32 = arith.constant 0 : i32
    %c0_i32_0 = arith.constant 0 : i32
    %c0_i32_1 = arith.constant 0 : i32
    return %c0_i32, %c0_i32_0 : i32, i32
  }
  func.func @transform_5(%arg0: i32) -> (i32, i32) {
    %c0_i32 = arith.constant 0 : i32
    %c0_i32_0 = arith.constant 0 : i32
    %c0_i32_1 = arith.constant 0 : i32
    return %c0_i32, %c0_i32_0 : i32, i32
  }
  func.func @transform_6(%arg0: i32) -> (i32, i32) {
    %c0_i32 = arith.constant 0 : i32
    %c0_i32_0 = arith.constant 0 : i32
    %c0_i32_1 = arith.constant 0 : i32
    return %c0_i32, %c0_i32_0 : i32, i32
  }
  func.func @transform_7(%arg0: i32) -> (i32, i32) {
    %c0_i32 = arith.constant 0 : i32
    %c0_i32_0 = arith.constant 0 : i32
    %c0_i32_1 = arith.constant 0 : i32
    return %c0_i32, %c0_i32_0 : i32, i32
  }
  func.func @transform_8(%arg0: i32) -> (i32, i32) {
    %c0_i32 = arith.constant 0 : i32
    %c0_i32_0 = arith.constant 0 : i32
    %c0_i32_1 = arith.constant 0 : i32
    return %c0_i32, %c0_i32_0 : i32, i32
  }
  func.func @transform_9(%arg0: i32) -> (i32, i32) {
    %c0_i32 = arith.constant 0 : i32
    %c0_i32_0 = arith.constant 0 : i32
    %c0_i32_1 = arith.constant 0 : i32
    return %c0_i32, %c0_i32_0 : i32, i32
  }
  func.func @transform_10(%arg0: i32) -> (i32, i32) {
    %c0_i32 = arith.constant 0 : i32
    %c0_i32_0 = arith.constant 0 : i32
    %c0_i32_1 = arith.constant 0 : i32
    return %c0_i32, %c0_i32_0 : i32, i32
  }
  func.func @transform_11(%arg0: i32) -> (i32, i32) {
    %c0_i32 = arith.constant 0 : i32
    %c0_i32_0 = arith.constant 0 : i32
    %c0_i32_1 = arith.constant 0 : i32
    return %c0_i32, %c0_i32_0 : i32, i32
  }
  func.func @transform_12(%arg0: i32) -> (i32, i32) {
    %c0_i32 = arith.constant 0 : i32
    %c0_i32_0 = arith.constant 0 : i32
    return %arg0, %c0_i32 : i32, i32
  }
}

</mosaic_0001>

<bundles_post_ra>
// kernel: tpu_custom_call.1
= control target key start
LH: loop header
LB: loop body
LE: loop exit
PB: predicated region body
PF: predicated region fallthrough
CT: control target
= control target key end

     0   :  { %s9467_s0 = inlined_call_operand.vmem [shape: bf16[32,16,128], index: 0, kind: input, shape index: {}]   ;;  %s9468_s1 = inlined_call_operand.vmem [shape: f32[32,16,1], index: 1, kind: input, shape index: {}]   ;;  %s9469_s2 = inlined_call_operand.hbm [shape: bf16[128,128], index: 2, kind: input, shape index: {}]   ;;  %s9470_s3 = inlined_call_operand.vmem [shape: f32[1,128], index: 3, kind: input, shape index: {}]   ;;  %s9471_s4 = inlined_call_operand.vmem [shape: f32[1,128], index: 4, kind: input, shape index: {}]   ;;  %s9472_s5 = inlined_call_operand.hbm [shape: bf16[128,128], index: 5, kind: input, shape index: {}]   ;;  %s9473_s6 = inlined_call_operand.vmem [shape: f32[1,128], index: 6, kind: input, shape index: {}]   ;;  %s9474_s7 = inlined_call_operand.hbm [shape: bf16[768,512], index: 7, kind: input, shape index: {}]   ;;  %s9475_s8 = inlined_call_operand.vmem [shape: f32[1,512], index: 8, kind: input, shape index: {}]   ;;  %s9476_s9 = inlined_call_operand.hbm [shape: f32[16,512], index: 9, kind: input, shape index: {}]   ;;  %s9477_s10 = inlined_call_operand.vmem [shape: bf16[512,128], index: 10, kind: input, shape index: {}]   ;;  %s9478_s11 = inlined_call_operand.vmem [shape: f32[1,128], index: 11, kind: input, shape index: {}]   ;;  %s9479_s12 = inlined_call_operand.hbm [shape: f32[32,128], index: 12, kind: output, shape index: {}]  }
   0x1   :  { %9537 = sst [smem:[#allocation76_spill]] %s9479_s12 }
   0x2   :  { %17 = vsyncpa [#allocation3], 0 }
   0x3   :  { %18 = vsyncpa [#allocation6], 0 }
   0x4   :  { %19 = vsyncpa [#allocation9], 0 }
   0x5   :  { %20 = vsyncpa [#allocation4], 0 }
   0x6   :  { %22 = vsyncpa [#allocation4 + $0x1], 0  ;;  %s7193_s21 = smov 0   ;;  %s7195_s22 = smov 0  }
   0x7   :  { %s7197_s23 = smov 0   ;;  %s7199_s24 = smov 0  }
   0x8 LB: > { %9538 = sst [smem:[#allocation15_spill]] %s7100_s21  ;;  %s7214_s25 = sadd.s32 4294967295, %s7112_s24   ;;  %s7112_s24 = sphi %s7199_s24, %s9742_s24   ;;  %s7108_s23 = sphi %s7197_s23, %s9744_s23   ;;  %s7104_s22 = sphi %s7195_s22, %s9746_s22   ;;  %s7100_s21 = sphi %s7193_s21, %s9745_s21  }
   0x9   : > { %9539 = sst [smem:[#allocation16_spill]] %s7108_s23  ;;  %s5612_s26 = sadd.s32 4294967294, %s7112_s24  }
   0xa   : > { %9540 = sst [smem:[#allocation17_spill]] %s7112_s24  ;;  %s7218_s27 = sadd.s32 1, %s7112_s24  }
   0xb   : > { %9541 = sst [smem:[#allocation18_spill]] %s7218_s27  ;;  %s297_s28 = sadd.s32 1, %s7108_s23 }
   0xc   : > { %s294_s29 = ssub.s32 %s7112_s24, %s7218_s27  ;;  %p307_p0 = scmp.ne.s32.totalorder %s7108_s23, %s7104_s22 }
   0xd   : > { %p295_p1 = scmp.eq.s32.totalorder %s294_s29, 0  ;;  %p308_p2 = scmp.eq.s32.totalorder %s7214_s25, 1 }
   0xe   : > { %p313_p3 = scmp.ne.s32.totalorder %s7104_s22, %s7100_s21  ;;  %p314_p4 = scmp.eq.s32.totalorder %s5612_s26, 1 }
   0xf   : > { %s7229_s30 = scalar_select %p295_p1, %s7108_s23, %s297_s28  }
  0x10   : > { %p7231_p5 = por %p308_p2, %p307_p0  ;;  %p7235_p6 = por %p314_p4, %p313_p3 }
  0x11   : > { %9542 = sst [smem:[#allocation19_spill]] %s7229_s30  ;;  %p5613_p7 = scmp.ge.s32.totalorder %s7112_s24, 1 }
  0x12   : > { %s9543_s13 = scalar_select %p7231_p5, 1, 0 }
  0x13   : > { %s9545_s14 = scalar_select %p7235_p6, 1, 0 }
  0x14   : > { %9544 = sst [smem:[#allocation20_spill]] %s9543_s13  ;;  %p321_p8 = scmp.lt.s32.totalorder %s7112_s24, 3 }
  0x15   : > { %9546 = sst [smem:[#allocation21_spill]] %s9545_s14  ;;  %p9484_p9 = scmp.eq.s32.totalorder %s7214_s25, 0 }
  0x16   : > { %p7242_p10 = pnand %p5613_p7, %p321_p8  ;;  %s7114_s16 = smov [#allocation5]  }
  0x17   : > { %s352_s17 = sshll.u32 %s7114_s16, 4  ;;  %s7115_s19 = smov [#allocation2]   ;;  %s7248_s17 = int_to_ptr.vmem [resolvable:$true] %s352_s17 }
  0x18   : > { %s9547_s15 = scalar_select %p7242_p10, 1, 0 }
  0x19   : > { %p6489_p11 = pneg %p7242_p10  ;;  %s333_s20 = sshll.u32 %s7115_s19, 4  ;;  %s7256_s20 = int_to_ptr.vmem [resolvable:$true] %s333_s20 }
  0x1a   : > { %s7116_s26 = smov [#allocation7]   ;;  %s6926_s23 = scalar_lea.hbm %s9472_s5, 1024 }
  0x1b   : > { %p7252_p12 = pnand %p9484_p9, %p6489_p11  ;;  %s7258_s28 = sshll.u32 %s7116_s26, 4  ;;  %s369_s28 = int_to_ptr.vmem [resolvable:$true] %s7258_s28 }
  0x1c   : > { %p6927_p13 = scmp.ne.s32.totalorder %s9472_s5, %s6926_s23  ;;  %p6933_p3 = scmp.lt.u32.totalorder %s6926_s23, %s9472_s5 }
  0x1d   : > { %p7268_p0 = pneg %p7252_p12 }
  0x1f   : > { %p6929_p1 = pnand %p7268_p0, %p6927_p13 }
  0x21   : > { %p6930_p2 = pneg %p6929_p1 }
  0x23   : > { %p6935_p4 = pnand %p6933_p3, %p6930_p2 }
  0x25   : > { %6938 = shalt.err (!%p6935_p4)
}
  0x26   : > { %s6939_s27 = scalar_lea.vmem %s7248_s17, 1024  ;;  %p6947_p9 = scmp.lt.s32.totalorder %s7248_s17, %s7248_s17 }
  0x27   : > { %p6940_p7 = scmp.ne.s32.totalorder %s7248_s17, %s6939_s27  ;;  %p6948_p6 = scmp.lt.s32.totalorder %s6939_s27, %s6939_s27 }
  0x29   : > { %p6942_p8 = pnand %p6940_p7, %p7268_p0  ;;  %p6949_p13 = por %p6948_p6, %p6947_p9 }
  0x2b   : > { %p6943_p11 = pneg %p6942_p8 }
  0x2d   : > { %p6950_p1 = pnand %p6949_p13, %p6943_p11 }
  0x2f   : > { %6953 = shalt.err (!%p6950_p1)
}
  0x30   : > { %s7117_s30 = smov 64   ;;  %s7118_s23 = smov 4  }
  0x31   : > { %6495 = dma.hbm_to_vmem [thread:$0]  (!%p7252_p12), %s9472_s5, 1024, %s7248_s17, [#allocation6], %s7117_s30, %s7117_s30, %s7118_s23  }
  0x32   : > { %s6954_s21 = scalar_lea.hbm %s9469_s2, 1024 }
  0x33   : > { %p6955_p6 = scmp.ne.s32.totalorder %s9469_s2, %s6954_s21  ;;  %p6961_p3 = scmp.lt.u32.totalorder %s6954_s21, %s9469_s2 }
  0x35   : > { %p6957_p9 = pnand %p6955_p6, %p7268_p0 }
  0x37   : > { %p6958_p2 = pneg %p6957_p9 }
  0x39   : > { %p6963_p4 = pnand %p6961_p3, %p6958_p2 }
  0x3b   : > { %6966 = shalt.err (!%p6963_p4)
}
  0x3c   : > { %s6967_s17 = scalar_lea.vmem %s7256_s20, 1024  ;;  %p6975_p13 = scmp.lt.s32.totalorder %s7256_s20, %s7256_s20 }
  0x3d   : > { %p6968_p7 = scmp.ne.s32.totalorder %s7256_s20, %s6967_s17  ;;  %p6976_p1 = scmp.lt.s32.totalorder %s6967_s17, %s6967_s17 }
  0x3f   : > { %p6970_p8 = pnand %p6968_p7, %p7268_p0  ;;  %p6977_p6 = por %p6976_p1, %p6975_p13 }
  0x41   : > { %p6971_p11 = pneg %p6970_p8 }
  0x43   : > { %p6978_p9 = pnand %p6977_p6, %p6971_p11 }
  0x45   : > { %6981 = shalt.err (!%p6978_p9)
}
  0x46   : > { %6492 = dma.hbm_to_vmem [thread:$0]  (!%p7252_p12), %s9469_s2, 1024, %s7256_s20, [#allocation3], %s7117_s30, %s7117_s30, %s7118_s23  }
  0x47   : > { %s6982_s29 = scalar_lea.hbm %s9474_s7, 24576 }
  0x48   : > { %p6983_p2 = scmp.ne.s32.totalorder %s9474_s7, %s6982_s29  ;;  %p6989_p7 = scmp.lt.u32.totalorder %s6982_s29, %s9474_s7 }
  0x4a   : > { %p6985_p3 = pnand %p6983_p2, %p7268_p0 }
  0x4c   : > { %p6986_p4 = pneg %p6985_p3 }
  0x4e   : > { %p6991_p8 = pnand %p6989_p7, %p6986_p4 }
  0x50   : > { %6994 = shalt.err (!%p6991_p8)
}
  0x51   : > { %s6995_s17 = scalar_lea.vmem %s369_s28, 24576  ;;  %p7003_p6 = scmp.lt.s32.totalorder %s369_s28, %s369_s28 }
  0x52   : > { %p6996_p11 = scmp.ne.s32.totalorder %s369_s28, %s6995_s17  ;;  %p7004_p9 = scmp.lt.s32.totalorder %s6995_s17, %s6995_s17 }
  0x54   : > { %p6998_p13 = pnand %p6996_p11, %p7268_p0  ;;  %p7005_p5 = por %p7004_p9, %p7003_p6 }
  0x56   : > { %p6999_p1 = pneg %p6998_p13 }
  0x58   : > { %p7006_p10 = pnand %p7005_p5, %p6999_p1 }
  0x5a   : > { %7009 = shalt.err (!%p7006_p10)
}
  0x5b   : > { %s7119_s20 = smov 256   ;;  %s7120_s30 = smov 16  }
  0x5c   : > { %6498 = dma.hbm_to_vmem [thread:$0]  (!%p7252_p12), %s9474_s7, 24576, %s369_s28, [#allocation6], %s7119_s20, %s7119_s20, %s7120_s30  }
  0x5d   : > { %s7121_s21 = smov [#allocation8]   ;;  %s7010_s16 = scalar_lea.hbm %s9476_s9, 1024 }
  0x5e   : > { %s384_s24 = sshll.u32 %s7121_s21, 4  ;;  %p7011_p5 = scmp.ne.s32.totalorder %s9476_s9, %s7010_s16  ;;  %s385_s24 = int_to_ptr.vmem [resolvable:$true] %s384_s24 }
  0x5f   : > { %p7017_p3 = scmp.lt.u32.totalorder %s7010_s16, %s9476_s9 }
  0x60   : > { %p7013_p10 = pnand %p7011_p5, %p7268_p0 }
  0x62   : > { %p7014_p2 = pneg %p7013_p10 }
  0x64   : > { %p7019_p4 = pnand %p7017_p3, %p7014_p2 }
  0x66   : > { %7022 = shalt.err (!%p7019_p4)
}
  0x67   : > { %s7023_s28 = scalar_lea.vmem %s385_s24, 1024  ;;  %p7031_p13 = scmp.lt.s32.totalorder %s385_s24, %s385_s24 }
  0x68   : > { %p7024_p7 = scmp.ne.s32.totalorder %s385_s24, %s7023_s28  ;;  %p7032_p1 = scmp.lt.s32.totalorder %s7023_s28, %s7023_s28 }
  0x6a   : > { %p7026_p8 = pnand %p7024_p7, %p7268_p0  ;;  %p7033_p6 = por %p7032_p1, %p7031_p13 }
  0x6c   : > { %p7027_p11 = pneg %p7026_p8 }
  0x6e   : > { %p7034_p9 = pnand %p7033_p6, %p7027_p11 }
  0x70   : > { %7037 = shalt.err (!%p7034_p9)
}
  0x71   : > { %s7122_s20 = smov 512   ;;  %s7123_s30 = smov 32  }
  0x72   : > { %6501 = dma.hbm_to_vmem [thread:$0]  (!%p7252_p12), %s9476_s9, 1024, %s385_s24, [#allocation9], %s7122_s20, %s7122_s20, %s7123_s30  }
  0x73   : > { %p9550_p5 = scmp.ne.s32.totalorder %s9547_s15, 0 }
  0x75   : > { %426 = sbr.rel (%p9550_p5) target bundleno = 1578 (0x62a), region = 68 }
  0x7c   : > { %p9551_p10 = scmp.eq.s32.totalorder %s7214_s25, 0 }
  0x7e   : > { %7083 = dma.done.wait (%p9551_p10), [#allocation3], 1024   ;;  %p9552_p0 = pmov %p9551_p10 }
  0x80   : > { %7085 = vsyncadd (%p9552_p0), [#allocation3], 4294966272  ;;  %p9553_p2 = pmov %p9552_p0 }
  0x81   : > { %p9554_p3 = pmov %p9552_p0 }
  0x82   : > { %7087 = dma.done.wait (%p9553_p2), [#allocation6], 25600  }
  0x83   : > { %7089 = vsyncadd (%p9554_p3), [#allocation6], 4294941696  ;;  %p9555_p4 = pmov %p9552_p0 }
  0x84   : > { %p9556_p12 = pmov %p9552_p0 }
  0x85   : > { %7091 = dma.done.wait (%p9555_p4), [#allocation9], 1024  }
  0x86   : > { %7093 = vsyncadd (%p9556_p12), [#allocation9], 4294966272  ;;  %s5625_s14 = sshll.u32 %s7214_s25, 4  ;;  %v7124_v0 = vmov 0   ;;  %v6562_v1 = vld [vmem:[#allocation2] sm:$0xff]   ;;  %v6563_v2 = vld [vmem:[#allocation2 + $0x8] sm:$0xff]  }
  0x87   : > { %p488_p7 = scmp.lt.s32.totalorder %s5625_s14, 31  ;;  %6560 = vset.pattern.permute.xlu0 %v7124_v0  ;;  %6561 = vset.pattern.permute.xlu1 %v7124_v0  ;;  %v6564_v3 = vld [vmem:[#allocation2 + $0x10] sm:$0xff]   ;;  %v6565_v4 = vld [vmem:[#allocation2 + $0x18] sm:$0xff]   ;;  %v6566_v6 = vld [vmem:[#allocation2 + $0x20] sm:$0xff]   ;;  %vm5136_vm5 = vcmask 1041409   ;;  %vm5138_vm6 = vcmask 1042434  }
  0x88   : > { %5991 = vmatprep.subr.bf16.mxu0 %v6562_v1  ;;  %v6567_v9 = vld [vmem:[#allocation2 + $0x28] sm:$0xff]   ;;  %v6568_v12 = vld [vmem:[#allocation2 + $0x30] sm:$0xff]   ;;  %v6569_v15 = vld [vmem:[#allocation2 + $0x38] sm:$0xff]   ;;  %vm5140_vm7 = vcmask 1043459   ;;  %vm5142_vm8 = vcmask 1044484   ;;  %vm5144_vm9 = vcmask 1045509  }
  0x89   : > { %s9748_s14 = smov (!%p488_p7, %s5625_s14), 31  ;;  %5992 = vmatpush3.bf16.msra.mxu0 %v6562_v1  ;;  %v6586_v42 = vld [vmem:[#allocation5] sm:$0xff]   ;;  %v6587_v46 = vld [vmem:[#allocation5 + $0x8] sm:$0xff]   ;;  %v6588_v50 = vld [vmem:[#allocation5 + $0x10] sm:$0xff]   ;;  %vm5146_vm10 = vcmask 1046534   ;;  %vm5148_vm11 = vcmask 1047559  }
  0x8a   : > { %s5896_s15 = sshll.u32 %s9748_s14, 3  ;;  %5993 = vmatprep.subr.bf16.mxu0 %v6563_v2  ;;  %s5897_s13 = sshll.u32 %s9748_s14, 4  ;;  %6039 = vmatprep.subr.bf16.mxu1 %v6586_v42  ;;  %v6589_v54 = vld [vmem:[#allocation5 + $0x18] sm:$0xff]   ;;  %v6590_v58 = vld [vmem:[#allocation5 + $0x20] sm:$0xff]   ;;  %v6591_v62 = vld [vmem:[#allocation5 + $0x28] sm:$0xff]  }
  0x8b   : > { %s7367_s24 = scalar_lea.vmem %s9467_s0, %s5896_s15  ;;  %s7373_s19 = scalar_lea.vmem %s9468_s1, %s5897_s13  ;;  %6040 = vmatpush3.bf16.msra.mxu1 %v6586_v42  ;;  %v6592_v63 = vld [vmem:[#allocation5 + $0x30] sm:$0xff]   ;;  %v6593_v0 = vld [vmem:[#allocation5 + $0x38] sm:$0xff]  }
  0x8c   : > { %v6570_v5 = vld [vmem:[%s7367_s24] sm:$0xff]   ;;  %v537_v8 = vld [vmem:[%s7373_s19 + $0x10] sm:$0xff]  ;;  %v536_v10 = vld [vmem:[%s7373_s19 + $0x8] sm:$0xff]  ;;  %6041 = vmatprep.subr.bf16.mxu1 %v6587_v46  ;;  %s484_s20 = sand.u32 1, %s7104_s22   ;;  %s9735_s18 = sld [smem:[#allocation20_spill]] }
  0x8d   : > { %5994 = vmatpush3.bf16.msra.mxu0 %v6563_v2  ;;  %6007 = vmatprep.mubr.bf16.mxu0 %v6570_v5  ;;  %v535_v7 = vld [vmem:[%s7373_s19] sm:$0xff]  ;;  %v538_v11 = vld [vmem:[%s7373_s19 + $0x18] sm:$0xff]  ;;  %v540_v14 = vld [vmem:[%s7373_s19 + $0x28] sm:$0xff]  ;;  %s5624_s30 = sshll.u32 %s484_s20, 4  ;;  %s5898_s21 = sshll.u32 %s7214_s25, 8 }
  0x8e   : > { %5995 = vmatprep.subr.bf16.mxu0 %v6564_v3  ;;  %586 = vperm.xlu0 %6560, %v535_v7   ;;  %v539_v13 = vld [vmem:[%s7373_s19 + $0x20] sm:$0xff]  ;;  %v541_v16 = vld [vmem:[%s7373_s19 + $0x30] sm:$0xff]  ;;  %v542_v17 = vld [vmem:[%s7373_s19 + $0x38] sm:$0xff]  ;;  %s486_s14 = scalar_lea.vmem [#allocation10], %s5624_s30  ;;  %s9736_s29 = sld [smem:[#allocation76_spill]] }
  0x8f   : > { %596 = vperm.xlu1 %6561, %v537_v8   ;;  %v543_v18 = vld [vmem:[%s7373_s19 + $0x40] sm:$0xff]  ;;  %v544_v19 = vld [vmem:[%s7373_s19 + $0x48] sm:$0xff]  ;;  %v6572_v21 = vld [vmem:[%s7367_s24 + $0x10] sm:$0xff]   ;;  %6042 = vmatpush3.bf16.msra.mxu1 %v6587_v46  ;;  %s5497_s15 = sshll.u32 %s486_s14, 4  ;;  %s7125_s25 = smov [#allocation10]   ;;  %s9419_s15 = int_to_ptr.vmem [resolvable:$true] %s5497_s15 }
  0x90   : > { %v6571_v20 = vld [vmem:[%s7367_s24 + $0x8] sm:$0xff]   ;;  %v545_v22 = vld [vmem:[%s7373_s19 + $0x50] sm:$0xff]  ;;  %v546_v23 = vld [vmem:[%s7373_s19 + $0x58] sm:$0xff]  ;;  %6043 = vmatprep.subr.bf16.mxu1 %v6588_v50  ;;  %s7038_s26 = scalar_lea.vmem %s9419_s15, 256  ;;  %s7042_s27 = sshll.u32 %s7125_s25, 4  ;;  %s7043_s27 = int_to_ptr.vmem [resolvable:$false] %s7042_s27 }
  0x91   : > { %5996 = vmatpush3.bf16.msra.mxu0 %v6564_v3  ;;  %v547_v24 = vld [vmem:[%s7373_s19 + $0x60] sm:$0xff]  ;;  %v548_v25 = vld [vmem:[%s7373_s19 + $0x68] sm:$0xff]  ;;  %v6573_v26 = vld [vmem:[%s7367_s24 + $0x18] sm:$0xff]   ;;  %p7039_p8 = scmp.ne.s32.totalorder %s9419_s15, %s7038_s26  ;;  %s7044_s17 = scalar_lea.vmem %s7043_s27, 512 }
  0x92   : > { %5997 = vmatprep.subr.bf16.mxu0 %v6565_v4  ;;  %591 = vperm.xlu0 %6560, %v536_v10   ;;  %v6574_v27 = vld [vmem:[%s7367_s24 + $0x20] sm:$0xff]   ;;  %v549_v28 = vld [vmem:[%s7373_s19 + $0x70] sm:$0xff]  ;;  %v550_v29 = vld [vmem:[%s7373_s19 + $0x78] sm:$0xff]  ;;  %p9737_p11 = scmp.ne.s32.totalorder %s9735_s18, 0  ;;  %p7045_p6 = scmp.lt.s32.totalorder %s9419_s15, %s7043_s27 }
  0x93   : > { %601 = vperm.xlu1 %6561, %v538_v11   ;;  %v551_v30 = vld [vmem:[%s7373_s19 + $0x80] sm:$0xff]  ;;  %v552_v31 = vld [vmem:[%s7373_s19 + $0x88] sm:$0xff]  ;;  %v6576_v33 = vld [vmem:[%s7367_s24 + $0x30] sm:$0xff]   ;;  %6044 = vmatpush3.bf16.msra.mxu1 %v6588_v50  ;;  %p7046_p9 = scmp.lt.s32.totalorder %s7044_s17, %s7038_s26 }
  0x94   : > { %v6575_v32 = vld [vmem:[%s7367_s24 + $0x28] sm:$0xff]   ;;  %v553_v34 = vld [vmem:[%s7373_s19 + $0x90] sm:$0xff]  ;;  %v554_v35 = vld [vmem:[%s7373_s19 + $0x98] sm:$0xff]  ;;  %6045 = vmatprep.subr.bf16.mxu1 %v6589_v54  ;;  %s9424_s16 = scalar_lea.hbm %s9736_s29, %s5898_s21  ;;  %p7040_p13 = pnand %p7039_p8, %p9737_p11 }
  0x95   : > { %5998 = vmatpush3.bf16.msra.mxu0 %v6565_v4  ;;  %v555_v36 = vld [vmem:[%s7373_s19 + $0xa0] sm:$0xff]  ;;  %v556_v37 = vld [vmem:[%s7373_s19 + $0xa8] sm:$0xff]  ;;  %v6577_v38 = vld [vmem:[%s7367_s24 + $0x38] sm:$0xff]   ;;  %p7047_p5 = por %p7046_p9, %p7045_p6 }
  0x96   : > { %5999 = vmatprep.subr.bf16.mxu0 %v6566_v6  ;;  %606 = vperm.xlu0 %6560, %v539_v13   ;;  %v6578_v39 = vld [vmem:[%s7367_s24 + $0x40] sm:$0xff]   ;;  %v557_v40 = vld [vmem:[%s7373_s19 + $0xb0] sm:$0xff]  ;;  %v558_v41 = vld [vmem:[%s7373_s19 + $0xb8] sm:$0xff]  ;;  %p7041_p1 = pneg %p7040_p13 }
  0x97   : > { %611 = vperm.xlu1 %6561, %v540_v14   ;;  %v559_v43 = vld [vmem:[%s7373_s19 + $0xc0] sm:$0xff]  ;;  %v560_v44 = vld [vmem:[%s7373_s19 + $0xc8] sm:$0xff]  ;;  %v6580_v47 = vld [vmem:[%s7367_s24 + $0x50] sm:$0xff]   ;;  %6046 = vmatpush3.bf16.msra.mxu1 %v6589_v54 }
  0x98   : > { %v6579_v45 = vld [vmem:[%s7367_s24 + $0x48] sm:$0xff]   ;;  %v561_v48 = vld [vmem:[%s7373_s19 + $0xd0] sm:$0xff]  ;;  %v562_v49 = vld [vmem:[%s7373_s19 + $0xd8] sm:$0xff]  ;;  %6047 = vmatprep.subr.bf16.mxu1 %v6590_v58  ;;  %p7048_p10 = pnand %p7047_p5, %p7041_p1 }
  0x99   : > { %6000 = vmatpush3.bf16.msra.mxu0 %v6566_v6  ;;  %v563_v51 = vld [vmem:[%s7373_s19 + $0xe0] sm:$0xff]  ;;  %v564_v52 = vld [vmem:[%s7373_s19 + $0xe8] sm:$0xff]  ;;  %v6581_v53 = vld [vmem:[%s7367_s24 + $0x58] sm:$0xff]  }
  0x9a   : > { %6001 = vmatprep.subr.bf16.mxu0 %v6567_v9  ;;  %616 = vperm.xlu0 %6560, %v541_v16   ;;  %v6582_v55 = vld [vmem:[%s7367_s24 + $0x60] sm:$0xff]   ;;  %v565_v56 = vld [vmem:[%s7373_s19 + $0xf0] sm:$0xff]  ;;  %v566_v57 = vld [vmem:[%s7373_s19 + $0xf8] sm:$0xff]  ;;  %s9426_s19 = scalar_lea.sflag [#allocation4], %s484_s20 }
  0x9b   : > { %621 = vperm.xlu1 %6561, %v542_v17   ;;  %v6583_v59 = vld [vmem:[%s7367_s24 + $0x68] sm:$0xff]   ;;  %6048 = vmatpush3.bf16.msra.mxu1 %v6590_v58  ;;  %v6584_v60 = vld [vmem:[%s7367_s24 + $0x70] sm:$0xff]   ;;  %v6585_v61 = vld [vmem:[%s7367_s24 + $0x78] sm:$0xff]  }
  0x9c   : > { %6049 = vmatprep.subr.bf16.mxu1 %v6591_v62  ;;  %v6594_v1 = vld [vmem:[#allocation7] ss:$16 sps:$4 sm:$0xff]   ;;  %v6596_v2 = vld [vmem:[#allocation7 + $0x4] ss:$16 sps:$4 sm:$0xff]   ;;  %v6599_v3 = vld [vmem:[#allocation7 + $0xc] ss:$16 sps:$4 sm:$0xff]  }
  0x9d   : > { %6002 = vmatpush3.bf16.msra.mxu0 %v6567_v9  ;;  %v6602_v4 = vld [vmem:[#allocation7 + $0x24] ss:$16 sps:$4 sm:$0xff]   ;;  %v6600_v5 = vld [vmem:[#allocation7 + $0x20] ss:$16 sps:$4 sm:$0xff]  }
  0x9e   : > { %6003 = vmatprep.subr.bf16.mxu0 %v6568_v12  ;;  %626 = vperm.xlu0 %6560, %v543_v18   ;;  %v6608_v6 = vld [vmem:[#allocation7 + $0x44] ss:$16 sps:$4 sm:$0xff]   ;;  %v6606_v7 = vld [vmem:[#allocation7 + $0x40] ss:$16 sps:$4 sm:$0xff]  }
  0x9f   : > { %631 = vperm.xlu1 %6561, %v544_v19   ;;  %6050 = vmatpush3.bf16.msra.mxu1 %v6591_v62  ;;  %v6614_v8 = vld [vmem:[#allocation7 + $0x64] ss:$16 sps:$4 sm:$0xff]   ;;  %v6612_v9 = vld [vmem:[#allocation7 + $0x60] ss:$16 sps:$4 sm:$0xff]  }
  0xa0   : > { %6051 = vmatprep.subr.bf16.mxu1 %v6592_v63  ;;  %v6620_v10 = vld [vmem:[#allocation7 + $0x84] ss:$16 sps:$4 sm:$0xff]   ;;  %v6618_v11 = vld [vmem:[#allocation7 + $0x80] ss:$16 sps:$4 sm:$0xff]  }
  0xa1   : > { %6004 = vmatpush3.bf16.msra.mxu0 %v6568_v12  ;;  %v6626_v12 = vld [vmem:[#allocation7 + $0xa4] ss:$16 sps:$4 sm:$0xff]   ;;  %v6624_v13 = vld [vmem:[#allocation7 + $0xa0] ss:$16 sps:$4 sm:$0xff]  }
  0xa2   : > { %6005 = vmatprep.subr.bf16.mxu0 %v6569_v15  ;;  %636 = vperm.xlu0 %6560, %v545_v22   ;;  %v6632_v14 = vld [vmem:[#allocation7 + $0xc4] ss:$16 sps:$4 sm:$0xff]   ;;  %v6630_v17 = vld [vmem:[#allocation7 + $0xc0] ss:$16 sps:$4 sm:$0xff]  }
  0xa3   : > { %641 = vperm.xlu1 %6561, %v546_v23   ;;  %6052 = vmatpush3.bf16.msra.mxu1 %v6592_v63  ;;  %v6638_v18 = vld [vmem:[#allocation7 + $0xe4] ss:$16 sps:$4 sm:$0xff]   ;;  %v6642_v23 = vld [vmem:[#allocation7 + $0x100] ss:$16 sps:$4 sm:$0xff]  }
  0xa4   : > { %6053 = vmatprep.subr.bf16.mxu1 %v6593_v0 }
  0xa5   : > { %6006 = vmatpush3.bf16.msra.mxu0 %v6569_v15 }
  0xa6   : > { %646 = vperm.xlu0 %6560, %v547_v24   ;;  %3003 = vmatprep.subr.bf16.mxu0 %v6596_v2  ;;  %v6650_v24 = vld [vmem:[#allocation7 + $0x124] ss:$16 sps:$4 sm:$0xff]  }
  0xa7   : > { %651 = vperm.xlu1 %6561, %v548_v25   ;;  %6054 = vmatpush3.bf16.msra.mxu1 %v6593_v0 }
  0xa8   : > { %6008 = vmatmul.mubr.bf16.vlgmr.msra.gmra.mrb[0].mxu0 %v6571_v20  ;;  %3582 = vmatprep.subr.bf16.mxu1 %v6599_v3  ;;  %v6636_v20 = vld [vmem:[#allocation7 + $0xe0] ss:$16 sps:$4 sm:$0xff]  }
  0xa9   : > { %6011 = vmatprep.mubr.bf16.mxu0 %v6572_v21  ;;  %3004 = vmatpush1.bf16.msra.mxu0 %v6594_v1  ;;  %v6644_v21 = vld [vmem:[#allocation7 + $0x104] ss:$16 sps:$4 sm:$0xff]  }
  0xaa   : > { %656 = vperm.xlu0 %6560, %v549_v28   ;;  %3005 = vmatprep.subr.bf16.mxu0 %v6602_v4  ;;  %v6656_v28 = vld [vmem:[#allocation7 + $0x144] ss:$16 sps:$4 sm:$0xff]  }
  0xab   : > { %661 = vperm.xlu1 %6561, %v550_v29  }
  0xad   : > { %3006 = vmatpush1.bf16.msra.mxu0 %v6600_v5 }
  0xae   : > { %666 = vperm.xlu0 %6560, %v551_v30   ;;  %3007 = vmatprep.subr.bf16.mxu0 %v6608_v6  ;;  %v6654_v30 = vld [vmem:[#allocation7 + $0x140] ss:$16 sps:$4 sm:$0xff]  }
  0xaf   : > { %671 = vperm.xlu1 %6561, %v552_v31   ;;  %v6662_v31 = vld [vmem:[#allocation7 + $0x164] ss:$16 sps:$4 sm:$0xff]  }
  0xb0   : > { %6012 = vmatmul.mubr.bf16.gmra.mrb[4].mxu0 %v6573_v26 }
  0xb1   : > { %6015 = vmatprep.mubr.bf16.mxu0 %v6574_v27  ;;  %3008 = vmatpush1.bf16.msra.mxu0 %v6606_v7  ;;  %v6648_v27 = vld [vmem:[#allocation7 + $0x120] ss:$16 sps:$4 sm:$0xff]  }
  0xb2   : > { %676 = vperm.xlu0 %6560, %v553_v34   ;;  %3009 = vmatprep.subr.bf16.mxu0 %v6614_v8  ;;  %v6668_v34 = vld [vmem:[#allocation7 + $0x184] ss:$16 sps:$4 sm:$0xff]  }
  0xb3   : > { %681 = vperm.xlu1 %6561, %v554_v35  }
  0xb5   : > { %3010 = vmatpush1.bf16.msra.mxu0 %v6612_v9 }
  0xb6   : > { %686 = vperm.xlu0 %6560, %v555_v36   ;;  %3011 = vmatprep.subr.bf16.mxu0 %v6620_v10 }
  0xb7   : > { %691 = vperm.xlu1 %6561, %v556_v37   ;;  %v6666_v37 = vld [vmem:[#allocation7 + $0x180] ss:$16 sps:$4 sm:$0xff]  }
  0xb8   : > { %6016 = vmatmul.mubr.bf16.gmra.mrb[8].mxu0 %v6575_v32 }
  0xb9   : > { %6019 = vmatprep.mubr.bf16.mxu0 %v6576_v33  ;;  %3012 = vmatpush1.bf16.msra.mxu0 %v6618_v11  ;;  %v6660_v33 = vld [vmem:[#allocation7 + $0x160] ss:$16 sps:$4 sm:$0xff]  }
  0xba   : > { %696 = vperm.xlu0 %6560, %v557_v40   ;;  %3013 = vmatprep.subr.bf16.mxu0 %v6626_v12  ;;  %v6672_v40 = vld [vmem:[#allocation7 + $0x1a0] ss:$16 sps:$4 sm:$0xff]  }
  0xbb   : > { %701 = vperm.xlu1 %6561, %v558_v41   ;;  %v7429_v41 = vld [vmem:[%s9470_s3] ss:$0 sm:$0xff] }
  0xbd   : > { %3014 = vmatpush1.bf16.msra.mxu0 %v6624_v13 }
  0xbe   : > { %706 = vperm.xlu0 %6560, %v559_v43   ;;  %3015 = vmatprep.subr.bf16.mxu0 %v6632_v14 }
  0xbf   : > { %711 = vperm.xlu1 %6561, %v560_v44  }
  0xc0   : > { %6020 = vmatmul.mubr.bf16.gmra.mrb[12].mxu0 %v6577_v38  ;;  %v6674_v38 = vld [vmem:[#allocation7 + $0x1a4] ss:$16 sps:$4 sm:$0xff]  }
  0xc1   : > { %6023 = vmatprep.mubr.bf16.mxu0 %v6578_v39  ;;  %3016 = vmatpush1.bf16.msra.mxu0 %v6630_v17 }
  0xc2   : > { %716 = vperm.xlu0 %6560, %v561_v48   ;;  %3017 = vmatprep.subr.bf16.mxu0 %v6638_v18  ;;  %v7442_v48 = vld [vmem:[%s9471_s4] ss:$0 sm:$0xff] }
  0xc3   : > { %721 = vperm.xlu1 %6561, %v562_v49  }
  0xc5   : > { %3018 = vmatpush1.bf16.msra.mxu0 %v6636_v20  ;;  %v6605_v20 = vld [vmem:[#allocation7 + $0x2c] ss:$16 sps:$4 sm:$0xff]  }
  0xc6   : > { %726 = vperm.xlu0 %6560, %v563_v51   ;;  %3019 = vmatprep.subr.bf16.mxu0 %v6644_v21 }
  0xc7   : > { %731 = vperm.xlu1 %6561, %v564_v52  }
  0xc8   : > { %6024 = vmatmul.mubr.bf16.gmra.mrb[16].mxu0 %v6579_v45 }
  0xc9   : > { %6027 = vmatprep.mubr.bf16.mxu0 %v6580_v47  ;;  %3020 = vmatpush1.bf16.msra.mxu0 %v6642_v23 }
  0xca   : > { %736 = vperm.xlu0 %6560, %v565_v56   ;;  %3021 = vmatprep.subr.bf16.mxu0 %v6650_v24 }
  0xcb   : > { %741 = vperm.xlu1 %6561, %v566_v57  }
  0xcd   : > { %3022 = vmatpush1.bf16.msra.mxu0 %v6648_v27 }
  0xce   : > { %3023 = vmatprep.subr.bf16.mxu0 %v6656_v28 }
  0xd0   : > { %6028 = vmatmul.mubr.bf16.gmra.mrb[20].mxu0 %v6581_v53 }
  0xd1   : > { %6031 = vmatprep.mubr.bf16.mxu0 %v6582_v55  ;;  %3024 = vmatpush1.bf16.msra.mxu0 %v6654_v30  ;;  %v6611_v30 = vld [vmem:[#allocation7 + $0x4c] ss:$16 sps:$4 sm:$0xff]  }
  0xd2   : > { %3025 = vmatprep.subr.bf16.mxu0 %v6662_v31 }
  0xd5   : > { %3026 = vmatpush1.bf16.msra.mxu0 %v6660_v33 }
  0xd6   : > { %3027 = vmatprep.subr.bf16.mxu0 %v6668_v34 }
  0xd8   : > { %6032 = vmatmul.mubr.bf16.gmra.mrb[24].mxu0 %v6583_v59 }
  0xd9   : > { %6035 = vmatprep.mubr.bf16.mxu0 %v6584_v60  ;;  %3028 = vmatpush1.bf16.msra.mxu0 %v6666_v37 }
  0xda   : > { %3029 = vmatprep.subr.bf16.mxu0 %v6674_v38 }
  0xdd   : > { %3030 = vmatpush1.bf16.msra.mxu0 %v6672_v40 }
  0xe0   : > { %6036 = vmatmul.mubr.bf16.gmra.mrb[28].mxu0 %v6585_v61 }
 0x10d   : > { %v587_v15 = vpop.permute.xlu0 %586 }
 0x10e   : > { %v597_v16 = vpop.permute.xlu1 %596  ;;  %v750_v45 = vmul.f32 %v7429_v41, %v587_v15 }
 0x10f   : > { %v752_v43 = vmul.f32 %v7429_v41, %v597_v16  ;;  %v6597_v16 = vld [vmem:[#allocation7 + $0x8] ss:$16 sps:$4 sm:$0xff]  }
 0x111   : > { %v592_v19 = vpop.permute.xlu0 %591 }
 0x112   : > { %v602_v22 = vpop.permute.xlu1 %601  ;;  %v751_v52 = vmul.f32 %v7429_v41, %v592_v19 }
 0x113   : > { %v753_v49 = vmul.f32 %v7429_v41, %v602_v22 }
 0x115   : > { %v607_v25 = vpop.permute.xlu0 %606 }
 0x116   : > { %v612_v26 = vpop.permute.xlu1 %611  ;;  %v754_v3 = vmul.f32 %v7429_v41, %v607_v25 }
 0x117   : > { %v755_v11 = vmul.f32 %v7429_v41, %v612_v26  ;;  %v6603_v26 = vld [vmem:[#allocation7 + $0x28] ss:$16 sps:$4 sm:$0xff]  }
 0x119   : > { %v617_v29 = vpop.permute.xlu0 %616 }
 0x11a   : > { %v622_v32 = vpop.permute.xlu1 %621  ;;  %v756_v0 = vmul.f32 %v7429_v41, %v617_v29 }
 0x11b   : > { %v757_v7 = vmul.f32 %v7429_v41, %v622_v32 }
 0x11d   : > { %v7422_v35 = vpop.permute.xlu0 %626 }
 0x11e   : > { %v7424_v36 = vpop.permute.xlu1 %631  ;;  %v758_v31 = vmul.f32 %v7429_v41, %v7422_v35  ;;  %v6609_v35 = vld [vmem:[#allocation7 + $0x48] ss:$16 sps:$4 sm:$0xff]  }
 0x121   : > { %v637_v39 = vpop.permute.xlu0 %636 }
 0x122   : > { %v7431_v42 = vpop.permute.xlu1 %641  ;;  %v760_v27 = vmul.f32 %v7429_v41, %v637_v39  ;;  %v759_v39 = vmul.f32 %v7429_v41, %v7424_v36 }
 0x123   : > { %v761_v38 = vmul.f32 %v7429_v41, %v7431_v42 }
 0x125   : > { %v7434_v44 = vpop.permute.xlu0 %646 }
 0x126   : > { %v7437_v46 = vpop.permute.xlu1 %651 }
 0x129   : > { %v7447_v58 = vpop.permute.xlu0 %656 }
 0x12a   : > { %v7451_v62 = vpop.permute.xlu1 %661 }
 0x12d   : > { %v7458_v12 = vpop.permute.xlu0 %666 }
 0x12e   : > { %v7461_v21 = vpop.permute.xlu1 %671 }
 0x131   : > { %v7469_v32 = vpop.permute.xlu0 %676 }
 0x135   : > { %v7480_v36 = vpop.permute.xlu0 %686 }
 0x17b   : > { %v6009_v47 = vpop.f32.mrb[0].mxu0 }
 0x17c   : > { %v969_v50 = vadd.f32 %v6009_v47, %v752_v43  ;;  %v960_v51 = vpop.f32.mrb[1].mxu0  ;;  %v7475_v47 = vpop.permute.xlu1 %681 }
 0x17d   : > { %v961_v53 = vadd.f32 %v960_v51, %v750_v45  ;;  %v6010_v54 = vpop.f32.mrb[2].mxu0 }
 0x17e   : > { %v1096_v55 = vadd.f32 %v7442_v48, %v969_v50  ;;  %v972_v56 = vadd.f32 %v6010_v54, %v753_v49  ;;  %v963_v57 = vpop.f32.mrb[3].mxu0 }
 0x17f   : > { %v964_v59 = vadd.f32 %v963_v57, %v751_v52  ;;  %v1094_v60 = vadd.f32 %v7442_v48, %v961_v53 }
 0x180   : > { %v1097_v61 = vadd.f32 %v7442_v48, %v972_v56  ;;  %v1128_v1 = vmax.f32 %v1096_v55, 0.0  ;;  %v6617_v55 = vld [vmem:[#allocation7 + $0x6c] ss:$16 sps:$4 sm:$0xff]  }
 0x181   : > { %v1095_v63 = vadd.f32 %v7442_v48, %v964_v59  ;;  %v1126_v5 = vmax.f32 %v1094_v60, 0.0  ;;  %v6615_v60 = vld [vmem:[#allocation7 + $0x68] ss:$16 sps:$4 sm:$0xff]  }
 0x182   : > { %v1129_v2 = vmax.f32 %v1097_v61, 0.0  ;;  %v764_v61 = vmul.f32 %v7429_v41, %v7447_v58  ;;  %v763_v58 = vmul.f32 %v7429_v41, %v7437_v46 }
 0x183   : > { %v6013_v4 = vpop.f32.mrb[4].mxu0  ;;  %v1127_v6 = vmax.f32 %v1095_v63, 0.0 }
 0x184   : > { %v985_v8 = vadd.f32 %v6013_v4, %v756_v0  ;;  %v976_v9 = vpop.f32.mrb[5].mxu0  ;;  %v1159_v10 = vpack.c.bf16 %v1129_v2, %v1128_v1  ;;  %v6623_v1 = vld [vmem:[#allocation7 + $0x8c] ss:$16 sps:$4 sm:$0xff]   ;;  %v762_v2 = vmul.f32 %v7429_v41, %v7434_v44 }
 0x185   : > { %v977_v13 = vadd.f32 %v976_v9, %v754_v3  ;;  %v6014_v14 = vpop.f32.mrb[6].mxu0  ;;  %v1158_v15 = vpack.c.bf16 %v1127_v6, %v1126_v5  ;;  %v7487_v3 = vpop.permute.xlu1 %691 }
 0x186   : > { %v1100_v17 = vadd.f32 %v7442_v48, %v985_v8  ;;  %v988_v18 = vadd.f32 %v6014_v14, %v757_v7  ;;  %v979_v19 = vpop.f32.mrb[7].mxu0  ;;  %v765_v7 = vmul.f32 %v7429_v41, %v7451_v62 }
 0x187   : > { %v1098_v22 = vadd.f32 %v7442_v48, %v977_v13  ;;  %v980_v23 = vadd.f32 %v979_v19, %v755_v11  ;;  %6055 = vmatprep.mubr.bf16.mxu1 %v1158_v15  ;;  %v6621_v15 = vld [vmem:[#allocation7 + $0x88] ss:$16 sps:$4 sm:$0xff]   ;;  %v697_v19 = vpop.permute.xlu0 %696 }
 0x188   : > { %v1101_v24 = vadd.f32 %v7442_v48, %v988_v18  ;;  %6056 = vmatmul.mubr.bf16.vlgmr.msra.gmra.mrb[0].mxu1 %v1159_v10  ;;  %v1132_v28 = vmax.f32 %v1100_v17, 0.0  ;;  %v6629_v18 = vld [vmem:[#allocation7 + $0xac] ss:$16 sps:$4 sm:$0xff]  }
 0x189   : > { %v1099_v25 = vadd.f32 %v7442_v48, %v980_v23  ;;  %3583 = vmatpush1.bf16.msra.mxu1 %v6597_v16  ;;  %v1130_v33 = vmax.f32 %v1098_v22, 0.0  ;;  %v702_v46 = vpop.permute.xlu1 %701 }
 0x18a   : > { %v1133_v29 = vmax.f32 %v1101_v24, 0.0  ;;  %3584 = vmatprep.subr.bf16.mxu1 %v6605_v20  ;;  %v6627_v24 = vld [vmem:[#allocation7 + $0xa8] ss:$16 sps:$4 sm:$0xff]  }
 0x18b   : > { %v1131_v34 = vmax.f32 %v1099_v25, 0.0  ;;  %v6017_v37 = vpop.f32.mrb[8].mxu0  ;;  %v768_v25 = vmul.f32 %v7429_v41, %v7469_v32  ;;  %v707_v32 = vpop.permute.xlu0 %706 }
 0x18c   : > { %v1001_v40 = vadd.f32 %v6017_v37, %v760_v27  ;;  %v992_v43 = vpop.f32.mrb[9].mxu0  ;;  %v1161_v45 = vpack.c.bf16 %v1133_v29, %v1132_v28  ;;  %v6635_v28 = vld [vmem:[#allocation7 + $0xcc] ss:$16 sps:$4 sm:$0xff]   ;;  %v766_v29 = vmul.f32 %v7429_v41, %v7458_v12 }
 0x18d   : > { %v993_v49 = vadd.f32 %v992_v43, %v758_v31  ;;  %v6018_v50 = vpop.f32.mrb[10].mxu0  ;;  %v1160_v51 = vpack.c.bf16 %v1131_v34, %v1130_v33  ;;  %3585 = vmatpush1.bf16.msra.mxu1 %v6603_v26  ;;  %v769_v34 = vmul.f32 %v7429_v41, %v7475_v47  ;;  %v767_v43 = vmul.f32 %v7429_v41, %v7461_v21 }
 0x18e   : > { %v1104_v52 = vadd.f32 %v7442_v48, %v1001_v40  ;;  %v1004_v53 = vadd.f32 %v6018_v50, %v761_v38  ;;  %v995_v54 = vpop.f32.mrb[11].mxu0  ;;  %3586 = vmatprep.subr.bf16.mxu1 %v6611_v30  ;;  %v6633_v50 = vld [vmem:[#allocation7 + $0xc8] ss:$16 sps:$4 sm:$0xff]  }
 0x18f   : > { %v1102_v42 = vadd.f32 %v7442_v48, %v993_v49  ;;  %v996_v56 = vadd.f32 %v995_v54, %v759_v39  ;;  %6059 = vmatprep.mubr.bf16.mxu1 %v1160_v51 }
 0x190   : > { %v1105_v57 = vadd.f32 %v7442_v48, %v1004_v53  ;;  %6060 = vmatmul.mubr.bf16.gmra.mrb[4].mxu1 %v1161_v45  ;;  %v1136_v63 = vmax.f32 %v1104_v52, 0.0  ;;  %v6641_v52 = vld [vmem:[#allocation7 + $0xec] ss:$16 sps:$4 sm:$0xff]   ;;  %v712_v53 = vpop.permute.xlu1 %711 }
 0x191   : > { %v1103_v59 = vadd.f32 %v7442_v48, %v996_v56  ;;  %3587 = vmatpush1.bf16.msra.mxu1 %v6609_v35  ;;  %v1134_v4 = vmax.f32 %v1102_v42, 0.0  ;;  %v6639_v42 = vld [vmem:[#allocation7 + $0xe8] ss:$16 sps:$4 sm:$0xff]   ;;  %v772_v56 = vmul.f32 %v7429_v41, %v697_v19 }
 0x192   : > { %v1137_v0 = vmax.f32 %v1105_v57, 0.0  ;;  %3588 = vmatprep.subr.bf16.mxu1 %v6617_v55 }
 0x193   : > { %v1135_v5 = vmax.f32 %v1103_v59, 0.0  ;;  %v6021_v6 = vpop.f32.mrb[12].mxu0 }
 0x194   : > { %v1017_v8 = vadd.f32 %v6021_v6, %v764_v61  ;;  %v1008_v9 = vpop.f32.mrb[13].mxu0  ;;  %v1163_v10 = vpack.c.bf16 %v1137_v0, %v1136_v63  ;;  %v770_v61 = vmul.f32 %v7429_v41, %v7480_v36  ;;  %v717_v63 = vpop.permute.xlu0 %716 }
 0x195   : > { %v1009_v11 = vadd.f32 %v1008_v9, %v762_v2  ;;  %v6022_v13 = vpop.f32.mrb[14].mxu0  ;;  %v1162_v14 = vpack.c.bf16 %v1135_v5, %v1134_v4  ;;  %3589 = vmatpush1.bf16.msra.mxu1 %v6615_v60  ;;  %v6647_v60 = vld [vmem:[#allocation7 + $0x10c] ss:$16 sps:$4 sm:$0xff]   ;;  %v773_v4 = vmul.f32 %v7429_v41, %v702_v46  ;;  %v722_v9 = vpop.permute.xlu1 %721 }
 0x196   : > { %v1108_v44 = vadd.f32 %v7442_v48, %v1017_v8  ;;  %v1020_v16 = vadd.f32 %v6022_v13, %v765_v7  ;;  %v1011_v17 = vpop.f32.mrb[15].mxu0  ;;  %3590 = vmatprep.subr.bf16.mxu1 %v6623_v1  ;;  %v771_v8 = vmul.f32 %v7429_v41, %v7487_v3  ;;  %v6645_v13 = vld [vmem:[#allocation7 + $0x108] ss:$16 sps:$4 sm:$0xff]  }
 0x197   : > { %v1106_v62 = vadd.f32 %v7442_v48, %v1009_v11  ;;  %v1012_v20 = vadd.f32 %v1011_v17, %v763_v58  ;;  %6063 = vmatprep.mubr.bf16.mxu1 %v1162_v14 }
 0x198   : > { %v1109_v22 = vadd.f32 %v7442_v48, %v1020_v16  ;;  %6064 = vmatmul.mubr.bf16.gmra.mrb[8].mxu1 %v1163_v10  ;;  %v1140_v26 = vmax.f32 %v1108_v44, 0.0  ;;  %v6653_v44 = vld [vmem:[#allocation7 + $0x12c] ss:$16 sps:$4 sm:$0xff]   ;;  %v727_v3 = vpop.permute.xlu0 %726 }
 0x199   : > { %v1107_v23 = vadd.f32 %v7442_v48, %v1012_v20  ;;  %3591 = vmatpush1.bf16.msra.mxu1 %v6621_v15  ;;  %v1138_v30 = vmax.f32 %v1106_v62, 0.0  ;;  %v6651_v62 = vld [vmem:[#allocation7 + $0x128] ss:$16 sps:$4 sm:$0xff]   ;;  %v776_v20 = vmul.f32 %v7429_v41, %v717_v63 }
 0x19a   : > { %v1141_v27 = vmax.f32 %v1109_v22, 0.0  ;;  %3592 = vmatprep.subr.bf16.mxu1 %v6629_v18 }
 0x19b   : > { %v1139_v31 = vmax.f32 %v1107_v23, 0.0  ;;  %v6025_v33 = vpop.f32.mrb[16].mxu0  ;;  %v6659_v23 = vld [vmem:[#allocation7 + $0x14c] ss:$16 sps:$4 sm:$0xff]  }
 0x19c   : > { %v1033_v37 = vadd.f32 %v6025_v33, %v768_v25  ;;  %v1024_v38 = vpop.f32.mrb[17].mxu0  ;;  %v1165_v40 = vpack.c.bf16 %v1141_v27, %v1140_v26  ;;  %v732_v25 = vpop.permute.xlu1 %731 }
 0x19d   : > { %v1025_v45 = vadd.f32 %v1024_v38, %v766_v29  ;;  %v6026_v39 = vpop.f32.mrb[18].mxu0  ;;  %v1164_v49 = vpack.c.bf16 %v1139_v31, %v1138_v30  ;;  %3593 = vmatpush1.bf16.msra.mxu1 %v6627_v24  ;;  %v774_v24 = vmul.f32 %v7429_v41, %v707_v32  ;;  %v777_v29 = vmul.f32 %v7429_v41, %v722_v9 }
 0x19e   : > { %v1112_v12 = vadd.f32 %v7442_v48, %v1033_v37  ;;  %v1036_v51 = vadd.f32 %v6026_v39, %v769_v34  ;;  %v1027_v35 = vpop.f32.mrb[19].mxu0  ;;  %3594 = vmatprep.subr.bf16.mxu1 %v6635_v28  ;;  %v775_v34 = vmul.f32 %v7429_v41, %v712_v53 }
 0x19f   : > { %v1110_v47 = vadd.f32 %v7442_v48, %v1025_v45  ;;  %v1028_v54 = vadd.f32 %v1027_v35, %v767_v43  ;;  %6067 = vmatprep.mubr.bf16.mxu1 %v1164_v49  ;;  %v6657_v43 = vld [vmem:[#allocation7 + $0x148] ss:$16 sps:$4 sm:$0xff]   ;;  %v6665_v49 = vld [vmem:[#allocation7 + $0x16c] ss:$16 sps:$4 sm:$0xff]  }
 0x1a0   : > { %v1113_v55 = vadd.f32 %v7442_v48, %v1036_v51  ;;  %6068 = vmatmul.mubr.bf16.gmra.mrb[12].mxu1 %v1165_v40  ;;  %v1144_v57 = vmax.f32 %v1112_v12, 0.0 }
 0x1a1   : > { %v1111_v21 = vadd.f32 %v7442_v48, %v1028_v54  ;;  %3595 = vmatpush1.bf16.msra.mxu1 %v6633_v50  ;;  %v1142_v0 = vmax.f32 %v1110_v47, 0.0  ;;  %v737_v50 = vpop.permute.xlu0 %736  ;;  %v6663_v47 = vld [vmem:[#allocation7 + $0x168] ss:$16 sps:$4 sm:$0xff]  }
 0x1a2   : > { %v1145_v59 = vmax.f32 %v1113_v55, 0.0  ;;  %3596 = vmatprep.subr.bf16.mxu1 %v6641_v52  ;;  %v742_v52 = vpop.permute.xlu1 %741  ;;  %v780_v54 = vmul.f32 %v7429_v41, %v737_v50 }
 0x1a3   : > { %v1143_v1 = vmax.f32 %v1111_v21, 0.0  ;;  %v6029_v2 = vpop.f32.mrb[20].mxu0 }
 0x1a4   : > { %v1049_v5 = vadd.f32 %v6029_v2, %v772_v56  ;;  %v1040_v6 = vpop.f32.mrb[21].mxu0  ;;  %v1167_v7 = vpack.c.bf16 %v1145_v59, %v1144_v57  ;;  %v778_v56 = vmul.f32 %v7429_v41, %v727_v3  ;;  %v779_v2 = vmul.f32 %v7429_v41, %v732_v25  ;;  %v6675_v3 = vld [vmem:[#allocation7 + $0x1a8] ss:$16 sps:$4 sm:$0xff]   ;;  %v6692_v25 = vld [vmem:[#allocation7 + $0x204] ss:$16 sps:$4 sm:$0xff]  }
 0x1a5   : > { %v1041_v10 = vadd.f32 %v1040_v6, %v770_v61  ;;  %v6030_v58 = vpop.f32.mrb[22].mxu0  ;;  %v1166_v11 = vpack.c.bf16 %v1143_v1, %v1142_v0  ;;  %3597 = vmatpush1.bf16.msra.mxu1 %v6639_v42  ;;  %v6671_v42 = vld [vmem:[#allocation7 + $0x18c] ss:$16 sps:$4 sm:$0xff]   ;;  %v781_v61 = vmul.f32 %v7429_v41, %v742_v52  ;;  %v6690_v52 = vld [vmem:[#allocation7 + $0x200] ss:$16 sps:$4 sm:$0xff]  }
 0x1a6   : > { %v1116_v36 = vadd.f32 %v7442_v48, %v1049_v5  ;;  %v1052_v14 = vadd.f32 %v6030_v58, %v773_v4  ;;  %v1043_v15 = vpop.f32.mrb[23].mxu0  ;;  %3598 = vmatprep.subr.bf16.mxu1 %v6647_v60 }
 0x1a7   : > { %v1114_v16 = vadd.f32 %v7442_v48, %v1041_v10  ;;  %v1044_v17 = vadd.f32 %v1043_v15, %v771_v8  ;;  %6071 = vmatprep.mubr.bf16.mxu1 %v1166_v11 }
 0x1a8   : > { %v1117_v18 = vadd.f32 %v7442_v48, %v1052_v14  ;;  %6072 = vmatmul.mubr.bf16.gmra.mrb[16].mxu1 %v1167_v7  ;;  %v1148_v22 = vmax.f32 %v1116_v36, 0.0  ;;  %v6669_v7 = vld [vmem:[#allocation7 + $0x188] ss:$16 sps:$4 sm:$0xff]  }
 0x1a9   : > { %v1115_v19 = vadd.f32 %v7442_v48, %v1044_v17  ;;  %3599 = vmatpush1.bf16.msra.mxu1 %v6645_v13  ;;  %v1146_v26 = vmax.f32 %v1114_v16, 0.0 }
 0x1aa   : > { %v1149_v46 = vmax.f32 %v1117_v18, 0.0  ;;  %3600 = vmatprep.subr.bf16.mxu1 %v6653_v44  ;;  %v6677_v18 = vld [vmem:[#allocation7 + $0x1ac] ss:$16 sps:$4 sm:$0xff]  }
 0x1ab   : > { %v1147_v27 = vmax.f32 %v1115_v19, 0.0  ;;  %v6033_v28 = vpop.f32.mrb[24].mxu0  ;;  %v6680_v19 = vld [vmem:[#allocation7 + $0x1c4] ss:$16 sps:$4 sm:$0xff]  }
 0x1ac   : > { %v1065_v30 = vadd.f32 %v6033_v28, %v776_v20  ;;  %v1056_v31 = vpop.f32.mrb[25].mxu0  ;;  %v1169_v33 = vpack.c.bf16 %v1149_v46, %v1148_v22  ;;  %v6678_v20 = vld [vmem:[#allocation7 + $0x1c0] ss:$16 sps:$4 sm:$0xff]   ;;  %v6681_v22 = vld [vmem:[#allocation7 + $0x1c8] ss:$16 sps:$4 sm:$0xff]   ;;  %3031 = vmatprep.subr.bf16.mxu0 %v6680_v19 }
 0x1ad   : > { %v1057_v37 = vadd.f32 %v1056_v31, %v774_v24  ;;  %v6034_v38 = vpop.f32.mrb[26].mxu0  ;;  %v1168_v40 = vpack.c.bf16 %v1147_v27, %v1146_v26  ;;  %3601 = vmatpush1.bf16.msra.mxu1 %v6651_v62  ;;  %v6683_v62 = vld [vmem:[#allocation7 + $0x1cc] ss:$16 sps:$4 sm:$0xff]   ;;  %3032 = vmatpush1.bf16.msra.mxu0 %v6678_v20  ;;  %v6684_v46 = vld [vmem:[#allocation7 + $0x1e0] ss:$16 sps:$4 sm:$0xff]   ;;  %v1454_v27 = vlaneseq }
 0x1ae   : > { %v1120_v45 = vadd.f32 %v7442_v48, %v1065_v30  ;;  %v1068_v39 = vadd.f32 %v6034_v38, %v777_v29  ;;  %v1059_v32 = vpop.f32.mrb[27].mxu0  ;;  %3602 = vmatprep.subr.bf16.mxu1 %v6659_v23  ;;  %v6689_v23 = vld [vmem:[#allocation7 + $0x1ec] ss:$16 sps:$4 sm:$0xff]   ;;  %v6687_v24 = vld [vmem:[#allocation7 + $0x1e8] ss:$16 sps:$4 sm:$0xff]  }
 0x1af   : > { %v1118_v12 = vadd.f32 %v7442_v48, %v1057_v37  ;;  %v1060_v51 = vadd.f32 %v1059_v32, %v775_v34  ;;  %6075 = vmatprep.mubr.bf16.mxu1 %v1168_v40  ;;  %v6695_v26 = vld [vmem:[#allocation7 + $0x20c] ss:$16 sps:$4 sm:$0xff]   ;;  %v7538_v28 = vld [vmem:[%s9473_s6] ss:$0 sm:$0xff]  ;;  %v7540_v31 = vshrl.u32 %v1454_v27, 7 }
 0x1b0   : > { %v1121_v35 = vadd.f32 %v7442_v48, %v1068_v39  ;;  %6076 = vmatmul.mubr.bf16.gmra.mrb[20].mxu1 %v1169_v33  ;;  %v1152_v55 = vmax.f32 %v1120_v45, 0.0 }
 0x1b1   : > { %v1119_v53 = vadd.f32 %v7442_v48, %v1060_v51  ;;  %3603 = vmatpush1.bf16.msra.mxu1 %v6657_v43  ;;  %v1150_v57 = vmax.f32 %v1118_v12, 0.0  ;;  %vm1456_vm0 = vcmp.lt.s32.totalorder %v7540_v31, 7  ;;  %vm1618_vm1 = vcmp.lt.s32.totalorder %v7540_v31, 5 }
 0x1b2   : > { %v1153_v21 = vmax.f32 %v1121_v35, 0.0  ;;  %3604 = vmatprep.subr.bf16.mxu1 %v6665_v49  ;;  %vm1537_vm2 = vcmp.lt.s32.totalorder %v7540_v31, 6  ;;  %vm1780_vm3 = vcmp.lt.s32.totalorder %v7540_v31, 3  ;;  %vm1699_vm4 = vcmp.lt.s32.totalorder %v7540_v31, 4 }
 0x1b3   : > { %v1151_v59 = vmax.f32 %v1119_v53, 0.0  ;;  %v6037_v60 = vpop.f32.mrb[28].mxu0  ;;  %v6693_v53 = vld [vmem:[#allocation7 + $0x208] ss:$16 sps:$4 sm:$0xff]  }
 0x1b4   : > { %v1081_v63 = vadd.f32 %v6037_v60, %v780_v54  ;;  %v1072_v0 = vpop.f32.mrb[29].mxu0  ;;  %v1171_v1 = vpack.c.bf16 %v1153_v21, %v1152_v55 }
 0x1b5   : > { %v1073_v4 = vadd.f32 %v1072_v0, %v778_v56  ;;  %v6038_v5 = vpop.f32.mrb[30].mxu0  ;;  %v1170_v6 = vpack.c.bf16 %v1151_v59, %v1150_v57  ;;  %3605 = vmatpush1.bf16.msra.mxu1 %v6663_v47  ;;  %v6698_v56 = vld [vmem:[#allocation7 + $0x224] ss:$16 sps:$4 sm:$0xff]   ;;  %v6701_v57 = vld [vmem:[#allocation7 + $0x22c] ss:$16 sps:$4 sm:$0xff]  }
 0x1b6   : > { %v1124_v8 = vadd.f32 %v7442_v48, %v1081_v63  ;;  %v1084_v9 = vadd.f32 %v6038_v5, %v781_v61  ;;  %v1075_v10 = vpop.f32.mrb[31].mxu0  ;;  %3606 = vmatprep.subr.bf16.mxu1 %v6671_v42  ;;  %v6699_v5 = vld [vmem:[#allocation7 + $0x228] ss:$16 sps:$4 sm:$0xff]  }
 0x1b7   : > { %v1122_v58 = vadd.f32 %v7442_v48, %v1073_v4  ;;  %v1076_v11 = vadd.f32 %v1075_v10, %v779_v2  ;;  %6079 = vmatprep.mubr.bf16.mxu1 %v1170_v6 }
 0x1b8   : > { %v1125_v13 = vadd.f32 %v7442_v48, %v1084_v9  ;;  %6080 = vmatmul.mubr.bf16.gmra.mrb[24].mxu1 %v1171_v1  ;;  %v1156_v41 = vmax.f32 %v1124_v8, 0.0  ;;  %v6696_v1 = vld [vmem:[#allocation7 + $0x220] ss:$16 sps:$4 sm:$0xff]   ;;  %v6707_v8 = vld [vmem:[#allocation7 + $0x24c] ss:$16 sps:$4 sm:$0xff]  }
 0x1b9   : > { %v1123_v36 = vadd.f32 %v7442_v48, %v1076_v11  ;;  %3607 = vmatpush1.bf16.msra.mxu1 %v6669_v7  ;;  %v1154_v15 = vmax.f32 %v1122_v58, 0.0  ;;  %v6686_v48 = vld [vmem:[#allocation7 + $0x1e4] ss:$16 sps:$4 sm:$0xff]  }
 0x1ba   : > { %v1157_v14 = vmax.f32 %v1125_v13, 0.0  ;;  %3608 = vmatprep.subr.bf16.mxu1 %v6677_v18  ;;  %3033 = vmatprep.subr.bf16.mxu0 %v6686_v48  ;;  %v6704_v7 = vld [vmem:[#allocation7 + $0x244] ss:$16 sps:$4 sm:$0xff]   ;;  %v6711_v48 = vld [vmem:[#allocation7 + $0x268] ss:$16 sps:$4 sm:$0xff]  }
 0x1bb   : > { %v1155_v44 = vmax.f32 %v1123_v36, 0.0  ;;  %3034 = vmatpush1.bf16.msra.mxu0 %v6684_v46  ;;  %v6710_v18 = vld [vmem:[#allocation7 + $0x264] ss:$16 sps:$4 sm:$0xff]  }
 0x1bc   : > { %v1173_v16 = vpack.c.bf16 %v1157_v14, %v1156_v41  ;;  %3196 = vmatprep.subr.bf16.mxu0 %v6692_v25 }
 0x1bd   : > { %v1172_v17 = vpack.c.bf16 %v1155_v44, %v1154_v15  ;;  %3609 = vmatpush1.bf16.msra.mxu1 %v6675_v3  ;;  %v6702_v15 = vld [vmem:[#allocation7 + $0x240] ss:$16 sps:$4 sm:$0xff]   ;;  %v6705_v44 = vld [vmem:[#allocation7 + $0x248] ss:$16 sps:$4 sm:$0xff]   ;;  %v6713_v3 = vld [vmem:[#allocation7 + $0x26c] ss:$16 sps:$4 sm:$0xff]  }
 0x1be   : > { %3610 = vmatprep.subr.bf16.mxu1 %v6683_v62 }
 0x1bf   : > { %6083 = vmatprep.mubr.bf16.mxu1 %v1172_v17 }
 0x1c0   : > { %6084 = vmatmul.mubr.bf16.gmra.mrb[28].mxu1 %v1173_v16 }
 0x1c1   : > { %3611 = vmatpush1.bf16.msra.mxu1 %v6681_v22  ;;  %v6708_v22 = vld [vmem:[#allocation7 + $0x260] ss:$16 sps:$4 sm:$0xff]  }
 0x1c2   : > { %3612 = vmatprep.subr.bf16.mxu1 %v6689_v23  ;;  %v6716_v23 = vld [vmem:[#allocation7 + $0x284] ss:$16 sps:$4 sm:$0xff]  }
 0x1c5   : > { %3613 = vmatpush1.bf16.msra.mxu1 %v6687_v24  ;;  %v6719_v24 = vld [vmem:[#allocation7 + $0x28c] ss:$16 sps:$4 sm:$0xff]  }
 0x1c6   : > { %3775 = vmatprep.subr.bf16.mxu1 %v6695_v26 }
 0x25b   : > { %v6057_v29 = vpop.f32.mrb[0].mxu1 }
 0x25c   : > { %v1279_v30 = vpop.f32.mrb[1].mxu1  ;;  %v7543_v33 = vadd.f32 %v6057_v29, %v7538_v28 }
 0x25d   : > { %v7546_v34 = vadd.f32 %v7538_v28, %v1279_v30  ;;  %v6058_v37 = vpop.f32.mrb[2].mxu1 }
 0x25e   : > { %v1282_v38 = vpop.f32.mrb[3].mxu1  ;;  %v7553_v43 = vadd.f32 %v6058_v37, %v7538_v28  ;;  %v1424_v32 = vrot.slane %v7543_v33, 1 }
 0x25f   : > { %v7549_v40 = vadd.f32 %v7538_v28, %v1282_v38  ;;  %v9498_v45 = vrot.slane %v7546_v34, 1 }
 0x260   : > { %v1425_v42 = vrot.slane %v7553_v43, 1  ;;  %v1407_v14 = vpack.c.bf16 %v7553_v43, %v7543_v33 }
 0x261   : > { %v1423_v39 = vrot.slane %v7549_v40, 1  ;;  %v1406_v21 = vpack.c.bf16 %v7549_v40, %v7546_v34 }
 0x262   : > { %v1485_v0 = vsel %vm1456_vm0, %v1424_v32, %v1425_v42 }
 0x263   : > { %v6061_v49 = vpop.f32.mrb[4].mxu1  ;;  %v1486_v50 = vsel %vm1456_vm0, %v1423_v39, %v1424_v32  ;;  %v1487_v12 = vsel %vm1456_vm0, %v9498_v45, %v1423_v39 }
 0x264   : > { %v1295_v51 = vpop.f32.mrb[5].mxu1  ;;  %v1489_v35 = vpack.c.bf16 %v1486_v50, %v1487_v12  ;;  %v7565_v47 = vadd.f32 %v6061_v49, %v7538_v28  ;;  %v6714_v49 = vld [vmem:[#allocation7 + $0x280] ss:$16 sps:$4 sm:$0xff]   ;;  %v6717_v50 = vld [vmem:[#allocation7 + $0x288] ss:$16 sps:$4 sm:$0xff]  }
 0x265   : > { %v7568_v54 = vadd.f32 %v7538_v28, %v1295_v51  ;;  %v6062_v55 = vpop.f32.mrb[6].mxu1 }
 0x266   : > { %9557 = vst [vmem:[#allocation22_spill] sm:$0xff] %v7565_v47  ;;  %v1298_v59 = vpop.f32.mrb[7].mxu1  ;;  %3035 = vmatprep.mubr.bf16.mxu0 %v1489_v35  ;;  %3614 = vmatprep.mubr.bf16.mxu1 %v1489_v35  ;;  %v1428_v4 = vrot.slane %v7565_v47, 1  ;;  %v7588_v13 = vadd.f32 %v6062_v55, %v7538_v28 }
 0x267   : > { %v7574_v60 = vadd.f32 %v7538_v28, %v1298_v59  ;;  %3036 = vmatmul.mubr.bf16.vlgmr.msra.gmra.mrb[32].mxu0 %v1406_v21  ;;  %3615 = vmatmul.mubr.bf16.vlgmr.msra.gmra.mrb[32].mxu1 %v1406_v21  ;;  %v1426_v61 = vrot.slane %v7568_v54, 1 }
 0x268   : > { %3197 = vmatpush1.bf16.msra.mxu0 %v6690_v52  ;;  %3776 = vmatpush1.bf16.msra.mxu1 %v6693_v53  ;;  %9558 = vst [vmem:[#allocation23_spill] sm:$0xff] %v7588_v13  ;;  %v1429_v20 = vrot.slane %v7588_v13, 1  ;;  %v6722_v52 = vld [vmem:[#allocation7 + $0x2a4] ss:$16 sps:$4 sm:$0xff]   ;;  %v6725_v53 = vld [vmem:[#allocation7 + $0x2ac] ss:$16 sps:$4 sm:$0xff]  }
 0x269   : > { %v1484_v63 = vsel %vm1456_vm0, %v1425_v42, %v1426_v61  ;;  %3198 = vmatprep.subr.bf16.mxu0 %v6698_v56  ;;  %v1427_v2 = vrot.slane %v7574_v60, 1  ;;  %3777 = vmatprep.subr.bf16.mxu1 %v6701_v57  ;;  %v1408_v29 = vpack.c.bf16 %v7574_v60, %v7568_v54  ;;  %v6720_v57 = vld [vmem:[#allocation7 + $0x2a0] ss:$16 sps:$4 sm:$0xff]  }
 0x26a   : > { %v1490_v6 = vpack.c.bf16 %v1484_v63, %v1485_v0  ;;  %v1481_v32 = vsel %vm1456_vm0, %v1428_v4, %v1429_v20  ;;  %v6723_v0 = vld [vmem:[#allocation7 + $0x2a8] ss:$16 sps:$4 sm:$0xff]  }
 0x26b   : > { %v6065_v9 = vpop.f32.mrb[8].mxu1  ;;  %v1482_v10 = vsel %vm1456_vm0, %v1427_v2, %v1428_v4  ;;  %v1483_v58 = vsel %vm1456_vm0, %v1426_v61, %v1427_v2  ;;  %v1409_v2 = vpack.c.bf16 %v7588_v13, %v7565_v47  ;;  %v6728_v4 = vld [vmem:[#allocation7 + $0x2c4] ss:$16 sps:$4 sm:$0xff]   ;;  %v6773_v13 = vld [vmem:[#allocation7 + $0x3ac] ss:$16 sps:$4 sm:$0xff]  }
 0x26c   : > { %v1311_v11 = vpop.f32.mrb[9].mxu1  ;;  %3045 = vmatprep.mubr.bf16.mxu0 %v1490_v6  ;;  %3624 = vmatprep.mubr.bf16.mxu1 %v1490_v6  ;;  %v1491_v17 = vpack.c.bf16 %v1482_v10, %v1483_v58  ;;  %v7601_v46 = vadd.f32 %v6065_v9, %v7538_v28 }
 0x26d   : > { %v7591_v36 = vadd.f32 %v7538_v28, %v1311_v11  ;;  %v6066_v41 = vpop.f32.mrb[10].mxu1  ;;  %3199 = vmatpush1.bf16.msra.mxu0 %v6696_v1  ;;  %3778 = vmatpush1.bf16.msra.mxu1 %v6699_v5  ;;  %v6731_v5 = vld [vmem:[#allocation7 + $0x2cc] ss:$16 sps:$4 sm:$0xff]  }
 0x26e   : > { %v1314_v16 = vpop.f32.mrb[11].mxu1  ;;  %3200 = vmatprep.subr.bf16.mxu0 %v6704_v7  ;;  %3779 = vmatprep.subr.bf16.mxu1 %v6707_v8  ;;  %9561 = vst [vmem:[#allocation26_spill] sm:$0xff] %v7601_v46  ;;  %v1432_v35 = vrot.slane %v7601_v46, 1  ;;  %v7618_v55 = vadd.f32 %v6066_v41, %v7538_v28 }
 0x26f   : > { %9559 = vst [vmem:[#allocation24_spill] sm:$0xff] %v7591_v36  ;;  %3046 = vmatmul.mubr.bf16.gmra.mrb[36].mxu0 %v1407_v14  ;;  %3625 = vmatmul.mubr.bf16.gmra.mrb[36].mxu1 %v1407_v14  ;;  %v1430_v19 = vrot.slane %v7591_v36, 1  ;;  %v7597_v62 = vadd.f32 %v7538_v28, %v1314_v16  ;;  %v6729_v16 = vld [vmem:[#allocation7 + $0x2c8] ss:$16 sps:$4 sm:$0xff]  }
 0x270   : > { %3055 = vmatprep.mubr.bf16.mxu0 %v1491_v17  ;;  %3634 = vmatprep.mubr.bf16.mxu1 %v1491_v17  ;;  %9562 = vst [vmem:[#allocation27_spill] sm:$0xff] %v7618_v55  ;;  %v1433_v7 = vrot.slane %v7618_v55, 1  ;;  %v7643_v8 = vpack.c.bf16 %v7618_v55, %v7601_v46 }
 0x271   : > { %9560 = vst [vmem:[#allocation25_spill] sm:$0xff] %v7597_v62  ;;  %3201 = vmatpush1.bf16.msra.mxu0 %v6702_v15  ;;  %3780 = vmatpush1.bf16.msra.mxu1 %v6705_v44  ;;  %v1480_v26 = vsel %vm1456_vm0, %v1429_v20, %v1430_v19  ;;  %v1431_v30 = vrot.slane %v7597_v62, 1  ;;  %v6726_v44 = vld [vmem:[#allocation7 + $0x2c0] ss:$16 sps:$4 sm:$0xff]  }
 0x272   : > { %3202 = vmatprep.subr.bf16.mxu0 %v6710_v18  ;;  %3781 = vmatprep.subr.bf16.mxu1 %v6713_v3  ;;  %v1492_v51 = vpack.c.bf16 %v1480_v26, %v1481_v32  ;;  %v6734_v3 = vld [vmem:[#allocation7 + $0x2e4] ss:$16 sps:$4 sm:$0xff]  }
 0x273   : > { %v6069_v25 = vpop.f32.mrb[12].mxu1  ;;  %v1478_v42 = vsel %vm1456_vm0, %v1431_v30, %v1432_v35  ;;  %v1479_v56 = vsel %vm1456_vm0, %v1430_v19, %v1431_v30 }
 0x274   : > { %v1327_v27 = vpop.f32.mrb[13].mxu1  ;;  %v7609_v37 = vadd.f32 %v6069_v25, %v7538_v28  ;;  %v1493_v14 = vpack.c.bf16 %v1478_v42, %v1479_v56  ;;  %v6737_v25 = vld [vmem:[#allocation7 + $0x2ec] ss:$16 sps:$4 sm:$0xff]   ;;  %v6735_v56 = vld [vmem:[#allocation7 + $0x2e8] ss:$16 sps:$4 sm:$0xff]  }
 0x275   : > { %v7612_v38 = vadd.f32 %v7538_v28, %v1327_v27  ;;  %v6070_v39 = vpop.f32.mrb[14].mxu1  ;;  %3203 = vmatpush1.bf16.msra.mxu0 %v6708_v22  ;;  %3782 = vmatpush1.bf16.msra.mxu1 %v6711_v48 }
 0x276   : > { %v1330_v12 = vpop.f32.mrb[15].mxu1  ;;  %3204 = vmatprep.subr.bf16.mxu0 %v6716_v23  ;;  %3783 = vmatprep.subr.bf16.mxu1 %v6719_v24  ;;  %v1436_v63 = vrot.slane %v7609_v37, 1  ;;  %v7652_v58 = vadd.f32 %v6070_v39, %v7538_v28  ;;  %v9493_v22 = vrot.slane %v7609_v37, 3 }
 0x277   : > { %v7621_v21 = vadd.f32 %v7538_v28, %v1330_v12  ;;  %3056 = vmatmul.mubr.bf16.gmra.mrb[40].mxu0 %v1408_v29  ;;  %3635 = vmatmul.mubr.bf16.gmra.mrb[40].mxu1 %v1408_v29  ;;  %v1434_v59 = vrot.slane %v7612_v38, 1  ;;  %v9496_v19 = vrot.slane %v7612_v38, 3  ;;  %v9495_v26 = vrot.slane %v7612_v38, 2 }
 0x278   : > { %3065 = vmatprep.mubr.bf16.mxu0 %v1492_v51  ;;  %3644 = vmatprep.mubr.bf16.mxu1 %v1492_v51  ;;  %9563 = vst [vmem:[#allocation28_spill] sm:$0xff] %v7652_v58  ;;  %v9492_v51 = vrot.slane %v7609_v37, 2 }
 0x279   : > { %3205 = vmatpush1.bf16.msra.mxu0 %v6714_v49  ;;  %3784 = vmatpush1.bf16.msra.mxu1 %v6717_v50  ;;  %v1435_v61 = vrot.slane %v7621_v21, 1  ;;  %v7634_v1 = vpack.c.bf16 %v7621_v21, %v7612_v38  ;;  %v1599_v20 = vrot.slane %v7621_v21, 3  ;;  %v1518_v27 = vrot.slane %v7621_v21, 2 }
 0x27a   : > { %3206 = vmatprep.subr.bf16.mxu0 %v6722_v52  ;;  %3785 = vmatprep.subr.bf16.mxu1 %v6725_v53  ;;  %v1437_v52 = vrot.slane %v7652_v58, 1  ;;  %v6732_v53 = vld [vmem:[#allocation7 + $0x2e0] ss:$16 sps:$4 sm:$0xff]  }
 0x27b   : > { %v6073_v6 = vpop.f32.mrb[16].mxu1  ;;  %v1474_v9 = vsel %vm1456_vm0, %v1435_v61, %v1436_v63  ;;  %v1475_v10 = vsel %vm1456_vm0, %v1434_v59, %v1435_v61  ;;  %v1636_v39 = vsel %vm1618_vm1, %v1599_v20, %v9493_v22  ;;  %v1637_v32 = vsel %vm1618_vm1, %v9496_v19, %v1599_v20  ;;  %v6753_v19 = vld [vmem:[#allocation7 + $0x348] ss:$16 sps:$4 sm:$0xff]  }
 0x27c   : > { %v7655_v11 = vadd.f32 %v6073_v6, %v7538_v28  ;;  %v1343_v41 = vpop.f32.mrb[17].mxu1  ;;  %v7657_v15 = vpack.c.bf16 %v1474_v9, %v1475_v10  ;;  %v7688_v12 = vpack.c.bf16 %v1636_v39, %v1637_v32  ;;  %v1556_v61 = vsel %vm1537_vm2, %v9495_v26, %v1518_v27  ;;  %v6741_v39 = vld [vmem:[#allocation7 + $0x308] ss:$16 sps:$4 sm:$0xff]  }
 0x27d   : > { %v7660_v17 = vadd.f32 %v7538_v28, %v1343_v41  ;;  %v6074_v18 = vpop.f32.mrb[18].mxu1  ;;  %3207 = vmatpush1.bf16.msra.mxu0 %v6720_v57  ;;  %3786 = vmatpush1.bf16.msra.mxu1 %v6723_v0  ;;  %v1476_v0 = vsel %vm1456_vm0, %v1433_v7, %v1434_v59  ;;  %v1555_v6 = vsel %vm1537_vm2, %v1518_v27, %v9492_v51 }
 0x27e   : > { %v7666_v48 = vadd.f32 %v6074_v18, %v7538_v28  ;;  %v1346_v23 = vpop.f32.mrb[19].mxu1  ;;  %3208 = vmatprep.subr.bf16.mxu0 %v6728_v4  ;;  %3787 = vmatprep.subr.bf16.mxu1 %v6731_v5  ;;  %v1440_v24 = vrot.slane %v7655_v11, 1  ;;  %9564 = vst [vmem:[#allocation29_spill] sm:$0xff] %v7688_v12  ;;  %v6743_v5 = vld [vmem:[#allocation7 + $0x30c] ss:$16 sps:$4 sm:$0xff]   ;;  %v1410_v18 = vpack.c.bf16 %v7597_v62, %v7591_v36 }
 0x27f   : > { %v7672_v29 = vadd.f32 %v7538_v28, %v1346_v23  ;;  %3066 = vmatmul.mubr.bf16.gmra.mrb[44].mxu0 %v1409_v2  ;;  %3645 = vmatmul.mubr.bf16.gmra.mrb[44].mxu1 %v1409_v2  ;;  %v1438_v30 = vrot.slane %v7660_v17, 1  ;;  %v6740_v2 = vld [vmem:[#allocation7 + $0x304] ss:$16 sps:$4 sm:$0xff]   ;;  %v7741_v27 = vpack.c.bf16 %v7652_v58, %v7609_v37 }
 0x280   : > { %3075 = vmatprep.mubr.bf16.mxu0 %v1493_v14  ;;  %3654 = vmatprep.mubr.bf16.mxu1 %v1493_v14  ;;  %v1441_v49 = vrot.slane %v7666_v48, 1  ;;  %v7686_v50 = vpack.c.bf16 %v7666_v48, %v7655_v11  ;;  %v7717_v14 = vpack.c.bf16 %v1555_v6, %v1556_v61  ;;  %v9494_v6 = vrot.slane %v7660_v17, 3 }
 0x281   : > { %3209 = vmatpush1.bf16.msra.mxu0 %v6726_v44  ;;  %3788 = vmatpush1.bf16.msra.mxu1 %v6729_v16  ;;  %v1439_v42 = vrot.slane %v7672_v29, 1  ;;  %v7695_v57 = vpack.c.bf16 %v7672_v29, %v7660_v17  ;;  %v1472_v10 = vsel %vm1456_vm0, %v1437_v52, %v1438_v30  ;;  %v1522_v51 = vrot.slane %v7672_v29, 2 }
 0x282   : > { %3210 = vmatprep.subr.bf16.mxu0 %v6734_v3  ;;  %3789 = vmatprep.subr.bf16.mxu1 %v6737_v25  ;;  %v1469_v4 = vsel %vm1456_vm0, %v1440_v24, %v1441_v49  ;;  %9565 = vst [vmem:[#allocation30_spill] sm:$0xff] %v7717_v14  ;;  %v1477_v3 = vsel %vm1456_vm0, %v1432_v35, %v1433_v7  ;;  %v1603_v35 = vrot.slane %v7672_v29, 3 }
 0x283   : > { %v6077_v9 = vpop.f32.mrb[20].mxu1  ;;  %v1470_v41 = vsel %vm1456_vm0, %v1439_v42, %v1440_v24  ;;  %v1471_v59 = vsel %vm1456_vm0, %v1438_v30, %v1439_v42  ;;  %v1473_v25 = vsel %vm1456_vm0, %v1436_v63, %v1437_v52  ;;  %v6738_v30 = vld [vmem:[#allocation7 + $0x300] ss:$16 sps:$4 sm:$0xff]   ;;  %v1494_v42 = vpack.c.bf16 %v1476_v0, %v1477_v3  ;;  %v6746_v63 = vld [vmem:[#allocation7 + $0x324] ss:$16 sps:$4 sm:$0xff]  }
 0x284   : > { %v7720_v44 = vadd.f32 %v6077_v9, %v7538_v28  ;;  %v1359_v16 = vpop.f32.mrb[21].mxu1  ;;  %v7730_v20 = vpack.c.bf16 %v1470_v41, %v1471_v59  ;;  %v7747_v61 = vpack.c.bf16 %v1472_v10, %v1473_v25  ;;  %v6749_v52 = vld [vmem:[#allocation7 + $0x32c] ss:$16 sps:$4 sm:$0xff]   ;;  %v9497_v9 = vrot.slane %v7660_v17, 2  ;;  %v6747_v3 = vld [vmem:[#allocation7 + $0x328] ss:$16 sps:$4 sm:$0xff]  }
 0x285   : > { %v7733_v23 = vadd.f32 %v7538_v28, %v1359_v16  ;;  %v6078_v24 = vpop.f32.mrb[22].mxu1  ;;  %3211 = vmatpush1.bf16.msra.mxu0 %v6732_v53  ;;  %3790 = vmatpush1.bf16.msra.mxu1 %v6735_v56  ;;  %v1604_v41 = vrot.slane %v7655_v11, 3  ;;  %v1633_v10 = vsel %vm1618_vm1, %v9494_v6, %v1603_v35  ;;  %v6744_v16 = vld [vmem:[#allocation7 + $0x320] ss:$16 sps:$4 sm:$0xff]  }
 0x286   : > { %v7745_v7 = vadd.f32 %v6078_v24, %v7538_v28  ;;  %v1362_v32 = vpop.f32.mrb[23].mxu1  ;;  %3212 = vmatprep.subr.bf16.mxu0 %v6740_v2  ;;  %3791 = vmatprep.subr.bf16.mxu1 %v6743_v5  ;;  %v1444_v0 = vrot.slane %v7720_v44, 1  ;;  %v1608_v58 = vrot.slane %v7720_v44, 3 }
 0x287   : > { %v7751_v53 = vadd.f32 %v7538_v28, %v1362_v32  ;;  %3076 = vmatmul.mubr.bf16.gmra.mrb[48].mxu0 %v1410_v18  ;;  %3655 = vmatmul.mubr.bf16.gmra.mrb[48].mxu1 %v1410_v18  ;;  %v1442_v56 = vrot.slane %v7733_v23, 1  ;;  %v1632_v25 = vsel %vm1618_vm1, %v1603_v35, %v1604_v41 }
 0x288   : > { %3085 = vmatprep.mubr.bf16.mxu0 %v1494_v42  ;;  %3664 = vmatprep.mubr.bf16.mxu1 %v1494_v42  ;;  %v1445_v2 = vrot.slane %v7745_v7, 1  ;;  %v7760_v5 = vpack.c.bf16 %v7745_v7, %v7720_v44  ;;  %v7779_v42 = vpack.c.bf16 %v1632_v25, %v1633_v10  ;;  %v1552_v10 = vsel %vm1537_vm2, %v9497_v9, %v1522_v51 }
 0x289   : > { %3213 = vmatpush1.bf16.msra.mxu0 %v6738_v30  ;;  %v1468_v59 = vsel %vm1456_vm0, %v1441_v49, %v1442_v56  ;;  %3792 = vmatpush1.bf16.msra.mxu1 %v6741_v39  ;;  %v1443_v18 = vrot.slane %v7751_v53, 1  ;;  %v7771_v24 = vpack.c.bf16 %v7751_v53, %v7733_v23  ;;  %v6752_v30 = vld [vmem:[#allocation7 + $0x344] ss:$16 sps:$4 sm:$0xff]   ;;  %v6755_v39 = vld [vmem:[#allocation7 + $0x34c] ss:$16 sps:$4 sm:$0xff]  }
 0x28a   : > { %v7775_v32 = vpack.c.bf16 %v1468_v59, %v1469_v4  ;;  %3214 = vmatprep.subr.bf16.mxu0 %v6746_v63  ;;  %3793 = vmatprep.subr.bf16.mxu1 %v6749_v52  ;;  %v1465_v49 = vsel %vm1456_vm0, %v1444_v0, %v1445_v2  ;;  %9566 = vst [vmem:[#allocation31_spill] sm:$0xff] %v7779_v42  ;;  %v1523_v4 = vrot.slane %v7655_v11, 2  ;;  %v1605_v63 = vrot.slane %v7666_v48, 3 }
 0x28b   : > { %v6081_v22 = vpop.f32.mrb[24].mxu1  ;;  %v1466_v6 = vsel %vm1456_vm0, %v1443_v18, %v1444_v0  ;;  %v1467_v35 = vsel %vm1456_vm0, %v1442_v56, %v1443_v18  ;;  %v1606_v0 = vrot.slane %v7733_v23, 3  ;;  %v6750_v18 = vld [vmem:[#allocation7 + $0x340] ss:$16 sps:$4 sm:$0xff]  }
 0x28c   : > { %v7789_v52 = vadd.f32 %v6081_v22, %v7538_v28  ;;  %v1375_v59 = vpop.f32.mrb[25].mxu1  ;;  %v7791_v26 = vpack.c.bf16 %v1466_v6, %v1467_v35  ;;  %v1551_v22 = vsel %vm1537_vm2, %v1522_v51, %v1523_v4  ;;  %v1631_v6 = vsel %vm1618_vm1, %v1604_v41, %v1605_v63 }
 0x28d   : > { %v7799_v25 = vadd.f32 %v7538_v28, %v1375_v59  ;;  %v6082_v56 = vpop.f32.mrb[26].mxu1  ;;  %3215 = vmatpush1.bf16.msra.mxu0 %v6744_v16  ;;  %3794 = vmatpush1.bf16.msra.mxu1 %v6747_v3  ;;  %v1524_v35 = vrot.slane %v7666_v48, 2  ;;  %v6758_v59 = vld [vmem:[#allocation7 + $0x364] ss:$16 sps:$4 sm:$0xff]   ;;  %v6761_v3 = vld [vmem:[#allocation7 + $0x36c] ss:$16 sps:$4 sm:$0xff]   ;;  %v7810_v42 = vpack.c.bf16 %v1551_v22, %v1552_v10  ;;  %v1630_v51 = vsel %vm1618_vm1, %v1605_v63, %v1606_v0 }
 0x28e   : > { %v7807_v9 = vadd.f32 %v6082_v56, %v7538_v28  ;;  %v1378_v45 = vpop.f32.mrb[27].mxu1  ;;  %3216 = vmatprep.subr.bf16.mxu0 %v6752_v30  ;;  %3795 = vmatprep.subr.bf16.mxu1 %v6755_v39  ;;  %v1448_v16 = vrot.slane %v7789_v52, 1  ;;  %v7820_v30 = vpack.c.bf16 %v1630_v51, %v1631_v6  ;;  %v1525_v39 = vrot.slane %v7733_v23, 2  ;;  %v6756_v22 = vld [vmem:[#allocation7 + $0x360] ss:$16 sps:$4 sm:$0xff]  }
 0x28f   : > { %9567 = vst [vmem:[#allocation32_spill] sm:$0xff] %v7810_v42  ;;  %v7815_v14 = vadd.f32 %v7538_v28, %v1378_v45  ;;  %3086 = vmatmul.mubr.bf16.gmra.mrb[52].mxu0 %v7643_v8  ;;  %3665 = vmatmul.mubr.bf16.gmra.mrb[52].mxu1 %v7643_v8  ;;  %v1446_v41 = vrot.slane %v7799_v25, 1  ;;  %v1550_v63 = vsel %vm1537_vm2, %v1523_v4, %v1524_v35  ;;  %v1607_v8 = vrot.slane %v7751_v53, 3  ;;  %v6764_v4 = vld [vmem:[#allocation7 + $0x384] ss:$16 sps:$4 sm:$0xff]  }
 0x290   : > { %9568 = vst [vmem:[#allocation33_spill] sm:$0xff] %v7820_v30  ;;  %3095 = vmatprep.mubr.bf16.mxu0 %v7657_v15  ;;  %3674 = vmatprep.mubr.bf16.mxu1 %v7657_v15  ;;  %v1449_v10 = vrot.slane %v7807_v9, 1  ;;  %v7828_v45 = vpack.c.bf16 %v7807_v9, %v7789_v52  ;;  %v6759_v15 = vld [vmem:[#allocation7 + $0x368] ss:$16 sps:$4 sm:$0xff]   ;;  %v1549_v30 = vsel %vm1537_vm2, %v1524_v35, %v1525_v39  ;;  %v1529_v36 = vrot.slane %v7799_v25, 2 }
 0x291   : > { %3217 = vmatpush1.bf16.msra.mxu0 %v6750_v18  ;;  %v1464_v56 = vsel %vm1456_vm0, %v1445_v2, %v1446_v41  ;;  %3796 = vmatpush1.bf16.msra.mxu1 %v6753_v19  ;;  %v1447_v6 = vrot.slane %v7815_v14, 1  ;;  %v7838_v51 = vpack.c.bf16 %v7815_v14, %v7799_v25  ;;  %v6767_v19 = vld [vmem:[#allocation7 + $0x38c] ss:$16 sps:$4 sm:$0xff]   ;;  %v7846_v18 = vpack.c.bf16 %v1549_v30, %v1550_v63  ;;  %v6762_v63 = vld [vmem:[#allocation7 + $0x380] ss:$16 sps:$4 sm:$0xff]  }
 0x292   : > { %v7842_v42 = vpack.c.bf16 %v1464_v56, %v1465_v49  ;;  %3218 = vmatprep.subr.bf16.mxu0 %v6758_v59  ;;  %3797 = vmatprep.subr.bf16.mxu1 %v6761_v3  ;;  %v1461_v2 = vsel %vm1456_vm0, %v1448_v16, %v1449_v10  ;;  %v1629_v49 = vsel %vm1618_vm1, %v1606_v0, %v1607_v8  ;;  %v1526_v59 = vrot.slane %v7751_v53, 2  ;;  %v6765_v0 = vld [vmem:[#allocation7 + $0x388] ss:$16 sps:$4 sm:$0xff]  }
 0x293   : > { %9569 = vst [vmem:[#allocation34_spill] sm:$0xff] %v7846_v18  ;;  %v6085_v12 = vpop.f32.mrb[28].mxu1  ;;  %v1462_v55 = vsel %vm1456_vm0, %v1447_v6, %v1448_v16  ;;  %v1463_v35 = vsel %vm1456_vm0, %v1446_v41, %v1447_v6  ;;  %v1628_v18 = vsel %vm1618_vm1, %v1607_v8, %v1608_v58  ;;  %v1527_v16 = vrot.slane %v7720_v44, 2  ;;  %v6770_v6 = vld [vmem:[#allocation7 + $0x3a4] ss:$16 sps:$4 sm:$0xff]  }
 0x294   : > { %v7857_v3 = vadd.f32 %v6085_v12, %v7538_v28  ;;  %v1391_v56 = vpop.f32.mrb[29].mxu1  ;;  %v7859_v30 = vpack.c.bf16 %v1462_v55, %v1463_v35  ;;  %v7867_v62 = vpack.c.bf16 %v1628_v18, %v1629_v49  ;;  %v1548_v55 = vsel %vm1537_vm2, %v1525_v39, %v1526_v59 }
 0x295   : > { %v7865_v46 = vadd.f32 %v7538_v28, %v1391_v56  ;;  %v6086_v41 = vpop.f32.mrb[30].mxu1  ;;  %3219 = vmatpush1.bf16.msra.mxu0 %v6756_v22  ;;  %3798 = vmatpush1.bf16.msra.mxu1 %v6759_v15  ;;  %v1609_v12 = vrot.slane %v7745_v7, 3  ;;  %v1547_v22 = vsel %vm1537_vm2, %v1526_v59, %v1527_v16  ;;  %v1610_v15 = vrot.slane %v7799_v25, 3 }
 0x296   : > { %9570 = vst [vmem:[#allocation35_spill] sm:$0xff] %v7867_v62  ;;  %v7873_v35 = vadd.f32 %v6086_v41, %v7538_v28  ;;  %v1394_v8 = vpop.f32.mrb[31].mxu1  ;;  %3220 = vmatprep.subr.bf16.mxu0 %v6764_v4  ;;  %3799 = vmatprep.subr.bf16.mxu1 %v6767_v19  ;;  %v1452_v56 = vrot.slane %v7857_v3, 1  ;;  %v7885_v49 = vpack.c.bf16 %v1547_v22, %v1548_v55  ;;  %v1528_v59 = vrot.slane %v7745_v7, 2  ;;  %v6779_v62 = vld [vmem:[#allocation7 + $0x3cc] ss:$16 sps:$4 sm:$0xff]  }
 0x297   : > { %v7880_v18 = vadd.f32 %v7538_v28, %v1394_v8  ;;  %3096 = vmatmul.mubr.bf16.gmra.mrb[56].mxu0 %v7634_v1  ;;  %3675 = vmatmul.mubr.bf16.gmra.mrb[56].mxu1 %v7634_v1  ;;  %v1450_v39 = vrot.slane %v7865_v46, 1  ;;  %v1627_v4 = vsel %vm1618_vm1, %v1608_v58, %v1609_v12  ;;  %v1626_v1 = vsel %vm1618_vm1, %v1609_v12, %v1610_v15  ;;  %v6768_v58 = vld [vmem:[#allocation7 + $0x3a0] ss:$16 sps:$4 sm:$0xff]   ;;  %v6776_v12 = vld [vmem:[#allocation7 + $0x3c4] ss:$16 sps:$4 sm:$0xff]  }
 0x298   : > { %9571 = vst [vmem:[#allocation36_spill] sm:$0xff] %v7885_v49  ;;  %3105 = vmatprep.mubr.bf16.mxu0 %v7747_v61  ;;  %3684 = vmatprep.mubr.bf16.mxu1 %v7747_v61  ;;  %v1453_v19 = vrot.slane %v7873_v35, 1  ;;  %v7894_v28 = vpack.c.bf16 %v7873_v35, %v7857_v3  ;;  %v6771_v61 = vld [vmem:[#allocation7 + $0x3a8] ss:$16 sps:$4 sm:$0xff]   ;;  %v7906_v22 = vpack.c.bf16 %v1626_v1, %v1627_v4 }
 0x299   : > { %3221 = vmatpush1.bf16.msra.mxu0 %v6762_v63  ;;  %v1460_v41 = vsel %vm1456_vm0, %v1449_v10, %v1450_v39  ;;  %3800 = vmatpush1.bf16.msra.mxu1 %v6765_v0  ;;  %v1451_v55 = vrot.slane %v7880_v18, 1  ;;  %v7904_v8 = vpack.c.bf16 %v7880_v18, %v7865_v46  ;;  %v9573_v10 = vrot.slane %v7546_v34, 1 }
 0x29a   : > { %9572 = vst [vmem:[#allocation37_spill] sm:$0xff] %v7906_v22  ;;  %v7908_v49 = vpack.c.bf16 %v1460_v41, %v1461_v2  ;;  %3222 = vmatprep.subr.bf16.mxu0 %v6770_v6  ;;  %3801 = vmatprep.subr.bf16.mxu1 %v6773_v13  ;;  %v1457_v63 = vsel %vm1456_vm0, %v1452_v56, %v1453_v19  ;;  %v6774_v41 = vld [vmem:[#allocation7 + $0x3c0] ss:$16 sps:$4 sm:$0xff]   ;;  %v1612_v22 = vrot.slane %v7789_v52, 3 }
 0x29b   : > { %v1488_v0 = vsel %vm1456_vm0, %v1453_v19, %v9573_v10  ;;  %v1458_v4 = vsel %vm1456_vm0, %v1451_v55, %v1452_v56  ;;  %v1459_v2 = vsel %vm1456_vm0, %v1450_v39, %v1451_v55  ;;  %v1546_v13 = vsel %vm1537_vm2, %v1527_v16, %v1528_v59  ;;  %v6777_v56 = vld [vmem:[#allocation7 + $0x3c8] ss:$16 sps:$4 sm:$0xff]  }
 0x29c   : > { %v7921_v6 = vpack.c.bf16 %v1488_v0, %v1457_v63  ;;  %v7925_v1 = vpack.c.bf16 %v1458_v4, %v1459_v2  ;;  %v1545_v19 = vsel %vm1537_vm2, %v1528_v59, %v1529_v36  ;;  %v1611_v10 = vrot.slane %v7815_v14, 3  ;;  %v6782_v63 = vld [vmem:[#allocation7 + $0x3e4] ss:$16 sps:$4 sm:$0xff]   ;;  %v6785_v0 = vld [vmem:[#allocation7 + $0x3ec] ss:$16 sps:$4 sm:$0xff]  }
 0x29d   : > { %3223 = vmatpush1.bf16.msra.mxu0 %v6768_v58  ;;  %3802 = vmatpush1.bf16.msra.mxu1 %v6771_v61  ;;  %v7931_v47 = vpack.c.bf16 %v1545_v19, %v1546_v13  ;;  %v1530_v39 = vrot.slane %v7815_v14, 2  ;;  %v1531_v55 = vrot.slane %v7789_v52, 2  ;;  %v1613_v16 = vrot.slane %v7807_v9, 3 }
 0x29e   : > { %3224 = vmatprep.subr.bf16.mxu0 %v6776_v12  ;;  %3803 = vmatprep.subr.bf16.mxu1 %v6779_v62  ;;  %v1624_v59 = vsel %vm1618_vm1, %v1611_v10, %v1612_v22  ;;  %v1625_v58 = vsel %vm1618_vm1, %v1610_v15, %v1611_v10  ;;  %v1614_v61 = vrot.slane %v7865_v46, 3  ;;  %v1532_v4 = vrot.slane %v7807_v9, 2  ;;  %v6780_v15 = vld [vmem:[#allocation7 + $0x3e0] ss:$16 sps:$4 sm:$0xff]  }
 0x29f   : > { %3106 = vmatmul.mubr.bf16.gmra.mrb[60].mxu0 %v7741_v27  ;;  %3685 = vmatmul.mubr.bf16.gmra.mrb[60].mxu1 %v7741_v27  ;;  %v7944_v2 = vpack.c.bf16 %v1624_v59, %v1625_v58  ;;  %v1543_v62 = vsel %vm1537_vm2, %v1530_v39, %v1531_v55  ;;  %v1544_v12 = vsel %vm1537_vm2, %v1529_v36, %v1530_v39  ;;  %v1533_v13 = vrot.slane %v7865_v46, 2  ;;  %v6783_v59 = vld [vmem:[#allocation7 + $0x3e8] ss:$16 sps:$4 sm:$0xff]   ;;  %v6788_v58 = vld [vmem:[#allocation7 + $0x404] ss:$16 sps:$4 sm:$0xff]  }
 0x2a0   : > { %3115 = vmatprep.mubr.bf16.mxu0 %v7730_v20  ;;  %3694 = vmatprep.mubr.bf16.mxu1 %v7730_v20  ;;  %v7953_v19 = vpack.c.bf16 %v1543_v62, %v1544_v12  ;;  %v1622_v27 = vsel %vm1618_vm1, %v1613_v16, %v1614_v61  ;;  %v1623_v10 = vsel %vm1618_vm1, %v1612_v22, %v1613_v16  ;;  %v1615_v62 = vrot.slane %v7880_v18, 3  ;;  %v6791_v12 = vld [vmem:[#allocation7 + $0x40c] ss:$16 sps:$4 sm:$0xff]  }
 0x2a1   : > { %3225 = vmatpush1.bf16.msra.mxu0 %v6774_v41  ;;  %3804 = vmatpush1.bf16.msra.mxu1 %v6777_v56  ;;  %v7959_v36 = vpack.c.bf16 %v1622_v27, %v1623_v10  ;;  %v1541_v39 = vsel %vm1537_vm2, %v1532_v4, %v1533_v13  ;;  %v1542_v20 = vsel %vm1537_vm2, %v1531_v55, %v1532_v4  ;;  %v1616_v22 = vrot.slane %v7857_v3, 3 }
 0x2a2   : > { %9574 = vst [vmem:[#allocation38_spill] sm:$0xff] %v7953_v19  ;;  %3226 = vmatprep.subr.bf16.mxu0 %v6782_v63  ;;  %3805 = vmatprep.subr.bf16.mxu1 %v6785_v0  ;;  %v7966_v19 = vpack.c.bf16 %v1541_v39, %v1542_v20  ;;  %v1534_v41 = vrot.slane %v7880_v18, 2  ;;  %v1535_v56 = vrot.slane %v7857_v3, 2  ;;  %v1621_v27 = vsel %vm1618_vm1, %v1614_v61, %v1615_v62 }
 0x2a3   : > { %v1617_v55 = vrot.slane %v7873_v35, 3  ;;  %v1536_v4 = vrot.slane %v7873_v35, 2  ;;  %v1620_v0 = vsel %vm1618_vm1, %v1615_v62, %v1616_v22  ;;  %v9576_v63 = vrot.slane %v7546_v34, 3 }
 0x2a4   : > { %9575 = vst [vmem:[#allocation39_spill] sm:$0xff] %v7966_v19  ;;  %v1539_v10 = vsel %vm1537_vm2, %v1534_v41, %v1535_v56  ;;  %v1540_v39 = vsel %vm1537_vm2, %v1533_v13, %v1534_v41  ;;  %v7983_v20 = vpack.c.bf16 %v1620_v0, %v1621_v27  ;;  %v9577_v13 = vrot.slane %v7546_v34, 2 }
 0x2a5   : > { %3227 = vmatpush1.bf16.msra.mxu0 %v6780_v15  ;;  %3806 = vmatpush1.bf16.msra.mxu1 %v6783_v59  ;;  %v7985_v61 = vpack.c.bf16 %v1539_v10, %v1540_v39  ;;  %v1619_v16 = vsel %vm1618_vm1, %v1616_v22, %v1617_v55  ;;  %v1650_v62 = vsel %vm1618_vm1, %v1617_v55, %v9576_v63  ;;  %v9524_v22 = vrot.slane %v7609_v37, 4 }
 0x2a6   : > { %3389 = vmatprep.subr.bf16.mxu0 %v6788_v58  ;;  %3968 = vmatprep.subr.bf16.mxu1 %v6791_v12  ;;  %v1538_v19 = vsel %vm1537_vm2, %v1535_v56, %v1536_v4  ;;  %v1569_v15 = vsel %vm1537_vm2, %v1536_v4, %v9577_v13  ;;  %v8001_v59 = vpack.c.bf16 %v1650_v62, %v1619_v16  ;;  %v1760_v12 = vrot.slane %v7612_v38, 5 }
 0x2a7   : > { %3116 = vmatmul.mubr.bf16.gmra.mrb[64].mxu0 %v7695_v57  ;;  %3695 = vmatmul.mubr.bf16.gmra.mrb[64].mxu1 %v7695_v57  ;;  %v8003_v58 = vpack.c.bf16 %v1569_v15, %v1538_v19  ;;  %v1761_v57 = vrot.slane %v7621_v21, 5  ;;  %v9526_v19 = vrot.slane %v7609_v37, 5  ;;  %v9527_v16 = vrot.slane %v7660_v17, 5 }
 0x2a8   : > { %3125 = vmatprep.mubr.bf16.mxu0 %v7775_v32  ;;  %3704 = vmatprep.mubr.bf16.mxu1 %v7775_v32  ;;  %v9525_v27 = vrot.slane %v7660_v17, 4  ;;  %v1765_v55 = vrot.slane %v7672_v29, 5  ;;  %v1766_v4 = vrot.slane %v7655_v11, 5  ;;  %v1684_v63 = vrot.slane %v7672_v29, 4 }
 0x2a9   : > { %v1799_v32 = vsel %vm1780_vm3, %v1760_v12, %v1761_v57  ;;  %v1798_v41 = vsel %vm1780_vm3, %v1761_v57, %v9526_v19  ;;  %v1685_v0 = vrot.slane %v7655_v11, 4  ;;  %v1767_v11 = vrot.slane %v7666_v48, 5 }
 0x2aa   : > { %v8031_v56 = vpack.c.bf16 %v1798_v41, %v1799_v32  ;;  %v1794_v10 = vsel %vm1780_vm3, %v1765_v55, %v1766_v4  ;;  %v1795_v39 = vsel %vm1780_vm3, %v9527_v16, %v1765_v55  ;;  %v1714_v62 = vsel %vm1699_vm4, %v9525_v27, %v1684_v63  ;;  %v9581_v27 = vld [vmem:[#allocation24_spill] sm:$0xff] }
 0x2ab   : > { %v8059_v13 = vpack.c.bf16 %v1794_v10, %v1795_v39  ;;  %v1713_v29 = vsel %vm1699_vm4, %v1684_v63, %v1685_v0  ;;  %v1768_v15 = vrot.slane %v7733_v23, 5  ;;  %v1686_v32 = vrot.slane %v7666_v48, 4 }
 0x2ac   : > { %v8067_v57 = vpack.c.bf16 %v1713_v29, %v1714_v62  ;;  %v1769_v41 = vrot.slane %v7751_v53, 5  ;;  %v1688_v10 = vrot.slane %v7751_v53, 4  ;;  %v1689_v39 = vrot.slane %v7720_v44, 4 }
 0x2ad   : > { %v1712_v48 = vsel %vm1699_vm4, %v1685_v0, %v1686_v32  ;;  %v1771_v62 = vrot.slane %v7745_v7, 5  ;;  %v1772_v29 = vrot.slane %v7799_v25, 5  ;;  %v1690_v0 = vrot.slane %v7745_v7, 4 }
 0x2ae   : > { %v1691_v53 = vrot.slane %v7799_v25, 4  ;;  %v1774_v25 = vrot.slane %v7789_v52, 5  ;;  %v1594_v19 = vrot.slane %v9581_v27, 3 }
 0x2af   : > { %3126 = vmatmul.mubr.bf16.gmra.mrb[68].mxu0 %v7686_v50  ;;  %3705 = vmatmul.mubr.bf16.gmra.mrb[68].mxu1 %v7686_v50  ;;  %v9528_v50 = vrot.slane %v7612_v38, 4  ;;  %v1708_v7 = vsel %vm1699_vm4, %v1689_v39, %v1690_v0 }
 0x2b0   : > { %3135 = vmatprep.mubr.bf16.mxu0 %v7791_v26  ;;  %3714 = vmatprep.mubr.bf16.mxu1 %v7791_v26  ;;  %v1680_v26 = vrot.slane %v7621_v21, 4 }
 0x2b2   : > { %v1717_v21 = vsel %vm1699_vm4, %v1680_v26, %v9524_v22  ;;  %v6809_v22 = vld [vmem:[#allocation7 + $0x46c] ss:$16 sps:$4 sm:$0xff]  }
 0x2b7   : > { %3136 = vmatmul.mubr.bf16.gmra.mrb[72].mxu0 %v7771_v24  ;;  %3715 = vmatmul.mubr.bf16.gmra.mrb[72].mxu1 %v7771_v24  ;;  %v1718_v24 = vsel %vm1699_vm4, %v9528_v50, %v1680_v26  ;;  %v1687_v26 = vrot.slane %v7733_v23, 4  ;;  %v1770_v23 = vrot.slane %v7720_v44, 5  ;;  %v6833_v50 = vld [vmem:[#allocation7 + $0x4ec] ss:$16 sps:$4 sm:$0xff]  }
 0x2b8   : > { %3145 = vmatprep.mubr.bf16.mxu0 %v7842_v42  ;;  %3724 = vmatprep.mubr.bf16.mxu1 %v7842_v42  ;;  %v8041_v42 = vpack.c.bf16 %v1717_v21, %v1718_v24  ;;  %v1792_v21 = vsel %vm1780_vm3, %v1767_v11, %v1768_v15  ;;  %v1793_v24 = vsel %vm1780_vm3, %v1766_v4, %v1767_v11 }
 0x2b9   : > { %v8078_v55 = vpack.c.bf16 %v1792_v21, %v1793_v24  ;;  %v1790_v4 = vsel %vm1780_vm3, %v1769_v41, %v1770_v23  ;;  %v1789_v21 = vsel %vm1780_vm3, %v1770_v23, %v1771_v62  ;;  %v1692_v23 = vrot.slane %v7815_v14, 4 }
 0x2bf   : > { %3146 = vmatmul.mubr.bf16.gmra.mrb[76].mxu0 %v7760_v5  ;;  %3725 = vmatmul.mubr.bf16.gmra.mrb[76].mxu1 %v7760_v5  ;;  %v1711_v5 = vsel %vm1699_vm4, %v1686_v32, %v1687_v26  ;;  %v1709_v32 = vsel %vm1699_vm4, %v1688_v10, %v1689_v39  ;;  %v1748_v39 = vrot.slane %v7546_v34, 5 }
 0x2c0   : > { %3155 = vmatprep.mubr.bf16.mxu0 %v7859_v30  ;;  %3734 = vmatprep.mubr.bf16.mxu1 %v7859_v30  ;;  %v8085_v63 = vpack.c.bf16 %v1711_v5, %v1712_v48  ;;  %v1791_v30 = vsel %vm1780_vm3, %v1768_v15, %v1769_v41  ;;  %v1710_v15 = vsel %vm1699_vm4, %v1687_v26, %v1688_v10  ;;  %v1773_v26 = vrot.slane %v7815_v14, 5 }
 0x2c1   : > { %v8096_v11 = vpack.c.bf16 %v1790_v4, %v1791_v30  ;;  %v8103_v44 = vpack.c.bf16 %v1709_v32, %v1710_v15  ;;  %v1788_v41 = vsel %vm1780_vm3, %v1771_v62, %v1772_v29  ;;  %v1707_v5 = vsel %vm1699_vm4, %v1690_v0, %v1691_v53 }
 0x2c2   : > { %v8111_v24 = vpack.c.bf16 %v1788_v41, %v1789_v21  ;;  %v8119_v48 = vpack.c.bf16 %v1707_v5, %v1708_v7  ;;  %v1693_v30 = vrot.slane %v7789_v52, 4  ;;  %v1775_v10 = vrot.slane %v7807_v9, 5 }
 0x2c3   : > { %v1786_v4 = vsel %vm1780_vm3, %v1773_v26, %v1774_v25  ;;  %v1706_v52 = vsel %vm1699_vm4, %v1691_v53, %v1692_v23  ;;  %v1776_v0 = vrot.slane %v7865_v46, 5  ;;  %v1694_v15 = vrot.slane %v7807_v9, 4 }
 0x2c4   : > { %v1705_v14 = vsel %vm1699_vm4, %v1692_v23, %v1693_v30  ;;  %v1695_v41 = vrot.slane %v7865_v46, 4  ;;  %v1777_v21 = vrot.slane %v7880_v18, 5  ;;  %v1778_v7 = vrot.slane %v7857_v3, 5 }
 0x2c5   : > { %v8138_v32 = vpack.c.bf16 %v1705_v14, %v1706_v52  ;;  %v1696_v53 = vrot.slane %v7880_v18, 4  ;;  %v1697_v9 = vrot.slane %v7857_v3, 4  ;;  %v1698_v3 = vrot.slane %v7873_v35, 4 }
 0x2c6   : > { %v1782_v23 = vsel %vm1780_vm3, %v1777_v21, %v1778_v7  ;;  %v1667_v14 = vrot.slane %v7546_v34, 4 }
 0x2c7   : > { %3156 = vmatmul.mubr.bf16.gmra.mrb[80].mxu0 %v7838_v51  ;;  %3735 = vmatmul.mubr.bf16.gmra.mrb[80].mxu1 %v7838_v51  ;;  %v1787_v51 = vsel %vm1780_vm3, %v1772_v29, %v1773_v26  ;;  %v1784_v29 = vsel %vm1780_vm3, %v1775_v10, %v1776_v0  ;;  %v1703_v26 = vsel %vm1699_vm4, %v1694_v15, %v1695_v41 }
 0x2c8   : > { %3165 = vmatprep.mubr.bf16.mxu0 %v7908_v49  ;;  %3744 = vmatprep.mubr.bf16.mxu1 %v7908_v49  ;;  %v8131_v62 = vpack.c.bf16 %v1786_v4, %v1787_v51  ;;  %v1785_v49 = vsel %vm1780_vm3, %v1774_v25, %v1775_v10  ;;  %v1704_v25 = vsel %vm1699_vm4, %v1693_v30, %v1694_v15  ;;  %v1779_v30 = vrot.slane %v7873_v35, 5 }
 0x2c9   : > { %v8149_v5 = vpack.c.bf16 %v1784_v29, %v1785_v49  ;;  %v8156_v46 = vpack.c.bf16 %v1703_v26, %v1704_v25  ;;  %v1783_v10 = vsel %vm1780_vm3, %v1776_v0, %v1777_v21  ;;  %v1702_v18 = vsel %vm1699_vm4, %v1695_v41, %v1696_v53 }
 0x2ca   : > { %v8164_v4 = vpack.c.bf16 %v1782_v23, %v1783_v10  ;;  %v1701_v51 = vsel %vm1699_vm4, %v1696_v53, %v1697_v9  ;;  %v1781_v0 = vsel %vm1780_vm3, %v1778_v7, %v1779_v30  ;;  %v1812_v35 = vsel %vm1780_vm3, %v1779_v30, %v1748_v39 }
 0x2cb   : > { %v8173_v52 = vpack.c.bf16 %v1701_v51, %v1702_v18  ;;  %v1700_v49 = vsel %vm1699_vm4, %v1697_v9, %v1698_v3  ;;  %v1731_v15 = vsel %vm1699_vm4, %v1698_v3, %v1667_v14  ;;  %v1588_v29 = vrot.slane %v7543_v33, 3 }
 0x2cc   : > { %v8191_v41 = vpack.c.bf16 %v1731_v15, %v1700_v49  ;;  %v9578_v7 = vrot.slane %v7546_v34, 3  ;;  %v1506_v25 = vrot.slane %v7549_v40, 2  ;;  %v1589_v9 = vrot.slane %v7553_v43, 3  ;;  %v6794_v49 = vld [vmem:[#allocation7 + $0x424] ss:$16 sps:$4 sm:$0xff]  }
 0x2cd   : > { %v9579_v10 = vrot.slane %v7546_v34, 2  ;;  %v1509_v15 = vrot.slane %v7568_v54, 2  ;;  %v1670_v34 = vrot.slane %v7553_v43, 4 }
 0x2ce   : > { %v1647_v3 = vsel %vm1618_vm1, %v1588_v29, %v1589_v9 }
 0x2cf   : > { %3166 = vmatmul.mubr.bf16.gmra.mrb[84].mxu0 %v7828_v45  ;;  %3745 = vmatmul.mubr.bf16.gmra.mrb[84].mxu1 %v7828_v45  ;;  %v8185_v45 = vpack.c.bf16 %v1812_v35, %v1781_v0  ;;  %v1568_v18 = vsel %vm1537_vm2, %v9579_v10, %v1506_v25  ;;  %v6789_v0 = vld [vmem:[#allocation7 + $0x408] ss:$16 sps:$4 sm:$0xff]   ;;  %v6803_v10 = vld [vmem:[#allocation7 + $0x44c] ss:$16 sps:$4 sm:$0xff]  }
 0x2d0   : > { %3175 = vmatprep.mubr.bf16.mxu0 %v7925_v1  ;;  %3754 = vmatprep.mubr.bf16.mxu1 %v7925_v1  ;;  %v1587_v1 = vrot.slane %v7549_v40, 3 }
 0x2d2   : > { %v1648_v21 = vsel %vm1618_vm1, %v1587_v1, %v1588_v29  ;;  %v1649_v53 = vsel %vm1618_vm1, %v9578_v7, %v1587_v1  ;;  %v6797_v1 = vld [vmem:[#allocation7 + $0x42c] ss:$16 sps:$4 sm:$0xff]   ;;  %v6792_v7 = vld [vmem:[#allocation7 + $0x420] ss:$16 sps:$4 sm:$0xff]   ;;  %v6795_v29 = vld [vmem:[#allocation7 + $0x428] ss:$16 sps:$4 sm:$0xff]  }
 0x2d3   : > { %v1651_v26 = vpack.c.bf16 %v1648_v21, %v1649_v53  ;;  %v1591_v21 = vrot.slane %v7574_v60, 3  ;;  %v1508_v53 = vrot.slane %v7553_v43, 2 }
 0x2d7   : > { %3176 = vmatmul.mubr.bf16.gmra.mrb[88].mxu0 %v7904_v8  ;;  %3755 = vmatmul.mubr.bf16.gmra.mrb[88].mxu1 %v7904_v8  ;;  %v1590_v8 = vrot.slane %v7568_v54, 3 }
 0x2d8   : > { %3185 = vmatprep.mubr.bf16.mxu0 %v7921_v6  ;;  %3764 = vmatprep.mubr.bf16.mxu1 %v7921_v6  ;;  %v1507_v6 = vrot.slane %v7543_v33, 2 }
 0x2d9   : > { %v1646_v51 = vsel %vm1618_vm1, %v1589_v9, %v1590_v8  ;;  %v6800_v9 = vld [vmem:[#allocation7 + $0x444] ss:$16 sps:$4 sm:$0xff]  }
 0x2da   : > { %v1567_v23 = vsel %vm1537_vm2, %v1506_v25, %v1507_v6  ;;  %v1652_v35 = vpack.c.bf16 %v1646_v51, %v1647_v3  ;;  %v1645_v51 = vsel %vm1618_vm1, %v1590_v8, %v1591_v21  ;;  %v6798_v3 = vld [vmem:[#allocation7 + $0x440] ss:$16 sps:$4 sm:$0xff]  }
 0x2db   : > { %v1570_v30 = vpack.c.bf16 %v1567_v23, %v1568_v18  ;;  %v1565_v23 = vsel %vm1537_vm2, %v1508_v53, %v1509_v15 }
 0x2df   : > { %3186 = vmatmul.mubr.bf16.gmra.mrb[92].mxu0 %v7894_v28  ;;  %3765 = vmatmul.mubr.bf16.gmra.mrb[92].mxu1 %v7894_v28  ;;  %v6786_v28 = vld [vmem:[#allocation7 + $0x400] ss:$16 sps:$4 sm:$0xff]  }
 0x2e0   : > { %3228 = vmatprep.mubr.bf16.mxu0 %v1651_v26  ;;  %3807 = vmatprep.mubr.bf16.mxu1 %v1651_v26  ;;  %v9580_v26 = vld [vmem:[#allocation22_spill] sm:$0xff] }
 0x2e1   : > { %v1592_v25 = vrot.slane %v9580_v26, 3  ;;  %v1511_v8 = vrot.slane %v9580_v26, 2 }
 0x2e3   : > { %v1644_v18 = vsel %vm1618_vm1, %v1591_v21, %v1592_v25 }
 0x2e7   : > { %3229 = vmatmul.mubr.bf16.vlgmr.msra.gmra.mrb[32].mxu0 %v1570_v30  ;;  %3808 = vmatmul.mubr.bf16.vlgmr.msra.gmra.mrb[32].mxu1 %v1570_v30 }
 0x2e8   : > { %3390 = vmatpush1.bf16.msra.mxu0 %v6786_v28  ;;  %3238 = vmatprep.mubr.bf16.mxu0 %v1652_v35  ;;  %v1566_v28 = vsel %vm1537_vm2, %v1507_v6, %v1508_v53  ;;  %v9582_v6 = vld [vmem:[#allocation23_spill] sm:$0xff] }
 0x2e9   : > { %3817 = vmatprep.mubr.bf16.mxu1 %v1652_v35  ;;  %3969 = vmatpush1.bf16.msra.mxu1 %v6789_v0  ;;  %v1571_v30 = vpack.c.bf16 %v1565_v23, %v1566_v28  ;;  %v6801_v0 = vld [vmem:[#allocation7 + $0x448] ss:$16 sps:$4 sm:$0xff]   ;;  %v1653_v35 = vpack.c.bf16 %v1644_v18, %v1645_v51  ;;  %v1593_v21 = vrot.slane %v9582_v6, 3  ;;  %v6812_v23 = vld [vmem:[#allocation7 + $0x484] ss:$16 sps:$4 sm:$0xff]  }
 0x2ea   : > { %3391 = vmatprep.subr.bf16.mxu0 %v6794_v49  ;;  %3970 = vmatprep.subr.bf16.mxu1 %v6797_v1  ;;  %v1510_v49 = vrot.slane %v7574_v60, 2  ;;  %v6806_v1 = vld [vmem:[#allocation7 + $0x464] ss:$16 sps:$4 sm:$0xff]   ;;  %v6807_v53 = vld [vmem:[#allocation7 + $0x468] ss:$16 sps:$4 sm:$0xff]  }
 0x2eb   : > { %v1642_v18 = vsel %vm1618_vm1, %v1593_v21, %v1594_v19  ;;  %v1643_v28 = vsel %vm1618_vm1, %v1592_v25, %v1593_v21  ;;  %v9584_v25 = vld [vmem:[#allocation26_spill] sm:$0xff] }
 0x2ec   : > { %3392 = vmatpush1.bf16.msra.mxu0 %v6792_v7  ;;  %v6804_v7 = vld [vmem:[#allocation7 + $0x460] ss:$16 sps:$4 sm:$0xff]   ;;  %v1596_v21 = vrot.slane %v9584_v25, 3 }
 0x2ed   : > { %3971 = vmatpush1.bf16.msra.mxu1 %v6795_v29  ;;  %3393 = vmatprep.subr.bf16.mxu0 %v6800_v9  ;;  %v1563_v29 = vsel %vm1537_vm2, %v1510_v49, %v1511_v8  ;;  %v1564_v9 = vsel %vm1537_vm2, %v1509_v15, %v1510_v49  ;;  %v6818_v15 = vld [vmem:[#allocation7 + $0x4a4] ss:$16 sps:$4 sm:$0xff]   ;;  %v9583_v49 = vld [vmem:[#allocation25_spill] sm:$0xff] }
 0x2ee   : > { %3972 = vmatprep.subr.bf16.mxu1 %v6803_v10  ;;  %v6815_v10 = vld [vmem:[#allocation7 + $0x48c] ss:$16 sps:$4 sm:$0xff]   ;;  %v1572_v51 = vpack.c.bf16 %v1563_v29, %v1564_v9  ;;  %v1512_v29 = vrot.slane %v9582_v6, 2 }
 0x2ef   : > { %3239 = vmatmul.mubr.bf16.gmra.mrb[36].mxu0 %v1571_v30  ;;  %3818 = vmatmul.mubr.bf16.gmra.mrb[36].mxu1 %v1571_v30  ;;  %v6810_v30 = vld [vmem:[#allocation7 + $0x480] ss:$16 sps:$4 sm:$0xff]  }
 0x2f0   : > { %3248 = vmatprep.mubr.bf16.mxu0 %v1653_v35  ;;  %3827 = vmatprep.mubr.bf16.mxu1 %v1653_v35  ;;  %v1513_v35 = vrot.slane %v9581_v27, 2 }
 0x2f1   : > { %3394 = vmatpush1.bf16.msra.mxu0 %v6798_v3  ;;  %3973 = vmatpush1.bf16.msra.mxu1 %v6801_v0  ;;  %v6813_v3 = vld [vmem:[#allocation7 + $0x488] ss:$16 sps:$4 sm:$0xff]   ;;  %v1654_v0 = vpack.c.bf16 %v1642_v18, %v1643_v28  ;;  %v1562_v28 = vsel %vm1537_vm2, %v1511_v8, %v1512_v29 }
 0x2f2   : > { %3395 = vmatprep.subr.bf16.mxu0 %v6806_v1  ;;  %3974 = vmatprep.subr.bf16.mxu1 %v6809_v22  ;;  %v6821_v22 = vld [vmem:[#allocation7 + $0x4ac] ss:$16 sps:$4 sm:$0xff]   ;;  %v1595_v1 = vrot.slane %v9583_v49, 3  ;;  %v1561_v9 = vsel %vm1537_vm2, %v1512_v29, %v1513_v35  ;;  %v6828_v29 = vld [vmem:[#allocation7 + $0x4e0] ss:$16 sps:$4 sm:$0xff]  }
 0x2f4   : > { %v1640_v18 = vsel %vm1618_vm1, %v1595_v1, %v1596_v21 }
 0x2f5   : > { %3396 = vmatpush1.bf16.msra.mxu0 %v6804_v7  ;;  %3975 = vmatpush1.bf16.msra.mxu1 %v6807_v53  ;;  %v6816_v7 = vld [vmem:[#allocation7 + $0x4a0] ss:$16 sps:$4 sm:$0xff]   ;;  %v6819_v53 = vld [vmem:[#allocation7 + $0x4a8] ss:$16 sps:$4 sm:$0xff]  }
 0x2f6   : > { %3397 = vmatprep.subr.bf16.mxu0 %v6812_v23  ;;  %3976 = vmatprep.subr.bf16.mxu1 %v6815_v10  ;;  %v6824_v23 = vld [vmem:[#allocation7 + $0x4c4] ss:$16 sps:$4 sm:$0xff]   ;;  %v6827_v10 = vld [vmem:[#allocation7 + $0x4cc] ss:$16 sps:$4 sm:$0xff]  }
 0x2f7   : > { %3249 = vmatmul.mubr.bf16.gmra.mrb[40].mxu0 %v1572_v51  ;;  %3828 = vmatmul.mubr.bf16.gmra.mrb[40].mxu1 %v1572_v51  ;;  %v1641_v51 = vsel %vm1618_vm1, %v1594_v19, %v1595_v1  ;;  %v1515_v19 = vrot.slane %v9584_v25, 2  ;;  %v9585_v1 = vld [vmem:[#allocation27_spill] sm:$0xff] }
 0x2f8   : > { %3258 = vmatprep.mubr.bf16.mxu0 %v1654_v0  ;;  %3837 = vmatprep.mubr.bf16.mxu1 %v1654_v0  ;;  %v6825_v0 = vld [vmem:[#allocation7 + $0x4c8] ss:$16 sps:$4 sm:$0xff]   ;;  %v1655_v16 = vpack.c.bf16 %v1640_v18, %v1641_v51  ;;  %v1597_v8 = vrot.slane %v9585_v1, 3 }
 0x2f9   : > { %3398 = vmatpush1.bf16.msra.mxu0 %v6810_v30  ;;  %3977 = vmatpush1.bf16.msra.mxu1 %v6813_v3  ;;  %v1573_v30 = vpack.c.bf16 %v1561_v9, %v1562_v28  ;;  %v6822_v3 = vld [vmem:[#allocation7 + $0x4c0] ss:$16 sps:$4 sm:$0xff]  }
 0x2fa   : > { %3399 = vmatprep.subr.bf16.mxu0 %v6818_v15  ;;  %3978 = vmatprep.subr.bf16.mxu1 %v6821_v22  ;;  %v1514_v15 = vrot.slane %v9583_v49, 2  ;;  %v6830_v22 = vld [vmem:[#allocation7 + $0x4e4] ss:$16 sps:$4 sm:$0xff]   ;;  %v1639_v28 = vsel %vm1618_vm1, %v1596_v21, %v1597_v8  ;;  %v9587_v21 = vrot.slane %v7612_v38, 2 }
 0x2fc   : > { %v1560_v9 = vsel %vm1537_vm2, %v1513_v35, %v1514_v15  ;;  %v6842_v35 = vld [vmem:[#allocation7 + $0x524] ss:$16 sps:$4 sm:$0xff]  }
 0x2fd   : > { %3400 = vmatpush1.bf16.msra.mxu0 %v6816_v7  ;;  %3979 = vmatpush1.bf16.msra.mxu1 %v6819_v53  ;;  %v6831_v7 = vld [vmem:[#allocation7 + $0x4e8] ss:$16 sps:$4 sm:$0xff]   ;;  %v1559_v53 = vsel %vm1537_vm2, %v1514_v15, %v1515_v19  ;;  %v1516_v15 = vrot.slane %v9585_v1, 2 }
 0x2fe   : > { %3401 = vmatprep.subr.bf16.mxu0 %v6824_v23  ;;  %3980 = vmatprep.subr.bf16.mxu1 %v6827_v10  ;;  %v6836_v23 = vld [vmem:[#allocation7 + $0x504] ss:$16 sps:$4 sm:$0xff]   ;;  %v6839_v10 = vld [vmem:[#allocation7 + $0x50c] ss:$16 sps:$4 sm:$0xff]   ;;  %v1574_v51 = vpack.c.bf16 %v1559_v53, %v1560_v9  ;;  %v6843_v53 = vld [vmem:[#allocation7 + $0x528] ss:$16 sps:$4 sm:$0xff]  }
 0x2ff   : > { %3259 = vmatmul.mubr.bf16.gmra.mrb[44].mxu0 %v1573_v30  ;;  %3838 = vmatmul.mubr.bf16.gmra.mrb[44].mxu1 %v1573_v30  ;;  %v6834_v30 = vld [vmem:[#allocation7 + $0x500] ss:$16 sps:$4 sm:$0xff]   ;;  %v1558_v9 = vsel %vm1537_vm2, %v1515_v19, %v1516_v15 }
 0x300   : > { %3268 = vmatprep.mubr.bf16.mxu0 %v1655_v16  ;;  %3847 = vmatprep.mubr.bf16.mxu1 %v1655_v16  ;;  %v9586_v16 = vrot.slane %v7612_v38, 3  ;;  %v6852_v19 = vld [vmem:[#allocation7 + $0x560] ss:$16 sps:$4 sm:$0xff]  }
 0x301   : > { %3402 = vmatpush1.bf16.msra.mxu0 %v6822_v3  ;;  %3981 = vmatpush1.bf16.msra.mxu1 %v6825_v0  ;;  %v6837_v3 = vld [vmem:[#allocation7 + $0x508] ss:$16 sps:$4 sm:$0xff]  }
 0x302   : > { %3403 = vmatprep.subr.bf16.mxu0 %v6830_v22  ;;  %3982 = vmatprep.subr.bf16.mxu1 %v6833_v50  ;;  %v1638_v18 = vsel %vm1618_vm1, %v1597_v8, %v9586_v16  ;;  %v6845_v50 = vld [vmem:[#allocation7 + $0x52c] ss:$16 sps:$4 sm:$0xff]   ;;  %v6840_v22 = vld [vmem:[#allocation7 + $0x520] ss:$16 sps:$4 sm:$0xff]   ;;  %v1557_v8 = vsel %vm1537_vm2, %v1516_v15, %v9587_v21  ;;  %v6849_v16 = vld [vmem:[#allocation7 + $0x548] ss:$16 sps:$4 sm:$0xff]  }
 0x303   : > { %v1656_v0 = vpack.c.bf16 %v1638_v18, %v1639_v28  ;;  %v6854_v18 = vld [vmem:[#allocation7 + $0x564] ss:$16 sps:$4 sm:$0xff]   ;;  %v9588_v28 = vld [vmem:[#allocation29_spill] sm:$0xff]  ;;  %v9590_v15 = vrot.slane %v7660_v17, 3 }
 0x305   : > { %3404 = vmatpush1.bf16.msra.mxu0 %v6828_v29  ;;  %3983 = vmatpush1.bf16.msra.mxu1 %v6831_v7  ;;  %v6848_v29 = vld [vmem:[#allocation7 + $0x544] ss:$16 sps:$4 sm:$0xff]   ;;  %v6851_v7 = vld [vmem:[#allocation7 + $0x54c] ss:$16 sps:$4 sm:$0xff]  }
 0x306   : > { %3405 = vmatprep.subr.bf16.mxu0 %v6836_v23  ;;  %3984 = vmatprep.subr.bf16.mxu1 %v6839_v10  ;;  %v1575_v23 = vpack.c.bf16 %v1557_v8, %v1558_v9  ;;  %v6846_v10 = vld [vmem:[#allocation7 + $0x540] ss:$16 sps:$4 sm:$0xff]   ;;  %v6866_v9 = vld [vmem:[#allocation7 + $0x5a4] ss:$16 sps:$4 sm:$0xff]  }
 0x307   : > { %3269 = vmatmul.mubr.bf16.gmra.mrb[48].mxu0 %v1574_v51  ;;  %3848 = vmatmul.mubr.bf16.gmra.mrb[48].mxu1 %v1574_v51  ;;  %v6857_v51 = vld [vmem:[#allocation7 + $0x56c] ss:$16 sps:$4 sm:$0xff]   ;;  %v6858_v8 = vld [vmem:[#allocation7 + $0x580] ss:$16 sps:$4 sm:$0xff]  }
 0x308   : > { %3278 = vmatprep.mubr.bf16.mxu0 %v1656_v0  ;;  %3857 = vmatprep.mubr.bf16.mxu1 %v1656_v0  ;;  %v6855_v0 = vld [vmem:[#allocation7 + $0x568] ss:$16 sps:$4 sm:$0xff]  }
 0x309   : > { %3406 = vmatpush1.bf16.msra.mxu0 %v6834_v30  ;;  %3985 = vmatpush1.bf16.msra.mxu1 %v6837_v3  ;;  %v9589_v30 = vld [vmem:[#allocation28_spill] sm:$0xff] }
 0x30a   : > { %3407 = vmatprep.subr.bf16.mxu0 %v6842_v35  ;;  %3986 = vmatprep.subr.bf16.mxu1 %v6845_v50  ;;  %v1601_v3 = vrot.slane %v9589_v30, 3  ;;  %v6860_v35 = vld [vmem:[#allocation7 + $0x584] ss:$16 sps:$4 sm:$0xff]   ;;  %v6863_v50 = vld [vmem:[#allocation7 + $0x58c] ss:$16 sps:$4 sm:$0xff]  }
 0x30d   : > { %3408 = vmatpush1.bf16.msra.mxu0 %v6840_v22  ;;  %3987 = vmatpush1.bf16.msra.mxu1 %v6843_v53  ;;  %v1634_v22 = vsel %vm1618_vm1, %v1601_v3, %v9590_v15  ;;  %v9591_v53 = vrot.slane %v7609_v37, 3 }
 0x30e   : > { %3409 = vmatprep.subr.bf16.mxu0 %v6848_v29  ;;  %3988 = vmatprep.subr.bf16.mxu1 %v6851_v7  ;;  %v6861_v29 = vld [vmem:[#allocation7 + $0x588] ss:$16 sps:$4 sm:$0xff]  }
 0x30f   : > { %3279 = vmatmul.mubr.bf16.gmra.mrb[52].mxu0 %v1575_v23  ;;  %3858 = vmatmul.mubr.bf16.gmra.mrb[52].mxu1 %v1575_v23  ;;  %v1635_v21 = vsel %vm1618_vm1, %v9591_v53, %v1601_v3  ;;  %v6869_v23 = vld [vmem:[#allocation7 + $0x5ac] ss:$16 sps:$4 sm:$0xff]   ;;  %v6873_v53 = vld [vmem:[#allocation7 + $0x5c8] ss:$16 sps:$4 sm:$0xff]  }
 0x310   : > { %3288 = vmatprep.mubr.bf16.mxu0 %v9588_v28  ;;  %3867 = vmatprep.mubr.bf16.mxu1 %v9588_v28  ;;  %v1658_v7 = vpack.c.bf16 %v1634_v22, %v1635_v21  ;;  %v9593_v28 = vrot.slane %v7660_v17, 2  ;;  %v6870_v22 = vld [vmem:[#allocation7 + $0x5c0] ss:$16 sps:$4 sm:$0xff]   ;;  %v6878_v21 = vld [vmem:[#allocation7 + $0x5e4] ss:$16 sps:$4 sm:$0xff]  }
 0x311   : > { %3410 = vmatpush1.bf16.msra.mxu0 %v6846_v10  ;;  %3989 = vmatpush1.bf16.msra.mxu1 %v6849_v16  ;;  %v9592_v10 = vld [vmem:[#allocation30_spill] sm:$0xff]  ;;  %v1520_v16 = vrot.slane %v9589_v30, 2 }
 0x312   : > { %3411 = vmatprep.subr.bf16.mxu0 %v6854_v18  ;;  %3990 = vmatprep.subr.bf16.mxu1 %v6857_v51  ;;  %v6864_v18 = vld [vmem:[#allocation7 + $0x5a0] ss:$16 sps:$4 sm:$0xff]   ;;  %v6867_v51 = vld [vmem:[#allocation7 + $0x5a8] ss:$16 sps:$4 sm:$0xff]  }
 0x313   : > { %v1553_v3 = vsel %vm1537_vm2, %v1520_v16, %v9593_v28  ;;  %v9601_v28 = vld [vmem:[#allocation37_spill] sm:$0xff] }
 0x315   : > { %3412 = vmatpush1.bf16.msra.mxu0 %v6852_v19  ;;  %3991 = vmatpush1.bf16.msra.mxu1 %v6855_v0  ;;  %v6872_v19 = vld [vmem:[#allocation7 + $0x5c4] ss:$16 sps:$4 sm:$0xff]   ;;  %v6875_v0 = vld [vmem:[#allocation7 + $0x5cc] ss:$16 sps:$4 sm:$0xff]  }
 0x316   : > { %3413 = vmatprep.subr.bf16.mxu0 %v6860_v35  ;;  %3992 = vmatprep.subr.bf16.mxu1 %v6863_v50  ;;  %v9594_v35 = vrot.slane %v7609_v37, 2 }
 0x317   : > { %3289 = vmatmul.mubr.bf16.gmra.mrb[56].mxu0 %v9592_v10  ;;  %3868 = vmatmul.mubr.bf16.gmra.mrb[56].mxu1 %v9592_v10  ;;  %v9597_v10 = vld [vmem:[#allocation33_spill] sm:$0xff] }
 0x318   : > { %3298 = vmatprep.mubr.bf16.mxu0 %v1658_v7  ;;  %3877 = vmatprep.mubr.bf16.mxu1 %v1658_v7  ;;  %v1554_v50 = vsel %vm1537_vm2, %v9594_v35, %v1520_v16  ;;  %v6876_v7 = vld [vmem:[#allocation7 + $0x5e0] ss:$16 sps:$4 sm:$0xff]   ;;  %v1668_v35 = vrot.slane %v7549_v40, 4 }
 0x319   : > { %3414 = vmatpush1.bf16.msra.mxu0 %v6858_v8  ;;  %3993 = vmatpush1.bf16.msra.mxu1 %v6861_v29  ;;  %v1577_v15 = vpack.c.bf16 %v1553_v3, %v1554_v50  ;;  %v6881_v8 = vld [vmem:[#allocation7 + $0x5ec] ss:$16 sps:$4 sm:$0xff]   ;;  %v9598_v16 = vld [vmem:[#allocation34_spill] sm:$0xff]  ;;  %v1751_v50 = vrot.slane %v7553_v43, 5  ;;  %v1756_v43 = vrot.slane %v9581_v27, 5 }
 0x31a   : > { %3415 = vmatprep.subr.bf16.mxu0 %v6866_v9  ;;  %3994 = vmatprep.subr.bf16.mxu1 %v6869_v23  ;;  %v9595_v29 = vld [vmem:[#allocation31_spill] sm:$0xff]  ;;  %v9596_v23 = vld [vmem:[#allocation32_spill] sm:$0xff]  ;;  %v9602_v3 = vld [vmem:[#allocation38_spill] sm:$0xff] }
 0x31b   : > { %v6879_v9 = vld [vmem:[#allocation7 + $0x5e8] ss:$16 sps:$4 sm:$0xff]  }
 0x31d   : > { %3416 = vmatpush1.bf16.msra.mxu0 %v6864_v18  ;;  %3995 = vmatpush1.bf16.msra.mxu1 %v6867_v51  ;;  %v9599_v18 = vld [vmem:[#allocation35_spill] sm:$0xff]  ;;  %v9600_v51 = vld [vmem:[#allocation36_spill] sm:$0xff] }
 0x31e   : > { %3417 = vmatprep.subr.bf16.mxu0 %v6872_v19  ;;  %3996 = vmatprep.subr.bf16.mxu1 %v6875_v0  ;;  %v9603_v19 = vld [vmem:[#allocation39_spill] sm:$0xff] }
 0x31f   : > { %3299 = vmatmul.mubr.bf16.gmra.mrb[60].mxu0 %v1577_v15  ;;  %3878 = vmatmul.mubr.bf16.gmra.mrb[60].mxu1 %v1577_v15 }
 0x320   : > { %3308 = vmatprep.mubr.bf16.mxu0 %v9595_v29  ;;  %3887 = vmatprep.mubr.bf16.mxu1 %v9595_v29 }
 0x321   : > { %3418 = vmatpush1.bf16.msra.mxu0 %v6870_v22  ;;  %3997 = vmatpush1.bf16.msra.mxu1 %v6873_v53 }
 0x322   : > { %3419 = vmatprep.subr.bf16.mxu0 %v6878_v21  ;;  %3998 = vmatprep.subr.bf16.mxu1 %v6881_v8  ;;  %v1753_v21 = vrot.slane %v7574_v60, 5 }
 0x325   : > { %3420 = vmatpush1.bf16.msra.mxu0 %v6876_v7  ;;  %3999 = vmatpush1.bf16.msra.mxu1 %v6879_v9 }
 0x327   : > { %3309 = vmatmul.mubr.bf16.gmra.mrb[64].mxu0 %v9596_v23  ;;  %3888 = vmatmul.mubr.bf16.gmra.mrb[64].mxu1 %v9596_v23 }
 0x328   : > { %3318 = vmatprep.mubr.bf16.mxu0 %v9597_v10  ;;  %3897 = vmatprep.mubr.bf16.mxu1 %v9597_v10  ;;  %v1672_v10 = vrot.slane %v7574_v60, 4 }
 0x32f   : > { %3319 = vmatmul.mubr.bf16.gmra.mrb[68].mxu0 %v9598_v16  ;;  %3898 = vmatmul.mubr.bf16.gmra.mrb[68].mxu1 %v9598_v16  ;;  %v1673_v16 = vrot.slane %v9580_v26, 4 }
 0x330   : > { %3328 = vmatprep.mubr.bf16.mxu0 %v9599_v18  ;;  %3907 = vmatprep.mubr.bf16.mxu1 %v9599_v18  ;;  %v1755_v18 = vrot.slane %v9582_v6, 5 }
 0x337   : > { %3329 = vmatmul.mubr.bf16.gmra.mrb[72].mxu0 %v9600_v51  ;;  %3908 = vmatmul.mubr.bf16.gmra.mrb[72].mxu1 %v9600_v51  ;;  %v1725_v51 = vsel %vm1699_vm4, %v1672_v10, %v1673_v16 }
 0x338   : > { %3338 = vmatprep.mubr.bf16.mxu0 %v9601_v28  ;;  %3917 = vmatprep.mubr.bf16.mxu1 %v9601_v28 }
 0x33f   : > { %3339 = vmatmul.mubr.bf16.gmra.mrb[76].mxu0 %v7931_v47  ;;  %3918 = vmatmul.mubr.bf16.gmra.mrb[76].mxu1 %v7931_v47  ;;  %v1749_v47 = vrot.slane %v7549_v40, 5  ;;  %v1730_v40 = vsel %vm1699_vm4, %v1667_v14, %v1668_v35  ;;  %v1754_v14 = vrot.slane %v9580_v26, 5  ;;  %v1757_v26 = vrot.slane %v9583_v49, 5 }
 0x340   : > { %3348 = vmatprep.mubr.bf16.mxu0 %v7944_v2  ;;  %3927 = vmatprep.mubr.bf16.mxu1 %v7944_v2  ;;  %v1750_v2 = vrot.slane %v7543_v33, 5 }
 0x341   : > { %v1806_v29 = vsel %vm1780_vm3, %v1753_v21, %v1754_v14 }
 0x342   : > { %v1809_v22 = vsel %vm1780_vm3, %v1750_v2, %v1751_v50 }
 0x347   : > { %3349 = vmatmul.mubr.bf16.gmra.mrb[80].mxu0 %v9602_v3  ;;  %3928 = vmatmul.mubr.bf16.gmra.mrb[80].mxu1 %v9602_v3  ;;  %v1804_v3 = vsel %vm1780_vm3, %v1755_v18, %v1756_v43 }
 0x348   : > { %3358 = vmatprep.mubr.bf16.mxu0 %v7959_v36  ;;  %3937 = vmatprep.mubr.bf16.mxu1 %v7959_v36  ;;  %v1810_v36 = vsel %vm1780_vm3, %v1749_v47, %v1750_v2  ;;  %v1675_v2 = vrot.slane %v9581_v27, 4 }
 0x34f   : > { %3359 = vmatmul.mubr.bf16.gmra.mrb[84].mxu0 %v9603_v19  ;;  %3938 = vmatmul.mubr.bf16.gmra.mrb[84].mxu1 %v9603_v19  ;;  %v1805_v19 = vsel %vm1780_vm3, %v1754_v14, %v1755_v18 }
 0x350   : > { %3368 = vmatprep.mubr.bf16.mxu0 %v7983_v20  ;;  %3947 = vmatprep.mubr.bf16.mxu1 %v7983_v20  ;;  %v1811_v20 = vsel %vm1780_vm3, %v1748_v39, %v1749_v47  ;;  %v1816_v47 = vpack.c.bf16 %v1804_v3, %v1805_v19 }
 0x351   : > { %v1813_v0 = vpack.c.bf16 %v1810_v36, %v1811_v20  ;;  %v1674_v36 = vrot.slane %v9582_v6, 4  ;;  %v1758_v20 = vrot.slane %v9584_v25, 5  ;;  %v1677_v6 = vrot.slane %v9584_v25, 4 }
 0x352   : > { %v1678_v25 = vrot.slane %v9585_v1, 4 }
 0x353   : > { %v1724_v27 = vsel %vm1699_vm4, %v1673_v16, %v1674_v36 }
 0x354   : > { %v1720_v14 = vsel %vm1699_vm4, %v1677_v6, %v1678_v25 }
 0x357   : > { %3369 = vmatmul.mubr.bf16.gmra.mrb[88].mxu0 %v7985_v61  ;;  %3948 = vmatmul.mubr.bf16.gmra.mrb[88].mxu1 %v7985_v61  ;;  %v1752_v61 = vrot.slane %v7568_v54, 5 }
 0x358   : > { %3378 = vmatprep.mubr.bf16.mxu0 %v8001_v59  ;;  %3957 = vmatprep.mubr.bf16.mxu1 %v8001_v59  ;;  %v1669_v59 = vrot.slane %v7543_v33, 4  ;;  %v1671_v33 = vrot.slane %v7568_v54, 4 }
 0x359   : > { %v1808_v39 = vsel %vm1780_vm3, %v1751_v50, %v1752_v61  ;;  %v1807_v7 = vsel %vm1780_vm3, %v1752_v61, %v1753_v21  ;;  %v1803_v61 = vsel %vm1780_vm3, %v1756_v43, %v1757_v26  ;;  %v9604_v21 = vrot.slane %v7612_v38, 4 }
 0x35a   : > { %v1729_v15 = vsel %vm1699_vm4, %v1668_v35, %v1669_v59  ;;  %v1814_v53 = vpack.c.bf16 %v1808_v39, %v1809_v22  ;;  %v1727_v8 = vsel %vm1699_vm4, %v1670_v34, %v1671_v33  ;;  %v1728_v54 = vsel %vm1699_vm4, %v1669_v59, %v1670_v34 }
 0x35b   : > { %v1733_v9 = vpack.c.bf16 %v1727_v8, %v1728_v54  ;;  %v1815_v23 = vpack.c.bf16 %v1806_v29, %v1807_v7  ;;  %v1726_v28 = vsel %vm1699_vm4, %v1671_v33, %v1672_v10  ;;  %v1802_v35 = vsel %vm1780_vm3, %v1757_v26, %v1758_v20 }
 0x35c   : > { %v1734_v60 = vpack.c.bf16 %v1725_v51, %v1726_v28  ;;  %v1817_v50 = vpack.c.bf16 %v1802_v35, %v1803_v61  ;;  %v1719_v34 = vsel %vm1699_vm4, %v1678_v25, %v9604_v21  ;;  %v1763_v8 = vrot.slane %v9589_v30, 5  ;;  %v8517_v35 = vld [vmem:[#allocation8 + $0x10] sm:$0xff] }
 0x35d   : > { %v9605_v29 = vrot.slane %v7660_v17, 5  ;;  %v9608_v10 = vrot.slane %v7609_v37, 4 }
 0x35f   : > { %3379 = vmatmul.mubr.bf16.gmra.mrb[92].mxu0 %v8003_v58  ;;  %3958 = vmatmul.mubr.bf16.gmra.mrb[92].mxu1 %v8003_v58  ;;  %v1732_v58 = vpack.c.bf16 %v1729_v15, %v1730_v40  ;;  %v1676_v15 = vrot.slane %v9583_v49, 4  ;;  %v1759_v40 = vrot.slane %v9585_v1, 5  ;;  %v1796_v38 = vsel %vm1780_vm3, %v1763_v8, %v9605_v29 }
 0x360   : > { %3421 = vmatprep.mubr.bf16.mxu0 %v1813_v0  ;;  %4000 = vmatprep.mubr.bf16.mxu1 %v1813_v0  ;;  %v1723_v0 = vsel %vm1699_vm4, %v1674_v36, %v1675_v2  ;;  %v9606_v1 = vrot.slane %v7609_v37, 5  ;;  %v6882_v37 = vld [vmem:[%s9477_s10 + $0x40] sm:$0xff]  }
 0x361   : > { %v1735_v59 = vpack.c.bf16 %v1723_v0, %v1724_v27  ;;  %v1721_v39 = vsel %vm1699_vm4, %v1676_v15, %v1677_v6  ;;  %v1800_v22 = vsel %vm1780_vm3, %v1759_v40, %v1760_v12  ;;  %v1737_v12 = vpack.c.bf16 %v1719_v34, %v1720_v14  ;;  %5947 = vmatprep.subr.bf16.mxu0 %v6882_v37  ;;  %v8534_v34 = vld [vmem:[#allocation8 + $0x28] sm:$0xff]  ;;  %v8536_v14 = vld [vmem:[#allocation8 + $0x38] sm:$0xff] }
 0x362   : > { %v1797_v7 = vsel %vm1780_vm3, %v9606_v1, %v1763_v8 }
 0x363   : > { %v1820_v54 = vpack.c.bf16 %v1796_v38, %v1797_v7 }
 0x367   : > { %3422 = vmatmul.mubr.bf16.vlgmr.msra.gmra.mrb[32].mxu0 %v1732_v58  ;;  %4001 = vmatmul.mubr.bf16.vlgmr.msra.gmra.mrb[32].mxu1 %v1732_v58  ;;  %v1722_v58 = vsel %vm1699_vm4, %v1675_v2, %v1676_v15  ;;  %v6893_v15 = vld [vmem:[%s9477_s10 + $0x90] sm:$0xff]  }
 0x368   : > { %3431 = vmatprep.mubr.bf16.mxu0 %v1814_v53  ;;  %4010 = vmatprep.mubr.bf16.mxu1 %v1814_v53  ;;  %v1736_v49 = vpack.c.bf16 %v1721_v39, %v1722_v58  ;;  %v1801_v53 = vsel %vm1780_vm3, %v1758_v20, %v1759_v40  ;;  %v8524_v40 = vld [vmem:[#allocation8 + $0x8] sm:$0xff]  ;;  %v8526_v58 = vld [vmem:[#allocation8 + $0x20] sm:$0xff] }
 0x369   : > { %v1818_v33 = vpack.c.bf16 %v1800_v22, %v1801_v53  ;;  %v8528_v22 = vld [vmem:[#allocation8 + $0x30] sm:$0xff] }
 0x36f   : > { %3432 = vmatmul.mubr.bf16.gmra.mrb[36].mxu0 %v1733_v9  ;;  %4011 = vmatmul.mubr.bf16.gmra.mrb[36].mxu1 %v1733_v9  ;;  %v9607_v9 = vrot.slane %v7660_v17, 4  ;;  %v6883_v17 = vld [vmem:[%s9477_s10] sm:$0xff]  }
 0x370   : > { %3441 = vmatprep.mubr.bf16.mxu0 %v1815_v23  ;;  %4020 = vmatprep.mubr.bf16.mxu1 %v1815_v23 }
 0x371   : > { %5948 = vmatpush3.bf16.msra.mxu0 %v6883_v17 }
 0x377   : > { %3442 = vmatmul.mubr.bf16.gmra.mrb[40].mxu0 %v1734_v60  ;;  %4021 = vmatmul.mubr.bf16.gmra.mrb[40].mxu1 %v1734_v60 }
 0x378   : > { %3451 = vmatprep.mubr.bf16.mxu0 %v1816_v47  ;;  %4030 = vmatprep.mubr.bf16.mxu1 %v1816_v47  ;;  %v8513_v47 = vld [vmem:[#allocation8] sm:$0xff] }
 0x37f   : > { %3452 = vmatmul.mubr.bf16.gmra.mrb[44].mxu0 %v1735_v59  ;;  %4031 = vmatmul.mubr.bf16.gmra.mrb[44].mxu1 %v1735_v59 }
 0x380   : > { %3461 = vmatprep.mubr.bf16.mxu0 %v1817_v50  ;;  %4040 = vmatprep.mubr.bf16.mxu1 %v1817_v50 }
 0x387   : > { %3462 = vmatmul.mubr.bf16.gmra.mrb[48].mxu0 %v1736_v49  ;;  %4041 = vmatmul.mubr.bf16.gmra.mrb[48].mxu1 %v1736_v49 }
 0x388   : > { %3471 = vmatprep.mubr.bf16.mxu0 %v1818_v33  ;;  %4050 = vmatprep.mubr.bf16.mxu1 %v1818_v33  ;;  %v8532_v33 = vld [vmem:[#allocation8 + $0x18] sm:$0xff] }
 0x38f   : > { %3472 = vmatmul.mubr.bf16.gmra.mrb[52].mxu0 %v1737_v12  ;;  %4051 = vmatmul.mubr.bf16.gmra.mrb[52].mxu1 %v1737_v12 }
 0x390   : > { %3481 = vmatprep.mubr.bf16.mxu0 %v8031_v56  ;;  %4060 = vmatprep.mubr.bf16.mxu1 %v8031_v56  ;;  %v1682_v56 = vrot.slane %v9589_v30, 4 }
 0x392   : > { %v1715_v23 = vsel %vm1699_vm4, %v1682_v56, %v9607_v9  ;;  %v1716_v43 = vsel %vm1699_vm4, %v9608_v10, %v1682_v56 }
 0x393   : > { %v1739_v16 = vpack.c.bf16 %v1715_v23, %v1716_v43 }
 0x397   : > { %3482 = vmatmul.mubr.bf16.gmra.mrb[56].mxu0 %v8041_v42  ;;  %4061 = vmatmul.mubr.bf16.gmra.mrb[56].mxu1 %v8041_v42  ;;  %v6884_v42 = vld [vmem:[%s9477_s10 + $0xc0] sm:$0xff]  }
 0x398   : > { %3491 = vmatprep.mubr.bf16.mxu0 %v1820_v54  ;;  %4070 = vmatprep.mubr.bf16.mxu1 %v1820_v54 }
 0x399   : > { %5969 = vmatprep.subr.bf16.mxu1 %v6884_v42 }
 0x39f   : > { %3492 = vmatmul.mubr.bf16.gmra.mrb[60].mxu0 %v1739_v16  ;;  %4071 = vmatmul.mubr.bf16.gmra.mrb[60].mxu1 %v1739_v16 }
 0x3a0   : > { %3501 = vmatprep.mubr.bf16.mxu0 %v8059_v13  ;;  %4080 = vmatprep.mubr.bf16.mxu1 %v8059_v13  ;;  %v6885_v13 = vld [vmem:[%s9477_s10 + $0x80] sm:$0xff]  }
 0x3a1   : > { %5970 = vmatpush3.bf16.msra.mxu1 %v6885_v13 }
 0x3a7   : > { %3502 = vmatmul.mubr.bf16.gmra.mrb[64].mxu0 %v8067_v57  ;;  %4081 = vmatmul.mubr.bf16.gmra.mrb[64].mxu1 %v8067_v57  ;;  %v6886_v57 = vld [vmem:[%s9477_s10 + $0x48] sm:$0xff]  }
 0x3a8   : > { %3511 = vmatprep.mubr.bf16.mxu0 %v8078_v55  ;;  %4090 = vmatprep.mubr.bf16.mxu1 %v8078_v55  ;;  %v6887_v55 = vld [vmem:[%s9477_s10 + $0x8] sm:$0xff]  }
 0x3a9   : > { %5949 = vmatprep.subr.bf16.mxu0 %v6886_v57 }
 0x3aa   : > { %5950 = vmatpush3.bf16.msra.mxu0 %v6887_v55 }
 0x3af   : > { %3512 = vmatmul.mubr.bf16.gmra.mrb[68].mxu0 %v8085_v63  ;;  %4091 = vmatmul.mubr.bf16.gmra.mrb[68].mxu1 %v8085_v63  ;;  %v6888_v63 = vld [vmem:[%s9477_s10 + $0xc8] sm:$0xff]  }
 0x3b0   : > { %3521 = vmatprep.mubr.bf16.mxu0 %v8096_v11  ;;  %4100 = vmatprep.mubr.bf16.mxu1 %v8096_v11  ;;  %v6889_v11 = vld [vmem:[%s9477_s10 + $0x88] sm:$0xff]  }
 0x3b1   : > { %5971 = vmatprep.subr.bf16.mxu1 %v6888_v63 }
 0x3b2   : > { %5972 = vmatpush3.bf16.msra.mxu1 %v6889_v11 }
 0x3b7   : > { %3522 = vmatmul.mubr.bf16.gmra.mrb[72].mxu0 %v8103_v44  ;;  %4101 = vmatmul.mubr.bf16.gmra.mrb[72].mxu1 %v8103_v44  ;;  %v6890_v44 = vld [vmem:[%s9477_s10 + $0x50] sm:$0xff]  }
 0x3b8   : > { %3531 = vmatprep.mubr.bf16.mxu0 %v8111_v24  ;;  %4110 = vmatprep.mubr.bf16.mxu1 %v8111_v24  ;;  %v6891_v24 = vld [vmem:[%s9477_s10 + $0x10] sm:$0xff]  }
 0x3b9   : > { %5951 = vmatprep.subr.bf16.mxu0 %v6890_v44 }
 0x3ba   : > { %5952 = vmatpush3.bf16.msra.mxu0 %v6891_v24 }
 0x3bf   : > { %3532 = vmatmul.mubr.bf16.gmra.mrb[76].mxu0 %v8119_v48  ;;  %4111 = vmatmul.mubr.bf16.gmra.mrb[76].mxu1 %v8119_v48  ;;  %v6892_v48 = vld [vmem:[%s9477_s10 + $0xd0] sm:$0xff]  }
 0x3c0   : > { %3541 = vmatprep.mubr.bf16.mxu0 %v8131_v62  ;;  %4120 = vmatprep.mubr.bf16.mxu1 %v8131_v62  ;;  %v2025_v62 = vsub.s32 0, %v7540_v31 }
 0x3c1   : > { %5973 = vmatprep.subr.bf16.mxu1 %v6892_v48 }
 0x3c2   : > { %5974 = vmatpush3.bf16.msra.mxu1 %v6893_v15 }
 0x3c7   : > { %3542 = vmatmul.mubr.bf16.gmra.mrb[80].mxu0 %v8138_v32  ;;  %4121 = vmatmul.mubr.bf16.gmra.mrb[80].mxu1 %v8138_v32  ;;  %v2033_v32 = vsub.s32 2, %v7540_v31 }
 0x3c8   : > { %3551 = vmatprep.mubr.bf16.mxu0 %v8149_v5  ;;  %4130 = vmatprep.mubr.bf16.mxu1 %v8149_v5  ;;  %v2021_v5 = vld [vmem:[%s9475_s8] sm:$0xf] }
 0x3cf   : > { %3552 = vmatmul.mubr.bf16.gmra.mrb[84].mxu0 %v8156_v46  ;;  %4131 = vmatmul.mubr.bf16.gmra.mrb[84].mxu1 %v8156_v46  ;;  %v2029_v46 = vsub.s32 1, %v7540_v31 }
 0x3d0   : > { %3561 = vmatprep.mubr.bf16.mxu0 %v8164_v4  ;;  %4140 = vmatprep.mubr.bf16.mxu1 %v8164_v4  ;;  %v2037_v4 = vsub.s32 3, %v7540_v31 }
 0x3d2   : > { %v8509_v30 = vrot.slane %v2021_v5, %v2037_v4 }
 0x3d7   : > { %3562 = vmatmul.mubr.bf16.gmra.mrb[88].mxu0 %v8173_v52  ;;  %4141 = vmatmul.mubr.bf16.gmra.mrb[88].mxu1 %v8173_v52  ;;  %v8503_v52 = vrot.slane %v2021_v5, %v2025_v62 }
 0x3d8   : > { %3571 = vmatprep.mubr.bf16.mxu0 %v8185_v45  ;;  %4150 = vmatprep.mubr.bf16.mxu1 %v8185_v45  ;;  %v8505_v45 = vrot.slane %v2021_v5, %v2033_v32 }
 0x3df   : > { %3572 = vmatmul.mubr.bf16.gmra.mrb[92].mxu0 %v8191_v41  ;;  %4151 = vmatmul.mubr.bf16.gmra.mrb[92].mxu1 %v8191_v41  ;;  %v8507_v41 = vrot.slane %v2021_v5, %v2029_v46 }
 0x43a   : > { %v3423_v18 = vpop.f32.mrb[32].mxu0  ;;  %v4002_v51 = vpop.f32.mrb[32].mxu1 }
 0x43b   : > { %v6087_v28 = vadd.f32 %v3423_v18, %v8503_v52  ;;  %v6151_v3 = vadd.f32 %v4002_v51, %v8505_v45  ;;  %v3425_v60 = vpop.f32.mrb[33].mxu0  ;;  %v4004_v19 = vpop.f32.mrb[33].mxu1 }
 0x43c   : > { %v6088_v31 = vadd.f32 %v3425_v60, %v8507_v41  ;;  %v6152_v2 = vadd.f32 %v4004_v19, %v8509_v30  ;;  %v3427_v26 = vpop.f32.mrb[34].mxu0  ;;  %v4006_v36 = vpop.f32.mrb[34].mxu1 }
 0x43d   : > { %v4161_v20 = vmax.f32 %v6087_v28, 0.0  ;;  %v4163_v0 = vmax.f32 %v6151_v3, 0.0  ;;  %v6089_v61 = vadd.f32 %v3427_v26, %v8503_v52  ;;  %v6153_v27 = vadd.f32 %v4006_v36, %v8505_v45  ;;  %v3429_v59 = vpop.f32.mrb[35].mxu0  ;;  %v4008_v50 = vpop.f32.mrb[35].mxu1 }
 0x43e   : > { %v4162_v6 = vmax.f32 %v6088_v31, 0.0  ;;  %v4164_v39 = vmax.f32 %v6152_v2, 0.0  ;;  %v6090_v49 = vadd.f32 %v3429_v59, %v8507_v41  ;;  %v6154_v53 = vadd.f32 %v4008_v50, %v8509_v30 }
 0x43f   : > { %v4165_v25 = vmax.f32 %v6089_v61, 0.0  ;;  %v4167_v21 = vmax.f32 %v6153_v27, 0.0  ;;  %v4297_v29 = vmul.f32 %v8513_v47, %v4161_v20  ;;  %v4299_v38 = vmul.f32 %v8517_v35, %v4163_v0 }
 0x440   : > { %v4166_v12 = vmax.f32 %v6090_v49, 0.0  ;;  %v4168_v8 = vmax.f32 %v6154_v53, 0.0  ;;  %v4298_v54 = vmul.f32 %v8524_v40, %v4162_v6  ;;  %v4300_v56 = vmul.f32 %v8532_v33, %v4164_v39 }
 0x441   : > { %v4301_v1 = vmul.f32 %v8526_v58, %v4165_v25  ;;  %v4303_v7 = vmul.f32 %v8528_v22, %v4167_v21 }
 0x442   : > { %v4302_v9 = vmul.f32 %v8534_v34, %v4166_v12  ;;  %v4304_v23 = vmul.f32 %v8536_v14, %v4168_v8  ;;  %v3433_v10 = vpop.f32.mrb[36].mxu0  ;;  %v4012_v43 = vpop.f32.mrb[36].mxu1 }
 0x443   : > { %v4425_v16 = vadd.f32 %v4301_v1, %v4297_v29  ;;  %v4439_v37 = vadd.f32 %v4303_v7, %v4299_v38  ;;  %v6091_v17 = vadd.f32 %v3433_v10, %v8503_v52  ;;  %v6155_v42 = vadd.f32 %v4012_v43, %v8505_v45  ;;  %v3435_v13 = vpop.f32.mrb[37].mxu0  ;;  %v4014_v57 = vpop.f32.mrb[37].mxu1 }
 0x444   : > { %v4432_v55 = vadd.f32 %v4302_v9, %v4298_v54  ;;  %v4446_v63 = vadd.f32 %v4304_v23, %v4300_v56  ;;  %v6092_v11 = vadd.f32 %v3435_v13, %v8507_v41  ;;  %v6156_v44 = vadd.f32 %v4014_v57, %v8509_v30  ;;  %v3437_v24 = vpop.f32.mrb[38].mxu0  ;;  %v4016_v48 = vpop.f32.mrb[38].mxu1 }
 0x445   : > { %v4426_v62 = vrot.slane %v4425_v16, 4  ;;  %v4440_v32 = vrot.slane %v4439_v37, 4  ;;  %v4169_v5 = vmax.f32 %v6091_v17, 0.0  ;;  %v4171_v46 = vmax.f32 %v6155_v42, 0.0  ;;  %v3439_v4 = vpop.f32.mrb[39].mxu0  ;;  %v4018_v18 = vpop.f32.mrb[39].mxu1 }
 0x446   : > { %v4433_v51 = vrot.slane %v4432_v55, 4  ;;  %v4447_v28 = vrot.slane %v4446_v63, 4  ;;  %v4170_v3 = vmax.f32 %v6092_v11, 0.0  ;;  %v4172_v60 = vmax.f32 %v6156_v44, 0.0 }
 0x447   : > { %v4427_v19 = vadd.f32 %v4426_v62, %v4425_v16  ;;  %v4441_v31 = vadd.f32 %v4440_v32, %v4439_v37  ;;  %v4305_v2 = vmul.f32 %v8513_v47, %v4169_v5  ;;  %v4307_v26 = vmul.f32 %v8517_v35, %v4171_v46  ;;  %v6896_v62 = vld [vmem:[%s9477_s10 + $0xd8] sm:$0xff]  }
 0x448   : > { %v4434_v36 = vadd.f32 %v4433_v51, %v4432_v55  ;;  %v4448_v20 = vadd.f32 %v4447_v28, %v4446_v63  ;;  %v4306_v0 = vmul.f32 %v8524_v40, %v4170_v3  ;;  %v4308_v61 = vmul.f32 %v8532_v33, %v4172_v60  ;;  %v6894_v55 = vld [vmem:[%s9477_s10 + $0x58] sm:$0xff]   ;;  %5975 = vmatprep.subr.bf16.mxu1 %v6896_v62 }
 0x449   : > { %v4428_v27 = vrot.slane %v4427_v19, 2  ;;  %v4442_v59 = vrot.slane %v4441_v31, 2  ;;  %v6093_v50 = vadd.f32 %v3437_v24, %v8503_v52  ;;  %v6157_v15 = vadd.f32 %v4016_v48, %v8505_v45  ;;  %v6895_v63 = vld [vmem:[%s9477_s10 + $0x18] sm:$0xff]   ;;  %5953 = vmatprep.subr.bf16.mxu0 %v6894_v55 }
 0x44a   : > { %v4435_v6 = vrot.slane %v4434_v36, 2  ;;  %v4449_v39 = vrot.slane %v4448_v20, 2  ;;  %v6094_v49 = vadd.f32 %v3439_v4, %v8507_v41  ;;  %v6158_v53 = vadd.f32 %v4018_v18, %v8509_v30  ;;  %v3443_v25 = vpop.f32.mrb[40].mxu0  ;;  %v4022_v21 = vpop.f32.mrb[40].mxu1  ;;  %5954 = vmatpush3.bf16.msra.mxu0 %v6895_v63 }
 0x44b   : > { %v4429_v12 = vadd.f32 %v4428_v27, %v4427_v19  ;;  %v4443_v8 = vadd.f32 %v4442_v59, %v4441_v31  ;;  %v4173_v29 = vmax.f32 %v6093_v50, 0.0  ;;  %v4175_v38 = vmax.f32 %v6157_v15, 0.0  ;;  %v8558_v1 = vpop.f32.mrb[41].mxu0  ;;  %v8560_v7 = vpop.f32.mrb[41].mxu1 }
 0x44c   : > { %v4436_v54 = vadd.f32 %v4435_v6, %v4434_v36  ;;  %v4450_v56 = vadd.f32 %v4449_v39, %v4448_v20  ;;  %v4174_v9 = vmax.f32 %v6094_v49, 0.0  ;;  %v4176_v23 = vmax.f32 %v6158_v53, 0.0  ;;  %v8562_v10 = vpop.f32.mrb[42].mxu0  ;;  %v8564_v43 = vpop.f32.mrb[42].mxu1 }
 0x44d   : > { %v4430_v16 = vrot.slane %v4429_v12, 1  ;;  %v4444_v37 = vrot.slane %v4443_v8, 1  ;;  %v4309_v17 = vmul.f32 %v8526_v58, %v4173_v29  ;;  %v4311_v42 = vmul.f32 %v8528_v22, %v4175_v38  ;;  %v8568_v13 = vpop.f32.mrb[43].mxu0  ;;  %v8570_v57 = vpop.f32.mrb[43].mxu1 }
 0x44e   : > { %v4437_v11 = vrot.slane %v4436_v54, 1  ;;  %v4451_v44 = vrot.slane %v4450_v56, 1  ;;  %v4310_v24 = vmul.f32 %v8534_v34, %v4174_v9  ;;  %v4312_v48 = vmul.f32 %v8536_v14, %v4176_v23 }
 0x44f   : > { %v4431_v32 = vadd.f32 %v4430_v16, %v4429_v12  ;;  %v4445_v5 = vadd.f32 %v4444_v37, %v4443_v8  ;;  %v4453_v46 = vadd.f32 %v4309_v17, %v4305_v2  ;;  %v4467_v4 = vadd.f32 %v4311_v42, %v4307_v26 }
 0x450   : > { %v4438_v18 = vadd.f32 %v4437_v11, %v4436_v54  ;;  %v4452_v51 = vadd.f32 %v4451_v44, %v4450_v56  ;;  %v4460_v28 = vadd.f32 %v4310_v24, %v4306_v0  ;;  %v4474_v3 = vadd.f32 %v4312_v48, %v4308_v61 }
 0x451   : > { %v4873_v60 = vpack.c.bf16 %v4431_v32, %v4431_v32  ;;  %v4875_v19 = vpack.c.bf16 %v4445_v5, %v4445_v5  ;;  %v4454_v31 = vrot.slane %v4453_v46, 4  ;;  %v4468_v36 = vrot.slane %v4467_v4, 4 }
 0x452   : > { %v4874_v20 = vpack.c.bf16 %v4438_v18, %v4438_v18  ;;  %v4876_v27 = vpack.c.bf16 %v4452_v51, %v4452_v51  ;;  %v4461_v59 = vrot.slane %v4460_v28, 4  ;;  %v4475_v50 = vrot.slane %v4474_v3, 4  ;;  %v8583_v15 = vpop.f32.mrb[44].mxu0  ;;  %v8585_v6 = vpop.f32.mrb[44].mxu1 }
 0x453   : > { %v8587_v2 = vunpack.c.l.b16 %v4873_v60  ;;  %v8589_v26 = vunpack.c.l.b16 %v4875_v19  ;;  %v4455_v0 = vadd.f32 %v4454_v31, %v4453_v46  ;;  %v4469_v61 = vadd.f32 %v4468_v36, %v4467_v4  ;;  %v8591_v39 = vpop.f32.mrb[45].mxu0  ;;  %v8593_v49 = vpop.f32.mrb[45].mxu1  ;;  %v6897_v46 = vld [vmem:[%s9477_s10 + $0x98] sm:$0xff]  }
 0x454   : > { %v8595_v53 = vunpack.c.l.b16 %v4874_v20  ;;  %v8597_v12 = vunpack.c.l.b16 %v4876_v27  ;;  %v4462_v8 = vadd.f32 %v4461_v59, %v4460_v28  ;;  %v4476_v29 = vadd.f32 %v4475_v50, %v4474_v3  ;;  %v8599_v38 = vpop.f32.mrb[46].mxu0  ;;  %v8601_v54 = vpop.f32.mrb[46].mxu1  ;;  %5976 = vmatpush3.bf16.msra.mxu1 %v6897_v46 }
 0x455   : > { %v4456_v56 = vrot.slane %v4455_v0, 2  ;;  %v4470_v9 = vrot.slane %v4469_v61, 2  ;;  %v6095_v23 = vadd.f32 %v3443_v25, %v8503_v52  ;;  %v6159_v16 = vadd.f32 %v4022_v21, %v8505_v45  ;;  %v8605_v37 = vpop.f32.mrb[47].mxu0  ;;  %v8607_v17 = vpop.f32.mrb[47].mxu1 }
 0x456   : > { %v4463_v42 = vrot.slane %v4462_v8, 2  ;;  %v4477_v55 = vrot.slane %v4476_v29, 2  ;;  %v6096_v63 = vadd.f32 %v8558_v1, %v8507_v41  ;;  %v6160_v11 = vadd.f32 %v8560_v7, %v8509_v30 }
 0x457   : > { %v4457_v44 = vadd.f32 %v4456_v56, %v4455_v0  ;;  %v4471_v24 = vadd.f32 %v4470_v9, %v4469_v61  ;;  %v4177_v48 = vmax.f32 %v6095_v23, 0.0  ;;  %v4179_v62 = vmax.f32 %v6159_v16, 0.0 }
 0x458   : > { %v4464_v25 = vadd.f32 %v4463_v42, %v4462_v8  ;;  %v4478_v32 = vadd.f32 %v4477_v55, %v4476_v29  ;;  %v4178_v21 = vmax.f32 %v6096_v63, 0.0  ;;  %v4180_v5 = vmax.f32 %v6160_v11, 0.0 }
 0x459   : > { %v4458_v4 = vrot.slane %v4457_v44, 1  ;;  %v4472_v18 = vrot.slane %v4471_v24, 1  ;;  %v4313_v51 = vmul.f32 %v8513_v47, %v4177_v48  ;;  %v4315_v1 = vmul.f32 %v8517_v35, %v4179_v62 }
 0x45a   : > { %v4465_v28 = vrot.slane %v4464_v25, 1  ;;  %v4479_v7 = vrot.slane %v4478_v32, 1  ;;  %v4314_v3 = vmul.f32 %v8524_v40, %v4178_v21  ;;  %v4316_v60 = vmul.f32 %v8532_v33, %v4180_v5  ;;  %v8620_v19 = vpop.f32.mrb[48].mxu0  ;;  %v8622_v31 = vpop.f32.mrb[48].mxu1 }
 0x45b   : > { %v4459_v36 = vadd.f32 %v4458_v4, %v4457_v44  ;;  %v4473_v20 = vadd.f32 %v4472_v18, %v4471_v24  ;;  %v6097_v27 = vadd.f32 %v8562_v10, %v8503_v52  ;;  %v6161_v59 = vadd.f32 %v8564_v43, %v8505_v45  ;;  %v8628_v50 = vpop.f32.mrb[49].mxu0  ;;  %v8630_v0 = vpop.f32.mrb[49].mxu1 }
 0x45c   : > { %v4466_v61 = vadd.f32 %v4465_v28, %v4464_v25  ;;  %v4480_v8 = vadd.f32 %v4479_v7, %v4478_v32  ;;  %v6098_v29 = vadd.f32 %v8568_v13, %v8507_v41  ;;  %v6162_v56 = vadd.f32 %v8570_v57, %v8509_v30  ;;  %v8636_v9 = vpop.f32.mrb[50].mxu0  ;;  %v8638_v23 = vpop.f32.mrb[50].mxu1 }
 0x45d   : > { %v4877_v10 = vpack.c.bf16 %v4459_v36, %v4459_v36  ;;  %v4879_v16 = vpack.c.bf16 %v4473_v20, %v4473_v20  ;;  %v4181_v42 = vmax.f32 %v6097_v27, 0.0  ;;  %v4183_v43 = vmax.f32 %v6161_v59, 0.0  ;;  %v8640_v55 = vpop.f32.mrb[51].mxu0  ;;  %v8642_v63 = vpop.f32.mrb[51].mxu1 }
 0x45e   : > { %v4878_v11 = vpack.c.bf16 %v4466_v61, %v4466_v61  ;;  %v4880_v44 = vpack.c.bf16 %v4480_v8, %v4480_v8  ;;  %v4182_v24 = vmax.f32 %v6098_v29, 0.0  ;;  %v4184_v48 = vmax.f32 %v6162_v56, 0.0 }
 0x45f   : > { %v5076_v13 = vunpack.c.l.b16 %v4877_v10  ;;  %v5078_v62 = vunpack.c.l.b16 %v4879_v16  ;;  %v4317_v57 = vmul.f32 %v8526_v58, %v4181_v42  ;;  %v4319_v25 = vmul.f32 %v8528_v22, %v4183_v43 }
 0x460   : > { %v5077_v32 = vunpack.c.l.b16 %v4878_v11  ;;  %v5079_v21 = vunpack.c.l.b16 %v4880_v44  ;;  %v4318_v5 = vmul.f32 %v8534_v34, %v4182_v24  ;;  %v4320_v46 = vmul.f32 %v8536_v14, %v4184_v48 }
 0x461   : > { %v8650_v4 = vsel %vm5136_vm5, %v5076_v13, %v8587_v2  ;;  %v8654_v18 = vsel %vm5136_vm5, %v5078_v62, %v8589_v26  ;;  %v4481_v28 = vadd.f32 %v4317_v57, %v4313_v51  ;;  %v4495_v7 = vadd.f32 %v4319_v25, %v4315_v1 }
 0x462   : > { %v8658_v36 = vsel %vm5136_vm5, %v5077_v32, %v8595_v53  ;;  %v8662_v20 = vsel %vm5136_vm5, %v5079_v21, %v8597_v12  ;;  %v4488_v27 = vadd.f32 %v4318_v5, %v4314_v3  ;;  %v4502_v59 = vadd.f32 %v4320_v46, %v4316_v60  ;;  %v8664_v61 = vpop.f32.mrb[52].mxu0  ;;  %v8666_v2 = vpop.f32.mrb[52].mxu1 }
 0x463   : > { %9609 = vst [vmem:[#allocation22_spill] sm:$0xff] %v8658_v36  ;;  %9610 = vst [vmem:[#allocation24_spill] sm:$0xff] %v8662_v20  ;;  %v4482_v8 = vrot.slane %v4481_v28, 4  ;;  %v4496_v29 = vrot.slane %v4495_v7, 4  ;;  %v6099_v26 = vadd.f32 %v8583_v15, %v8503_v52  ;;  %v6163_v51 = vadd.f32 %v8585_v6, %v8505_v45  ;;  %v8672_v53 = vpop.f32.mrb[53].mxu0  ;;  %v8674_v1 = vpop.f32.mrb[53].mxu1 }
 0x464   : > { %v4489_v12 = vrot.slane %v4488_v27, 4  ;;  %v4503_v56 = vrot.slane %v4502_v59, 4  ;;  %v6100_v3 = vadd.f32 %v8591_v39, %v8507_v41  ;;  %v6164_v60 = vadd.f32 %v8593_v49, %v8509_v30  ;;  %v8680_v10 = vpop.f32.mrb[54].mxu0  ;;  %v8682_v16 = vpop.f32.mrb[54].mxu1 }
 0x465   : > { %v4483_v15 = vadd.f32 %v4482_v8, %v4481_v28  ;;  %v4497_v42 = vadd.f32 %v4496_v29, %v4495_v7  ;;  %v4185_v43 = vmax.f32 %v6099_v26, 0.0  ;;  %v4187_v6 = vmax.f32 %v6163_v51, 0.0  ;;  %v8684_v11 = vpop.f32.mrb[55].mxu0  ;;  %v8686_v44 = vpop.f32.mrb[55].mxu1 }
 0x466   : > { %v4490_v24 = vadd.f32 %v4489_v12, %v4488_v27  ;;  %v4504_v48 = vadd.f32 %v4503_v56, %v4502_v59  ;;  %v4186_v13 = vmax.f32 %v6100_v3, 0.0  ;;  %v4188_v62 = vmax.f32 %v6164_v60, 0.0 }
 0x467   : > { %v4484_v39 = vrot.slane %v4483_v15, 2  ;;  %v4498_v57 = vrot.slane %v4497_v42, 2  ;;  %v4321_v49 = vmul.f32 %v8513_v47, %v4185_v43  ;;  %v4323_v25 = vmul.f32 %v8517_v35, %v4187_v6 }
 0x468   : > { %v4491_v32 = vrot.slane %v4490_v24, 2  ;;  %v4505_v21 = vrot.slane %v4504_v48, 2  ;;  %v4322_v5 = vmul.f32 %v8524_v40, %v4186_v13  ;;  %v4324_v46 = vmul.f32 %v8532_v33, %v4188_v62 }
 0x469   : > { %v4485_v28 = vadd.f32 %v4484_v39, %v4483_v15  ;;  %v4499_v7 = vadd.f32 %v4498_v57, %v4497_v42  ;;  %v6101_v27 = vadd.f32 %v8599_v38, %v8503_v52  ;;  %v6165_v59 = vadd.f32 %v8601_v54, %v8505_v45 }
 0x46a   : > { %v4492_v8 = vadd.f32 %v4491_v32, %v4490_v24  ;;  %v4506_v29 = vadd.f32 %v4505_v21, %v4504_v48  ;;  %v6102_v26 = vadd.f32 %v8605_v37, %v8507_v41  ;;  %v6166_v51 = vadd.f32 %v8607_v17, %v8509_v30  ;;  %v8700_v12 = vpop.f32.mrb[56].mxu0  ;;  %v8702_v56 = vpop.f32.mrb[56].mxu1 }
 0x46b   : > { %9611 = vst [vmem:[#allocation23_spill] sm:$0xff] %v8702_v56  ;;  %v4486_v3 = vrot.slane %v4485_v28, 1  ;;  %v4500_v60 = vrot.slane %v4499_v7, 1  ;;  %v4189_v15 = vmax.f32 %v6101_v27, 0.0  ;;  %v4191_v42 = vmax.f32 %v6165_v59, 0.0  ;;  %v8704_v38 = vpop.f32.mrb[57].mxu0 }
 0x46c   : > { %9612 = vst [vmem:[#allocation25_spill] sm:$0xff] %v8704_v38  ;;  %v8706_v43 = vpop.f32.mrb[57].mxu1  ;;  %v4493_v54 = vrot.slane %v4492_v8, 1  ;;  %v4507_v6 = vrot.slane %v4506_v29, 1  ;;  %v4190_v24 = vmax.f32 %v6102_v26, 0.0  ;;  %v4192_v48 = vmax.f32 %v6166_v51, 0.0 }
 0x46d   : > { %9613 = vst [vmem:[#allocation26_spill] sm:$0xff] %v8706_v43  ;;  %v8708_v37 = vpop.f32.mrb[58].mxu0  ;;  %v8710_v13 = vpop.f32.mrb[58].mxu1  ;;  %v4487_v17 = vadd.f32 %v4486_v3, %v4485_v28  ;;  %v4501_v62 = vadd.f32 %v4500_v60, %v4499_v7  ;;  %v4325_v39 = vmul.f32 %v8526_v58, %v4189_v15  ;;  %v4327_v57 = vmul.f32 %v8528_v22, %v4191_v42  ;;  %v6898_v27 = vld [vmem:[%s9477_s10 + $0x60] sm:$0xff]  }
 0x46e   : > { %9614 = vst [vmem:[#allocation27_spill] sm:$0xff] %v8708_v37  ;;  %9615 = vst [vmem:[#allocation29_spill] sm:$0xff] %v8710_v13  ;;  %v8714_v32 = vpop.f32.mrb[59].mxu0  ;;  %v8716_v21 = vpop.f32.mrb[59].mxu1  ;;  %v6899_v59 = vld [vmem:[%s9477_s10 + $0x20] sm:$0xff]   ;;  %v4494_v7 = vadd.f32 %v4493_v54, %v4492_v8  ;;  %v4508_v26 = vadd.f32 %v4507_v6, %v4506_v29  ;;  %v4326_v51 = vmul.f32 %v8534_v34, %v4190_v24  ;;  %5955 = vmatprep.subr.bf16.mxu0 %v6898_v27 }
 0x46f   : > { %9616 = vst [vmem:[#allocation28_spill] sm:$0xff] %v8714_v32  ;;  %9617 = vst [vmem:[#allocation30_spill] sm:$0xff] %v8716_v21  ;;  %v6900_v28 = vld [vmem:[%s9477_s10 + $0xe0] sm:$0xff]   ;;  %v4328_v3 = vmul.f32 %v8536_v14, %v4192_v48  ;;  %v4881_v60 = vpack.c.bf16 %v4487_v17, %v4487_v17  ;;  %v4883_v15 = vpack.c.bf16 %v4501_v62, %v4501_v62  ;;  %5956 = vmatpush3.bf16.msra.mxu0 %v6899_v59 }
 0x470   : > { %v4509_v42 = vadd.f32 %v4325_v39, %v4321_v49  ;;  %v4523_v20 = vadd.f32 %v4327_v57, %v4323_v25  ;;  %v4882_v36 = vpack.c.bf16 %v4494_v7, %v4494_v7  ;;  %v4884_v21 = vpack.c.bf16 %v4508_v26, %v4508_v26  ;;  %5977 = vmatprep.subr.bf16.mxu1 %v6900_v28 }
 0x471   : > { %v4516_v32 = vadd.f32 %v4326_v51, %v4322_v5  ;;  %v4530_v13 = vadd.f32 %v4328_v3, %v4324_v46  ;;  %v5080_v37 = vunpack.c.l.b16 %v4881_v60  ;;  %v5082_v43 = vunpack.c.l.b16 %v4883_v15 }
 0x472   : > { %v4510_v38 = vrot.slane %v4509_v42, 4  ;;  %v4524_v56 = vrot.slane %v4523_v20, 4  ;;  %v8729_v8 = vunpack.c.l.b16 %v4882_v36  ;;  %v8731_v29 = vunpack.c.l.b16 %v4884_v21  ;;  %v8733_v24 = vpop.f32.mrb[60].mxu0  ;;  %v8735_v49 = vpop.f32.mrb[60].mxu1 }
 0x473   : > { %v4517_v54 = vrot.slane %v4516_v32, 4  ;;  %v4531_v6 = vrot.slane %v4530_v13, 4  ;;  %v8739_v25 = vsel %vm5138_vm6, %v5080_v37, %v8650_v4  ;;  %v8743_v5 = vsel %vm5138_vm6, %v5082_v43, %v8654_v18  ;;  %v8745_v36 = vpop.f32.mrb[61].mxu0  ;;  %v8747_v17 = vpop.f32.mrb[61].mxu1 }
 0x474   : > { %9618 = vst [vmem:[#allocation31_spill] sm:$0xff] %v8729_v8  ;;  %9619 = vst [vmem:[#allocation32_spill] sm:$0xff] %v8731_v29  ;;  %v4511_v46 = vadd.f32 %v4510_v38, %v4509_v42  ;;  %v4525_v48 = vadd.f32 %v4524_v56, %v4523_v20  ;;  %v6103_v57 = vadd.f32 %v8620_v19, %v8503_v52  ;;  %v8753_v4 = vpop.f32.mrb[62].mxu0  ;;  %v8755_v37 = vpop.f32.mrb[62].mxu1 }
 0x475   : > { %v4518_v62 = vadd.f32 %v4517_v54, %v4516_v32  ;;  %v4532_v39 = vadd.f32 %v4531_v6, %v4530_v13  ;;  %v6167_v21 = vadd.f32 %v8622_v31, %v8505_v45  ;;  %v6104_v20 = vadd.f32 %v8628_v50, %v8507_v41  ;;  %v8761_v38 = vpop.f32.mrb[63].mxu0  ;;  %v8763_v13 = vpop.f32.mrb[63].mxu1 }
 0x476   : > { %v4512_v18 = vrot.slane %v4511_v46, 2  ;;  %v4526_v43 = vrot.slane %v4525_v48, 2  ;;  %v6168_v56 = vadd.f32 %v8630_v0, %v8509_v30  ;;  %v4193_v31 = vmax.f32 %v6103_v57, 0.0  ;;  %v6901_v0 = vld [vmem:[%s9477_s10 + $0xa0] sm:$0xff]  }
 0x477   : > { %v4519_v19 = vrot.slane %v4518_v62, 2  ;;  %v4533_v32 = vrot.slane %v4532_v39, 2  ;;  %v4195_v27 = vmax.f32 %v6167_v21, 0.0  ;;  %v4194_v7 = vmax.f32 %v6104_v20, 0.0  ;;  %5978 = vmatpush3.bf16.msra.mxu1 %v6901_v0 }
 0x478   : > { %v4513_v59 = vadd.f32 %v4512_v18, %v4511_v46  ;;  %v4527_v28 = vadd.f32 %v4526_v43, %v4525_v48  ;;  %v4196_v26 = vmax.f32 %v6168_v56, 0.0  ;;  %v4329_v50 = vmul.f32 %v8513_v47, %v4193_v31 }
 0x479   : > { %v4520_v51 = vadd.f32 %v4519_v19, %v4518_v62  ;;  %v4534_v3 = vadd.f32 %v4533_v32, %v4532_v39  ;;  %v4331_v60 = vmul.f32 %v8517_v35, %v4195_v27  ;;  %v4330_v54 = vmul.f32 %v8524_v40, %v4194_v7 }
 0x47a   : > { %v4514_v15 = vrot.slane %v4513_v59, 1  ;;  %v4528_v42 = vrot.slane %v4527_v28, 1  ;;  %v4332_v6 = vmul.f32 %v8532_v33, %v4196_v26  ;;  %v6105_v62 = vadd.f32 %v8636_v9, %v8503_v52  ;;  %v8776_v57 = vpop.f32.mrb[64].mxu0  ;;  %v8778_v21 = vpop.f32.mrb[64].mxu1 }
 0x47b   : > { %v4521_v46 = vrot.slane %v4520_v51, 1  ;;  %v4535_v48 = vrot.slane %v4534_v3, 1  ;;  %v6169_v39 = vadd.f32 %v8638_v23, %v8505_v45  ;;  %v6106_v20 = vadd.f32 %v8640_v55, %v8507_v41  ;;  %v8784_v19 = vpop.f32.mrb[65].mxu0  ;;  %v8786_v32 = vpop.f32.mrb[65].mxu1 }
 0x47c   : > { %v4515_v18 = vadd.f32 %v4514_v15, %v4513_v59  ;;  %v4529_v43 = vadd.f32 %v4528_v42, %v4527_v28  ;;  %v6170_v56 = vadd.f32 %v8642_v63, %v8509_v30  ;;  %v4197_v23 = vmax.f32 %v6105_v62, 0.0  ;;  %v8788_v7 = vpop.f32.mrb[66].mxu0  ;;  %v8790_v26 = vpop.f32.mrb[66].mxu1 }
 0x47d   : > { %v4522_v9 = vadd.f32 %v4521_v46, %v4520_v51  ;;  %v4536_v31 = vadd.f32 %v4535_v48, %v4534_v3  ;;  %v4199_v27 = vmax.f32 %v6169_v39, 0.0  ;;  %v4198_v0 = vmax.f32 %v6106_v20, 0.0  ;;  %v8792_v55 = vpop.f32.mrb[67].mxu0  ;;  %v8794_v42 = vpop.f32.mrb[67].mxu1 }
 0x47e   : > { %v4885_v59 = vpack.c.bf16 %v4515_v18, %v4515_v18  ;;  %v4887_v28 = vpack.c.bf16 %v4529_v43, %v4529_v43  ;;  %v4200_v15 = vmax.f32 %v6170_v56, 0.0  ;;  %v4333_v8 = vmul.f32 %v8526_v58, %v4197_v23 }
 0x47f   : > { %v4886_v63 = vpack.c.bf16 %v4522_v9, %v4522_v9  ;;  %v4888_v29 = vpack.c.bf16 %v4536_v31, %v4536_v31  ;;  %v4335_v51 = vmul.f32 %v8528_v22, %v4199_v27  ;;  %v4334_v48 = vmul.f32 %v8534_v34, %v4198_v0 }
 0x480   : > { %v5084_v3 = vunpack.c.l.b16 %v4885_v59  ;;  %v5086_v46 = vunpack.c.l.b16 %v4887_v28  ;;  %v4336_v62 = vmul.f32 %v8536_v14, %v4200_v15  ;;  %v4537_v43 = vadd.f32 %v4333_v8, %v4329_v50 }
 0x481   : > { %v8800_v39 = vunpack.c.l.b16 %v4886_v63  ;;  %v8802_v18 = vunpack.c.l.b16 %v4888_v29  ;;  %v4551_v20 = vadd.f32 %v4335_v51, %v4331_v60  ;;  %v4544_v31 = vadd.f32 %v4334_v48, %v4330_v54 }
 0x482   : > { %v8806_v56 = vsel %vm5140_vm7, %v5084_v3, %v8739_v25  ;;  %v8810_v9 = vsel %vm5140_vm7, %v5086_v46, %v8743_v5  ;;  %v4558_v23 = vadd.f32 %v4336_v62, %v4332_v6  ;;  %v4538_v27 = vrot.slane %v4537_v43, 4  ;;  %v8816_v8 = vpop.f32.mrb[68].mxu0  ;;  %v8818_v50 = vpop.f32.mrb[68].mxu1 }
 0x483   : > { %9620 = vst [vmem:[#allocation33_spill] sm:$0xff] %v8800_v39  ;;  %9621 = vst [vmem:[#allocation34_spill] sm:$0xff] %v8802_v18  ;;  %v4552_v59 = vrot.slane %v4551_v20, 4  ;;  %v6107_v28 = vadd.f32 %v8664_v61, %v8503_v52  ;;  %v6171_v29 = vadd.f32 %v8666_v2, %v8505_v45  ;;  %v4545_v25 = vrot.slane %v4544_v31, 4  ;;  %v8824_v6 = vpop.f32.mrb[69].mxu0  ;;  %v8826_v0 = vpop.f32.mrb[69].mxu1 }
 0x484   : > { %v4559_v60 = vrot.slane %v4558_v23, 4  ;;  %v6108_v5 = vadd.f32 %v8672_v53, %v8507_v41  ;;  %v6172_v54 = vadd.f32 %v8674_v1, %v8509_v30  ;;  %9622 = vst [vmem:[#allocation35_spill] sm:$0xff] %v8824_v6  ;;  %9623 = vst [vmem:[#allocation36_spill] sm:$0xff] %v8826_v0  ;;  %v4539_v61 = vadd.f32 %v4538_v27, %v4537_v43  ;;  %v8828_v51 = vpop.f32.mrb[70].mxu0  ;;  %v8830_v3 = vpop.f32.mrb[70].mxu1 }
 0x485   : > { %v4553_v15 = vadd.f32 %v4552_v59, %v4551_v20  ;;  %v4201_v63 = vmax.f32 %v6107_v28, 0.0  ;;  %v4203_v2 = vmax.f32 %v6171_v29, 0.0  ;;  %9624 = vst [vmem:[#allocation37_spill] sm:$0xff] %v8828_v51  ;;  %9625 = vst [vmem:[#allocation38_spill] sm:$0xff] %v8830_v3  ;;  %v4546_v46 = vadd.f32 %v4545_v25, %v4544_v31  ;;  %v8832_v53 = vpop.f32.mrb[71].mxu0  ;;  %v8834_v39 = vpop.f32.mrb[71].mxu1 }
 0x486   : > { %v4560_v48 = vadd.f32 %v4559_v60, %v4558_v23  ;;  %v4202_v62 = vmax.f32 %v6108_v5, 0.0  ;;  %v4204_v18 = vmax.f32 %v6172_v54, 0.0  ;;  %9626 = vst [vmem:[#allocation39_spill] sm:$0xff] %v8832_v53  ;;  %9627 = vst [vmem:[#allocation40_spill] sm:$0xff] %v8834_v39  ;;  %v4540_v1 = vrot.slane %v4539_v61, 2 }
 0x487   : > { %v4554_v6 = vrot.slane %v4553_v15, 2  ;;  %v4337_v0 = vmul.f32 %v8513_v47, %v4201_v63  ;;  %v4339_v43 = vmul.f32 %v8517_v35, %v4203_v2  ;;  %v4547_v20 = vrot.slane %v4546_v46, 2 }
 0x488   : > { %v4561_v27 = vrot.slane %v4560_v48, 2  ;;  %v4338_v59 = vmul.f32 %v8524_v40, %v4202_v62  ;;  %v4340_v31 = vmul.f32 %v8532_v33, %v4204_v18  ;;  %v4541_v23 = vadd.f32 %v4540_v1, %v4539_v61 }
 0x489   : > { %v4555_v28 = vadd.f32 %v4554_v6, %v4553_v15  ;;  %v6109_v29 = vadd.f32 %v8680_v10, %v8503_v52  ;;  %v6173_v25 = vadd.f32 %v8682_v16, %v8505_v45  ;;  %v4548_v60 = vadd.f32 %v4547_v20, %v4546_v46 }
 0x48a   : > { %v4562_v5 = vadd.f32 %v4561_v27, %v4560_v48  ;;  %v6110_v54 = vadd.f32 %v8684_v11, %v8507_v41  ;;  %v6174_v63 = vadd.f32 %v8686_v44, %v8509_v30  ;;  %v4542_v2 = vrot.slane %v4541_v23, 1  ;;  %v8848_v61 = vpop.f32.mrb[72].mxu0  ;;  %v8850_v6 = vpop.f32.mrb[72].mxu1 }
 0x48b   : > { %v4556_v62 = vrot.slane %v4555_v28, 1  ;;  %v4205_v39 = vmax.f32 %v6109_v29, 0.0  ;;  %v4207_v18 = vmax.f32 %v6173_v25, 0.0  ;;  %9628 = vst [vmem:[#allocation41_spill] sm:$0xff] %v8848_v61  ;;  %9629 = vst [vmem:[#allocation42_spill] sm:$0xff] %v8850_v6  ;;  %v4549_v10 = vrot.slane %v4548_v60, 1 }
 0x48c   : > { %v4563_v15 = vrot.slane %v4562_v5, 1  ;;  %v4206_v1 = vmax.f32 %v6110_v54, 0.0  ;;  %v4208_v16 = vmax.f32 %v6174_v63, 0.0  ;;  %v8852_v46 = vpop.f32.mrb[73].mxu0  ;;  %v8854_v48 = vpop.f32.mrb[73].mxu1  ;;  %v4543_v11 = vadd.f32 %v4542_v2, %v4541_v23  ;;  %v6902_v6 = vld [vmem:[%s9477_s10 + $0x68] sm:$0xff]  }
 0x48d   : > { %9630 = vst [vmem:[#allocation43_spill] sm:$0xff] %v8852_v46  ;;  %9631 = vst [vmem:[#allocation44_spill] sm:$0xff] %v8854_v48  ;;  %v4557_v20 = vadd.f32 %v4556_v62, %v4555_v28  ;;  %v4341_v44 = vmul.f32 %v8526_v58, %v4205_v39  ;;  %v4343_v27 = vmul.f32 %v8528_v22, %v4207_v18  ;;  %v8858_v29 = vpop.f32.mrb[74].mxu0  ;;  %v8860_v25 = vpop.f32.mrb[74].mxu1  ;;  %v6903_v54 = vld [vmem:[%s9477_s10 + $0x28] sm:$0xff]   ;;  %5957 = vmatprep.subr.bf16.mxu0 %v6902_v6 }
 0x48e   : > { %9632 = vst [vmem:[#allocation45_spill] sm:$0xff] %v8858_v29  ;;  %9633 = vst [vmem:[#allocation46_spill] sm:$0xff] %v8860_v25  ;;  %v6904_v23 = vld [vmem:[%s9477_s10 + $0xe8] sm:$0xff]   ;;  %v4550_v28 = vadd.f32 %v4549_v10, %v4548_v60  ;;  %v4564_v39 = vadd.f32 %v4563_v15, %v4562_v5  ;;  %v4342_v63 = vmul.f32 %v8534_v34, %v4206_v1  ;;  %v8873_v62 = vpop.f32.mrb[75].mxu0  ;;  %v8875_v18 = vpop.f32.mrb[75].mxu1  ;;  %5958 = vmatpush3.bf16.msra.mxu0 %v6903_v54 }
 0x48f   : > { %v4344_v2 = vmul.f32 %v8536_v14, %v4208_v16  ;;  %9634 = vst [vmem:[#allocation47_spill] sm:$0xff] %v8875_v18  ;;  %v4889_v25 = vpack.c.bf16 %v4543_v11, %v4543_v11  ;;  %v4891_v29 = vpack.c.bf16 %v4557_v20, %v4557_v20  ;;  %v4565_v48 = vadd.f32 %v4341_v44, %v4337_v0 }
 0x490   : > { %v4579_v46 = vadd.f32 %v4343_v27, %v4339_v43  ;;  %v4890_v61 = vpack.c.bf16 %v4550_v28, %v4550_v28  ;;  %v4892_v53 = vpack.c.bf16 %v4564_v39, %v4564_v39  ;;  %v4572_v3 = vadd.f32 %v4342_v63, %v4338_v59  ;;  %5979 = vmatprep.subr.bf16.mxu1 %v6904_v23  ;;  %v9637_v27 = vld [vmem:[#allocation23_spill] sm:$0xff]  ;;  %v9639_v23 = vld [vmem:[#allocation26_spill] sm:$0xff] }
 0x491   : > { %v4586_v51 = vadd.f32 %v4344_v2, %v4340_v31  ;;  %v5088_v60 = vunpack.c.l.b16 %v4889_v25  ;;  %v5090_v5 = vunpack.c.l.b16 %v4891_v29  ;;  %v4566_v10 = vrot.slane %v4565_v48, 4 }
 0x492   : > { %v4580_v15 = vrot.slane %v4579_v46, 4  ;;  %v8877_v1 = vunpack.c.l.b16 %v4890_v61  ;;  %v8879_v16 = vunpack.c.l.b16 %v4892_v53  ;;  %v4573_v18 = vrot.slane %v4572_v3, 4  ;;  %v8889_v6 = vpop.f32.mrb[76].mxu0  ;;  %v8891_v20 = vpop.f32.mrb[76].mxu1 }
 0x493   : > { %v4587_v11 = vrot.slane %v4586_v51, 4  ;;  %v8883_v0 = vsel %vm5142_vm8, %v5088_v60, %v8806_v56  ;;  %v8887_v43 = vsel %vm5142_vm8, %v5090_v5, %v8810_v9  ;;  %v4567_v59 = vadd.f32 %v4566_v10, %v4565_v48  ;;  %v8897_v56 = vpop.f32.mrb[77].mxu0  ;;  %v8899_v25 = vpop.f32.mrb[77].mxu1 }
 0x494   : > { %9635 = vst [vmem:[#allocation48_spill] sm:$0xff] %v8877_v1  ;;  %9636 = vst [vmem:[#allocation49_spill] sm:$0xff] %v8879_v16  ;;  %v4581_v31 = vadd.f32 %v4580_v15, %v4579_v46  ;;  %v4574_v61 = vadd.f32 %v4573_v18, %v4572_v3  ;;  %v6111_v53 = vadd.f32 %v8700_v12, %v8503_v52  ;;  %v9638_v46 = vld [vmem:[#allocation25_spill] sm:$0xff]  ;;  %v8905_v3 = vpop.f32.mrb[78].mxu0 }
 0x495   : > { %v4588_v44 = vadd.f32 %v4587_v11, %v4586_v51  ;;  %v6175_v29 = vadd.f32 %v9637_v27, %v8505_v45  ;;  %v4568_v9 = vrot.slane %v4567_v59, 2  ;;  %v6112_v48 = vadd.f32 %v9638_v46, %v8507_v41  ;;  %9640 = vst [vmem:[#allocation23_spill] sm:$0xff] %v8905_v3  ;;  %v8907_v51 = vpop.f32.mrb[78].mxu1  ;;  %v8909_v18 = vpop.f32.mrb[79].mxu0 }
 0x496   : > { %v4582_v54 = vrot.slane %v4581_v31, 2  ;;  %v6176_v28 = vadd.f32 %v9639_v23, %v8509_v30  ;;  %9641 = vst [vmem:[#allocation25_spill] sm:$0xff] %v8907_v51  ;;  %v4575_v12 = vrot.slane %v4574_v61, 2  ;;  %v4209_v63 = vmax.f32 %v6111_v53, 0.0  ;;  %v8911_v60 = vpop.f32.mrb[79].mxu1 }
 0x497   : > { %v4589_v39 = vrot.slane %v4588_v44, 2  ;;  %v4211_v2 = vmax.f32 %v6175_v29, 0.0  ;;  %9642 = vst [vmem:[#allocation26_spill] sm:$0xff] %v8911_v60  ;;  %v4569_v5 = vadd.f32 %v4568_v9, %v4567_v59  ;;  %v4210_v15 = vmax.f32 %v6112_v48, 0.0  ;;  %v6905_v29 = vld [vmem:[%s9477_s10 + $0xa8] sm:$0xff]   ;;  %v9645_v48 = vld [vmem:[#allocation28_spill] sm:$0xff] }
 0x498   : > { %v4583_v10 = vadd.f32 %v4582_v54, %v4581_v31  ;;  %v4212_v11 = vmax.f32 %v6176_v28, 0.0  ;;  %v4576_v27 = vadd.f32 %v4575_v12, %v4574_v61  ;;  %v4345_v23 = vmul.f32 %v8513_v47, %v4209_v63  ;;  %v9643_v9 = vld [vmem:[#allocation27_spill] sm:$0xff]  ;;  %5980 = vmatpush3.bf16.msra.mxu1 %v6905_v29 }
 0x499   : > { %v4590_v46 = vadd.f32 %v4589_v39, %v4588_v44  ;;  %v4347_v16 = vmul.f32 %v8517_v35, %v4211_v2  ;;  %v4570_v1 = vrot.slane %v4569_v5, 1  ;;  %v4346_v3 = vmul.f32 %v8524_v40, %v4210_v15  ;;  %v9644_v44 = vld [vmem:[#allocation29_spill] sm:$0xff]  ;;  %v9646_v40 = vld [vmem:[#allocation30_spill] sm:$0xff] }
 0x49a   : > { %v4584_v51 = vrot.slane %v4583_v10, 1  ;;  %v4348_v53 = vmul.f32 %v8532_v33, %v4212_v11  ;;  %v4577_v59 = vrot.slane %v4576_v27, 1  ;;  %v6113_v61 = vadd.f32 %v9643_v9, %v8503_v52  ;;  %v8928_v12 = vpop.f32.mrb[80].mxu0  ;;  %v8930_v39 = vpop.f32.mrb[80].mxu1 }
 0x49b   : > { %v4591_v31 = vrot.slane %v4590_v46, 1  ;;  %v6177_v47 = vadd.f32 %v9644_v44, %v8505_v45  ;;  %v4571_v54 = vadd.f32 %v4570_v1, %v4569_v5  ;;  %v6114_v28 = vadd.f32 %v9645_v48, %v8507_v41  ;;  %9647 = vst [vmem:[#allocation27_spill] sm:$0xff] %v8928_v12  ;;  %v8932_v9 = vpop.f32.mrb[81].mxu0  ;;  %v8934_v44 = vpop.f32.mrb[81].mxu1 }
 0x49c   : > { %v4585_v35 = vadd.f32 %v4584_v51, %v4583_v10  ;;  %v6178_v33 = vadd.f32 %v9646_v40, %v8509_v30  ;;  %v4578_v63 = vadd.f32 %v4577_v59, %v4576_v27  ;;  %v4213_v15 = vmax.f32 %v6113_v61, 0.0  ;;  %v8936_v48 = vpop.f32.mrb[82].mxu0  ;;  %v8938_v40 = vpop.f32.mrb[82].mxu1 }
 0x49d   : > { %v4592_v2 = vadd.f32 %v4591_v31, %v4590_v46  ;;  %v4215_v11 = vmax.f32 %v6177_v47, 0.0  ;;  %v4893_v1 = vpack.c.bf16 %v4571_v54, %v4571_v54  ;;  %v4214_v5 = vmax.f32 %v6114_v28, 0.0  ;;  %v8942_v46 = vpop.f32.mrb[83].mxu0  ;;  %v8944_v59 = vpop.f32.mrb[83].mxu1 }
 0x49e   : > { %v4895_v51 = vpack.c.bf16 %v4585_v35, %v4585_v35  ;;  %v4216_v10 = vmax.f32 %v6178_v33, 0.0  ;;  %v4894_v12 = vpack.c.bf16 %v4578_v63, %v4578_v63  ;;  %v4349_v29 = vmul.f32 %v8526_v58, %v4213_v15 }
 0x49f   : > { %v4896_v60 = vpack.c.bf16 %v4592_v2, %v4592_v2  ;;  %v4351_v27 = vmul.f32 %v8528_v22, %v4215_v11  ;;  %v5092_v31 = vunpack.c.l.b16 %v4893_v1  ;;  %v4350_v47 = vmul.f32 %v8534_v34, %v4214_v5 }
 0x4a0   : > { %v5094_v61 = vunpack.c.l.b16 %v4895_v51  ;;  %v4352_v54 = vmul.f32 %v8536_v14, %v4216_v10  ;;  %v8948_v35 = vunpack.c.l.b16 %v4894_v12  ;;  %v4593_v33 = vadd.f32 %v4349_v29, %v4345_v23 }
 0x4a1   : > { %v8950_v28 = vunpack.c.l.b16 %v4896_v60  ;;  %v4607_v63 = vadd.f32 %v4351_v27, %v4347_v16  ;;  %v8954_v58 = vsel %vm5144_vm9, %v5092_v31, %v8883_v0  ;;  %v4600_v2 = vadd.f32 %v4350_v47, %v4346_v3 }
 0x4a2   : > { %9648 = vst [vmem:[#allocation29_spill] sm:$0xff] %v8948_v35  ;;  %9650 = vst [vmem:[#allocation30_spill] sm:$0xff] %v8954_v58  ;;  %v8958_v22 = vsel %vm5144_vm9, %v5094_v61, %v8887_v43  ;;  %v4614_v15 = vadd.f32 %v4352_v54, %v4348_v53  ;;  %v4594_v11 = vrot.slane %v4593_v33, 4  ;;  %v6115_v14 = vadd.f32 %v8733_v24, %v8503_v52  ;;  %v8968_v43 = vpop.f32.mrb[84].mxu0  ;;  %v8970_v3 = vpop.f32.mrb[84].mxu1  ;;  %v8980_v54 = vld [vmem:[#allocation8] sm:$0xff] }
 0x4a3   : > { %9649 = vst [vmem:[#allocation28_spill] sm:$0xff] %v8950_v28  ;;  %9651 = vst [vmem:[#allocation50_spill] sm:$0xff] %v8958_v22  ;;  %v4608_v34 = vrot.slane %v4607_v63, 4  ;;  %v6179_v60 = vadd.f32 %v8735_v49, %v8505_v45  ;;  %v4601_v23 = vrot.slane %v4600_v2, 4  ;;  %v6116_v0 = vadd.f32 %v8745_v36, %v8507_v41  ;;  %v8972_v24 = vpop.f32.mrb[85].mxu0  ;;  %v8974_v10 = vpop.f32.mrb[85].mxu1 }
 0x4a4   : > { %v4615_v16 = vrot.slane %v4614_v15, 4  ;;  %v6180_v12 = vadd.f32 %v8747_v17, %v8509_v30  ;;  %v4595_v53 = vadd.f32 %v4594_v11, %v4593_v33  ;;  %v4217_v51 = vmax.f32 %v6115_v14, 0.0  ;;  %9652 = vst [vmem:[#allocation51_spill] sm:$0xff] %v8974_v10  ;;  %v8976_v36 = vpop.f32.mrb[86].mxu0  ;;  %v8978_v61 = vpop.f32.mrb[86].mxu1  ;;  %v9020_v10 = vld [vmem:[#allocation8 + $0x30] sm:$0xff] }
 0x4a5   : > { %v4609_v1 = vadd.f32 %v4608_v34, %v4607_v63  ;;  %v4219_v5 = vmax.f32 %v6179_v60, 0.0  ;;  %v4602_v49 = vadd.f32 %v4601_v23, %v4600_v2  ;;  %v4218_v27 = vmax.f32 %v6116_v0, 0.0  ;;  %9653 = vst [vmem:[#allocation52_spill] sm:$0xff] %v8976_v36  ;;  %9654 = vst [vmem:[#allocation53_spill] sm:$0xff] %v8978_v61  ;;  %v8983_v63 = vld [vmem:[#allocation8 + $0x10] sm:$0xff]  ;;  %v8986_v34 = vpop.f32.mrb[87].mxu0 }
 0x4a6   : > { %v4616_v29 = vadd.f32 %v4615_v16, %v4614_v15  ;;  %v4220_v31 = vmax.f32 %v6180_v12, 0.0  ;;  %v4596_v17 = vrot.slane %v4595_v53, 2  ;;  %v4353_v33 = vmul.f32 %v8980_v54, %v4217_v51  ;;  %9655 = vst [vmem:[#allocation54_spill] sm:$0xff] %v8986_v34  ;;  %v8988_v2 = vpop.f32.mrb[87].mxu1  ;;  %v8990_v60 = vld [vmem:[#allocation8 + $0x8] sm:$0xff]  ;;  %v8993_v16 = vld [vmem:[#allocation8 + $0x18] sm:$0xff] }
 0x4a7   : > { %v4610_v47 = vrot.slane %v4609_v1, 2  ;;  %v4355_v11 = vmul.f32 %v8983_v63, %v4219_v5  ;;  %9656 = vst [vmem:[#allocation55_spill] sm:$0xff] %v8988_v2  ;;  %v4603_v15 = vrot.slane %v4602_v49, 2  ;;  %v4354_v23 = vmul.f32 %v8990_v60, %v4218_v27  ;;  %v9017_v61 = vld [vmem:[#allocation8 + $0x20] sm:$0xff] }
 0x4a8   : > { %v4617_v14 = vrot.slane %v4616_v29, 2  ;;  %v4356_v0 = vmul.f32 %v8993_v16, %v4220_v31  ;;  %v4597_v12 = vadd.f32 %v4596_v17, %v4595_v53  ;;  %v6117_v22 = vadd.f32 %v8753_v4, %v8503_v52  ;;  %v6906_v31 = vld [vmem:[%s9477_s10 + $0x70] sm:$0xff]  }
 0x4a9   : > { %v4611_v51 = vadd.f32 %v4610_v47, %v4609_v1  ;;  %v6181_v5 = vadd.f32 %v8755_v37, %v8505_v45  ;;  %v4604_v58 = vadd.f32 %v4603_v15, %v4602_v49  ;;  %v6118_v35 = vadd.f32 %v8761_v38, %v8507_v41  ;;  %v6907_v53 = vld [vmem:[%s9477_s10 + $0x30] sm:$0xff]   ;;  %5959 = vmatprep.subr.bf16.mxu0 %v6906_v31  ;;  %v9031_v31 = vld [vmem:[#allocation8 + $0x28] sm:$0xff] }
 0x4aa   : > { %v4618_v28 = vadd.f32 %v4617_v14, %v4616_v29  ;;  %v6182_v27 = vadd.f32 %v8763_v13, %v8509_v30  ;;  %v6908_v4 = vld [vmem:[%s9477_s10 + $0xf0] sm:$0xff]   ;;  %v4598_v37 = vrot.slane %v4597_v12, 1  ;;  %v4221_v49 = vmax.f32 %v6117_v22, 0.0  ;;  %v9013_v15 = vpop.f32.mrb[88].mxu0  ;;  %v9015_v14 = vpop.f32.mrb[88].mxu1  ;;  %5960 = vmatpush3.bf16.msra.mxu0 %v6907_v53 }
 0x4ab   : > { %v4612_v1 = vrot.slane %v4611_v51, 1  ;;  %v4223_v29 = vmax.f32 %v6181_v5, 0.0  ;;  %v4605_v38 = vrot.slane %v4604_v58, 1  ;;  %v4222_v47 = vmax.f32 %v6118_v35, 0.0  ;;  %9657 = vst [vmem:[#allocation56_spill] sm:$0xff] %v9015_v14  ;;  %5981 = vmatprep.subr.bf16.mxu1 %v6908_v4  ;;  %v9023_v5 = vpop.f32.mrb[89].mxu0 }
 0x4ac   : > { %v4619_v17 = vrot.slane %v4618_v28, 1  ;;  %v4224_v13 = vmax.f32 %v6182_v27, 0.0  ;;  %v4599_v2 = vadd.f32 %v4598_v37, %v4597_v12  ;;  %v4357_v36 = vmul.f32 %v9017_v61, %v4221_v49  ;;  %9658 = vst [vmem:[#allocation57_spill] sm:$0xff] %v9023_v5  ;;  %v9025_v35 = vpop.f32.mrb[89].mxu1  ;;  %v9037_v37 = vpop.f32.mrb[90].mxu0 }
 0x4ad   : > { %v4613_v34 = vadd.f32 %v4612_v1, %v4611_v51  ;;  %v4359_v22 = vmul.f32 %v9020_v10, %v4223_v29  ;;  %9659 = vst [vmem:[#allocation58_spill] sm:$0xff] %v9025_v35  ;;  %v9027_v27 = vadd.f32 %v4605_v38, %v4604_v58  ;;  %v4358_v12 = vmul.f32 %v9031_v31, %v4222_v47  ;;  %v9034_v51 = vld [vmem:[#allocation8 + $0x38] sm:$0xff]  ;;  %v9039_v1 = vpop.f32.mrb[90].mxu1  ;;  %v9041_v58 = vpop.f32.mrb[91].mxu0 }
 0x4ae   : > { %v9029_v14 = vadd.f32 %v4619_v17, %v4618_v28  ;;  %v4360_v4 = vmul.f32 %v9034_v51, %v4224_v13  ;;  %9662 = vst [vmem:[#allocation61_spill] sm:$0xff] %v9037_v37  ;;  %v4897_v49 = vpack.c.bf16 %v4599_v2, %v4599_v2  ;;  %v4621_v35 = vadd.f32 %v4357_v36, %v4353_v33  ;;  %v9043_v28 = vpop.f32.mrb[91].mxu1 }
 0x4af   : > { %9660 = vst [vmem:[#allocation59_spill] sm:$0xff] %v9027_v27  ;;  %v4899_v29 = vpack.c.bf16 %v4613_v34, %v4613_v34  ;;  %v4635_v53 = vadd.f32 %v4359_v22, %v4355_v11  ;;  %v4628_v47 = vadd.f32 %v4358_v12, %v4354_v23  ;;  %v6119_v11 = vadd.f32 %v8776_v57, %v8503_v52 }
 0x4b0   : > { %9661 = vst [vmem:[#allocation60_spill] sm:$0xff] %v9029_v14  ;;  %v4642_v13 = vadd.f32 %v4360_v4, %v4356_v0  ;;  %v9049_v5 = vunpack.c.l.b16 %v4897_v49  ;;  %v4622_v2 = vrot.slane %v4621_v35, 4  ;;  %v6183_v22 = vadd.f32 %v8778_v21, %v8505_v45 }
 0x4b1   : > { %v9051_v37 = vunpack.c.l.b16 %v4899_v29  ;;  %v4636_v34 = vrot.slane %v4635_v53, 4  ;;  %v4629_v36 = vrot.slane %v4628_v47, 4  ;;  %v6120_v23 = vadd.f32 %v8784_v19, %v8507_v41 }
 0x4b2   : > { %9663 = vst [vmem:[#allocation62_spill] sm:$0xff] %v9049_v5  ;;  %v4643_v33 = vrot.slane %v4642_v13, 4  ;;  %v4623_v38 = vadd.f32 %v4622_v2, %v4621_v35  ;;  %v6184_v0 = vadd.f32 %v8786_v32, %v8509_v30  ;;  %v4225_v49 = vmax.f32 %v6119_v11, 0.0  ;;  %v9061_v17 = vpop.f32.mrb[92].mxu0 }
 0x4b3   : > { %9664 = vst [vmem:[#allocation63_spill] sm:$0xff] %v9051_v37  ;;  %v4637_v27 = vadd.f32 %v4636_v34, %v4635_v53  ;;  %v4630_v12 = vadd.f32 %v4629_v36, %v4628_v47  ;;  %v4227_v29 = vmax.f32 %v6183_v22, 0.0  ;;  %9665 = vst [vmem:[#allocation64_spill] sm:$0xff] %v9061_v17  ;;  %v9063_v37 = vpop.f32.mrb[92].mxu1  ;;  %v4226_v14 = vmax.f32 %v6120_v23, 0.0  ;;  %v9065_v35 = vpop.f32.mrb[93].mxu0 }
 0x4b4   : > { %v4644_v4 = vadd.f32 %v4643_v33, %v4642_v13  ;;  %9666 = vst [vmem:[#allocation65_spill] sm:$0xff] %v9063_v37  ;;  %v4624_v57 = vrot.slane %v4623_v38, 2  ;;  %v4228_v21 = vmax.f32 %v6184_v0, 0.0  ;;  %9667 = vst [vmem:[#allocation66_spill] sm:$0xff] %v9065_v35  ;;  %v9067_v53 = vpop.f32.mrb[93].mxu1  ;;  %v4361_v32 = vmul.f32 %v8980_v54, %v4225_v49  ;;  %v9071_v13 = vpop.f32.mrb[94].mxu0 }
 0x4b5   : > { %v4638_v5 = vrot.slane %v4637_v27, 2  ;;  %9668 = vst [vmem:[#allocation67_spill] sm:$0xff] %v9067_v53  ;;  %v4631_v19 = vrot.slane %v4630_v12, 2  ;;  %v4363_v47 = vmul.f32 %v8983_v63, %v4227_v29  ;;  %9669 = vst [vmem:[#allocation68_spill] sm:$0xff] %v9071_v13  ;;  %v9073_v34 = vpop.f32.mrb[94].mxu1  ;;  %v6909_v36 = vld [vmem:[%s9477_s10 + $0xb0] sm:$0xff]   ;;  %v4362_v22 = vmul.f32 %v8990_v60, %v4226_v14 }
 0x4b6   : > { %v4645_v2 = vrot.slane %v4644_v4, 2  ;;  %9670 = vst [vmem:[#allocation69_spill] sm:$0xff] %v9073_v34  ;;  %v4625_v33 = vadd.f32 %v4624_v57, %v4623_v38  ;;  %v4364_v23 = vmul.f32 %v8993_v16, %v4228_v21  ;;  %v9080_v0 = vpop.f32.mrb[95].mxu0  ;;  %v9082_v53 = vpop.f32.mrb[95].mxu1  ;;  %v6121_v34 = vadd.f32 %v8788_v7, %v8503_v52  ;;  %5982 = vmatpush3.bf16.msra.mxu1 %v6909_v36  ;;  %v6910_v14 = vld [vmem:[%s9477_s10 + $0x78] sm:$0xff]  }
 0x4b7   : > { %v4639_v11 = vadd.f32 %v4638_v5, %v4637_v27  ;;  %9671 = vst [vmem:[#allocation70_spill] sm:$0xff] %v9080_v0  ;;  %9672 = vst [vmem:[#allocation71_spill] sm:$0xff] %v9082_v53  ;;  %v9084_v49 = vadd.f32 %v4631_v19, %v4630_v12  ;;  %v6185_v13 = vadd.f32 %v8790_v26, %v8505_v45  ;;  %v6911_v5 = vld [vmem:[%s9477_s10 + $0x38] sm:$0xff]   ;;  %5961 = vmatprep.subr.bf16.mxu0 %v6910_v14 }
 0x4b8   : > { %v9086_v29 = vadd.f32 %v4645_v2, %v4644_v4  ;;  %v6912_v27 = vld [vmem:[%s9477_s10 + $0xf8] sm:$0xff]   ;;  %v4626_v38 = vrot.slane %v4625_v33, 1  ;;  %v6122_v7 = vadd.f32 %v8792_v55, %v8507_v41  ;;  %v6186_v26 = vadd.f32 %v8794_v42, %v8509_v30  ;;  %5962 = vmatpush3.bf16.msra.mxu0 %v6911_v5 }
 0x4b9   : > { %9673 = vst [vmem:[#allocation72_spill] sm:$0xff] %v9084_v49  ;;  %v4640_v12 = vrot.slane %v4639_v11, 1  ;;  %v6913_v4 = vld [vmem:[%s9477_s10 + $0xb8] sm:$0xff]   ;;  %v4229_v19 = vmax.f32 %v6121_v34, 0.0  ;;  %v4231_v2 = vmax.f32 %v6185_v13, 0.0  ;;  %5983 = vmatprep.subr.bf16.mxu1 %v6912_v27  ;;  %v6123_v37 = vadd.f32 %v8816_v8, %v8503_v52 }
 0x4ba   : > { %9674 = vst [vmem:[#allocation73_spill] sm:$0xff] %v9086_v29  ;;  %v4627_v36 = vadd.f32 %v4626_v38, %v4625_v33  ;;  %v4230_v0 = vmax.f32 %v6122_v7, 0.0  ;;  %v4232_v35 = vmax.f32 %v6186_v26, 0.0  ;;  %v6187_v57 = vadd.f32 %v8818_v50, %v8505_v45  ;;  %5984 = vmatpush3.bf16.msra.mxu1 %v6913_v4 }
 0x4bb   : > { %v4641_v53 = vadd.f32 %v4640_v12, %v4639_v11  ;;  %v4365_v55 = vmul.f32 %v9017_v61, %v4229_v19  ;;  %v4367_v42 = vmul.f32 %v9020_v10, %v4231_v2  ;;  %v4233_v5 = vmax.f32 %v6123_v37, 0.0  ;;  %v9678_v37 = vld [vmem:[#allocation36_spill] sm:$0xff] }
 0x4bc   : > { %v4901_v34 = vpack.c.bf16 %v4627_v36, %v4627_v36  ;;  %v4366_v14 = vmul.f32 %v9031_v31, %v4230_v0  ;;  %v4368_v33 = vmul.f32 %v9034_v51, %v4232_v35  ;;  %v4235_v38 = vmax.f32 %v6187_v57, 0.0  ;;  %v9677_v35 = vld [vmem:[#allocation35_spill] sm:$0xff] }
 0x4bd   : > { %v4903_v13 = vpack.c.bf16 %v4641_v53, %v4641_v53  ;;  %v4649_v11 = vadd.f32 %v4365_v55, %v4361_v32  ;;  %v4663_v27 = vadd.f32 %v4367_v42, %v4363_v47  ;;  %v4369_v50 = vmul.f32 %v8980_v54, %v4233_v5  ;;  %v9679_v55 = vld [vmem:[#allocation37_spill] sm:$0xff] }
 0x4be   : > { %v9118_v12 = vunpack.c.l.b16 %v4901_v34  ;;  %v4656_v26 = vadd.f32 %v4366_v14, %v4362_v22  ;;  %v4670_v8 = vadd.f32 %v4368_v33, %v4364_v23  ;;  %v4371_v53 = vmul.f32 %v8983_v63, %v4235_v38  ;;  %v9680_v23 = vld [vmem:[#allocation38_spill] sm:$0xff] }
 0x4bf   : > { %v9120_v7 = vunpack.c.l.b16 %v4903_v13  ;;  %v4650_v19 = vrot.slane %v4649_v11, 4  ;;  %v4664_v2 = vrot.slane %v4663_v27, 4  ;;  %v6124_v32 = vadd.f32 %v9677_v35, %v8507_v41 }
 0x4c0   : > { %9675 = vst [vmem:[#allocation74_spill] sm:$0xff] %v9118_v12  ;;  %v4657_v4 = vrot.slane %v4656_v26, 4  ;;  %v4671_v0 = vrot.slane %v4670_v8, 4  ;;  %v6188_v47 = vadd.f32 %v9678_v37, %v8509_v30  ;;  %v6125_v22 = vadd.f32 %v9679_v55, %v8503_v52 }
 0x4c1   : > { %9676 = vst [vmem:[#allocation75_spill] sm:$0xff] %v9120_v7  ;;  %v4651_v57 = vadd.f32 %v4650_v19, %v4649_v11  ;;  %v4665_v36 = vadd.f32 %v4664_v2, %v4663_v27  ;;  %v6189_v42 = vadd.f32 %v9680_v23, %v8505_v45  ;;  %v4234_v14 = vmax.f32 %v6124_v32, 0.0  ;;  %v9682_v32 = vld [vmem:[#allocation40_spill] sm:$0xff] }
 0x4c2   : > { %v4658_v34 = vadd.f32 %v4657_v4, %v4656_v26  ;;  %v4672_v13 = vadd.f32 %v4671_v0, %v4670_v8  ;;  %v4236_v33 = vmax.f32 %v6188_v47, 0.0  ;;  %v4237_v21 = vmax.f32 %v6125_v22, 0.0  ;;  %v9681_v4 = vld [vmem:[#allocation39_spill] sm:$0xff] }
 0x4c3   : > { %v4652_v5 = vrot.slane %v4651_v57, 2  ;;  %v4666_v38 = vrot.slane %v4665_v36, 2  ;;  %v4239_v7 = vmax.f32 %v6189_v42, 0.0  ;;  %v4370_v37 = vmul.f32 %v8990_v60, %v4234_v14 }
 0x4c4   : > { %v4659_v35 = vrot.slane %v4658_v34, 2  ;;  %v4673_v12 = vrot.slane %v4672_v13, 2  ;;  %v4372_v11 = vmul.f32 %v8993_v16, %v4236_v33  ;;  %v4373_v2 = vmul.f32 %v9017_v61, %v4237_v21 }
 0x4c5   : > { %v4653_v27 = vadd.f32 %v4652_v5, %v4651_v57  ;;  %v4667_v19 = vadd.f32 %v4666_v38, %v4665_v36  ;;  %v4375_v55 = vmul.f32 %v9020_v10, %v4239_v7  ;;  %v6126_v0 = vadd.f32 %v9681_v4, %v8507_v41 }
 0x4c6   : > { %v4660_v26 = vadd.f32 %v4659_v35, %v4658_v34  ;;  %v4674_v8 = vadd.f32 %v4673_v12, %v4672_v13  ;;  %v6190_v47 = vadd.f32 %v9682_v32, %v8509_v30  ;;  %v4677_v42 = vadd.f32 %v4373_v2, %v4369_v50 }
 0x4c7   : > { %v4654_v22 = vrot.slane %v4653_v27, 1  ;;  %v4668_v23 = vrot.slane %v4667_v19, 1  ;;  %v4691_v14 = vadd.f32 %v4375_v55, %v4371_v53  ;;  %v4238_v57 = vmax.f32 %v6126_v0, 0.0 }
 0x4c8   : > { %v4661_v29 = vrot.slane %v4660_v26, 1  ;;  %v4675_v33 = vrot.slane %v4674_v8, 1  ;;  %v4240_v36 = vmax.f32 %v6190_v47, 0.0  ;;  %v4678_v38 = vrot.slane %v4677_v42, 4 }
 0x4c9   : > { %v4655_v5 = vadd.f32 %v4654_v22, %v4653_v27  ;;  %v4669_v21 = vadd.f32 %v4668_v23, %v4667_v19  ;;  %v4692_v7 = vrot.slane %v4691_v14, 4  ;;  %v4374_v13 = vmul.f32 %v9031_v31, %v4238_v57  ;;  %v9683_v57 = vld [vmem:[#allocation41_spill] sm:$0xff] }
 0x4ca   : > { %v4662_v34 = vadd.f32 %v4661_v29, %v4660_v26  ;;  %v4676_v12 = vadd.f32 %v4675_v33, %v4674_v8  ;;  %v4376_v35 = vmul.f32 %v9034_v51, %v4240_v36  ;;  %v4679_v49 = vadd.f32 %v4678_v38, %v4677_v42  ;;  %v9686_v38 = vld [vmem:[#allocation44_spill] sm:$0xff] }
 0x4cb   : > { %v4905_v4 = vpack.c.bf16 %v4655_v5, %v4655_v5  ;;  %v4907_v32 = vpack.c.bf16 %v4669_v21, %v4669_v21  ;;  %v4693_v17 = vadd.f32 %v4692_v7, %v4691_v14  ;;  %v4684_v2 = vadd.f32 %v4374_v13, %v4370_v37  ;;  %v9684_v14 = vld [vmem:[#allocation42_spill] sm:$0xff]  ;;  %v9685_v5 = vld [vmem:[#allocation43_spill] sm:$0xff] }
 0x4cc   : > { %v4906_v50 = vpack.c.bf16 %v4662_v34, %v4662_v34  ;;  %v4908_v53 = vpack.c.bf16 %v4676_v12, %v4676_v12  ;;  %v4698_v55 = vadd.f32 %v4376_v35, %v4372_v11  ;;  %v4680_v27 = vrot.slane %v4679_v49, 2 }
 0x4cd   : > { %v5104_v0 = vunpack.c.l.b16 %v4905_v4  ;;  %v5106_v47 = vunpack.c.l.b16 %v4907_v32  ;;  %v4694_v19 = vrot.slane %v4693_v17, 2  ;;  %v4685_v26 = vrot.slane %v4684_v2, 4 }
 0x4ce   : > { %v9142_v22 = vunpack.c.l.b16 %v4906_v50  ;;  %v9144_v29 = vunpack.c.l.b16 %v4908_v53  ;;  %v4699_v8 = vrot.slane %v4698_v55, 4  ;;  %v4681_v23 = vadd.f32 %v4680_v27, %v4679_v49 }
 0x4cf   : > { %v4695_v33 = vadd.f32 %v4694_v19, %v4693_v17  ;;  %v6127_v42 = vadd.f32 %v9683_v57, %v8503_v52  ;;  %v6191_v36 = vadd.f32 %v9684_v14, %v8505_v45  ;;  %v4686_v37 = vadd.f32 %v4685_v26, %v4684_v2 }
 0x4d0   : > { %v4700_v11 = vadd.f32 %v4699_v8, %v4698_v55  ;;  %v6128_v21 = vadd.f32 %v9685_v5, %v8507_v41  ;;  %v6192_v7 = vadd.f32 %v9686_v38, %v8509_v30  ;;  %v4682_v34 = vrot.slane %v4681_v23, 1  ;;  %v9688_v5 = vld [vmem:[#allocation46_spill] sm:$0xff] }
 0x4d1   : > { %v4696_v12 = vrot.slane %v4695_v33, 1  ;;  %v4241_v13 = vmax.f32 %v6127_v42, 0.0  ;;  %v4243_v35 = vmax.f32 %v6191_v36, 0.0  ;;  %v4687_v49 = vrot.slane %v4686_v37, 2  ;;  %v9687_v42 = vld [vmem:[#allocation45_spill] sm:$0xff] }
 0x4d2   : > { %v4701_v17 = vrot.slane %v4700_v11, 2  ;;  %v4242_v4 = vmax.f32 %v6128_v21, 0.0  ;;  %v4244_v32 = vmax.f32 %v6192_v7, 0.0  ;;  %v4683_v50 = vadd.f32 %v4682_v34, %v4681_v23 }
 0x4d3   : > { %v4697_v53 = vadd.f32 %v4696_v12, %v4695_v33  ;;  %v4377_v27 = vmul.f32 %v8980_v54, %v4241_v13  ;;  %v4379_v2 = vmul.f32 %v8983_v63, %v4243_v35  ;;  %v4688_v55 = vadd.f32 %v4687_v49, %v4686_v37  ;;  %v9689_v37 = vld [vmem:[#allocation47_spill] sm:$0xff] }
 0x4d4   : > { %v4702_v19 = vadd.f32 %v4701_v17, %v4700_v11  ;;  %v4378_v26 = vmul.f32 %v8990_v60, %v4242_v4  ;;  %v4380_v8 = vmul.f32 %v8993_v16, %v4244_v32  ;;  %v4909_v57 = vpack.c.bf16 %v4683_v50, %v4683_v50 }
 0x4d5   : > { %v4911_v14 = vpack.c.bf16 %v4697_v53, %v4697_v53  ;;  %v6129_v36 = vadd.f32 %v9687_v42, %v8503_v52  ;;  %v6193_v21 = vadd.f32 %v9688_v5, %v8505_v45  ;;  %v4689_v23 = vrot.slane %v4688_v55, 1 }
 0x4d6   : > { %v4703_v33 = vrot.slane %v4702_v19, 1  ;;  %v6130_v38 = vadd.f32 %v8873_v62, %v8507_v41  ;;  %v6194_v11 = vadd.f32 %v9689_v37, %v8509_v30  ;;  %v5108_v7 = vunpack.c.l.b16 %v4909_v57 }
 0x4d7   : > { %v5110_v34 = vunpack.c.l.b16 %v4911_v14  ;;  %v4245_v12 = vmax.f32 %v6129_v36, 0.0  ;;  %v4247_v13 = vmax.f32 %v6193_v21, 0.0  ;;  %v4690_v35 = vadd.f32 %v4689_v23, %v4688_v55 }
 0x4d8   : > { %v4704_v49 = vadd.f32 %v4703_v33, %v4702_v19  ;;  %v4246_v17 = vmax.f32 %v6130_v38, 0.0  ;;  %v4248_v4 = vmax.f32 %v6194_v11, 0.0  ;;  %v9167_v32 = vsel %vm5136_vm5, %v5108_v7, %v5104_v0 }
 0x4d9   : > { %v9170_v50 = vsel %vm5136_vm5, %v5110_v34, %v5106_v47  ;;  %v4381_v53 = vmul.f32 %v9017_v61, %v4245_v12  ;;  %v4383_v62 = vmul.f32 %v9020_v10, %v4247_v13  ;;  %v4910_v42 = vpack.c.bf16 %v4690_v35, %v4690_v35 }
 0x4da   : > { %v4912_v5 = vpack.c.bf16 %v4704_v49, %v4704_v49  ;;  %v4382_v57 = vmul.f32 %v9031_v31, %v4246_v17  ;;  %v4384_v14 = vmul.f32 %v9034_v51, %v4248_v4  ;;  %v6131_v36 = vadd.f32 %v8889_v6, %v8503_v52 }
 0x4db   : > { %v4705_v55 = vadd.f32 %v4381_v53, %v4377_v27  ;;  %v4719_v19 = vadd.f32 %v4383_v62, %v4379_v2  ;;  %v6195_v0 = vadd.f32 %v8891_v20, %v8505_v45  ;;  %v5109_v47 = vunpack.c.l.b16 %v4910_v42  ;;  %v9691_v62 = vld [vmem:[#allocation25_spill] sm:$0xff] }
 0x4dc   : > { %v5111_v21 = vunpack.c.l.b16 %v4912_v5  ;;  %v4712_v23 = vadd.f32 %v4382_v57, %v4378_v26  ;;  %v4726_v33 = vadd.f32 %v4384_v14, %v4380_v8  ;;  %v4249_v11 = vmax.f32 %v6131_v36, 0.0 }
 0x4dd   : > { %v4706_v38 = vrot.slane %v4705_v55, 4  ;;  %v4720_v37 = vrot.slane %v4719_v19, 4  ;;  %v4251_v7 = vmax.f32 %v6195_v0, 0.0  ;;  %v9182_v34 = vsel %vm5136_vm5, %v5109_v47, %v9142_v22 }
 0x4de   : > { %v9186_v27 = vsel %vm5136_vm5, %v5111_v21, %v9144_v29  ;;  %v4713_v6 = vrot.slane %v4712_v23, 4  ;;  %v4727_v2 = vrot.slane %v4726_v33, 4  ;;  %v4385_v13 = vmul.f32 %v8980_v54, %v4249_v11  ;;  %v9690_v29 = vld [vmem:[#allocation23_spill] sm:$0xff] }
 0x4df   : > { %v4707_v12 = vadd.f32 %v4706_v38, %v4705_v55  ;;  %v4721_v20 = vadd.f32 %v4720_v37, %v4719_v19  ;;  %v4387_v26 = vmul.f32 %v8983_v63, %v4251_v7  ;;  %v6132_v49 = vadd.f32 %v8897_v56, %v8507_v41 }
 0x4e0   : > { %v4714_v8 = vadd.f32 %v4713_v6, %v4712_v23  ;;  %v4728_v35 = vadd.f32 %v4727_v2, %v4726_v33  ;;  %v6196_v22 = vadd.f32 %v8899_v25, %v8509_v30  ;;  %v6133_v53 = vadd.f32 %v9690_v29, %v8503_v52 }
 0x4e1   : > { %v4708_v17 = vrot.slane %v4707_v12, 2  ;;  %v4722_v4 = vrot.slane %v4721_v20, 2  ;;  %v6197_v42 = vadd.f32 %v9691_v62, %v8505_v45  ;;  %v4250_v14 = vmax.f32 %v6132_v49, 0.0 }
 0x4e2   : > { %v4715_v5 = vrot.slane %v4714_v8, 2  ;;  %v4729_v57 = vrot.slane %v4728_v35, 2  ;;  %v4252_v55 = vmax.f32 %v6196_v22, 0.0  ;;  %v4253_v0 = vmax.f32 %v6133_v53, 0.0 }
 0x4e3   : > { %v4709_v19 = vadd.f32 %v4708_v17, %v4707_v12  ;;  %v4723_v36 = vadd.f32 %v4722_v4, %v4721_v20  ;;  %v4255_v47 = vmax.f32 %v6197_v42, 0.0  ;;  %v4386_v25 = vmul.f32 %v8990_v60, %v4250_v14  ;;  %v9692_v12 = vld [vmem:[#allocation26_spill] sm:$0xff] }
 0x4e4   : > { %v4716_v56 = vadd.f32 %v4715_v5, %v4714_v8  ;;  %v4730_v21 = vadd.f32 %v4729_v57, %v4728_v35  ;;  %v4388_v23 = vmul.f32 %v8993_v16, %v4252_v55  ;;  %v4389_v37 = vmul.f32 %v9017_v61, %v4253_v0 }
 0x4e5   : > { %v4710_v33 = vrot.slane %v4709_v19, 1  ;;  %v4724_v38 = vrot.slane %v4723_v36, 1  ;;  %v4391_v11 = vmul.f32 %v9020_v10, %v4255_v47  ;;  %v6134_v2 = vadd.f32 %v8909_v18, %v8507_v41 }
 0x4e6   : > { %v4717_v7 = vrot.slane %v4716_v56, 1  ;;  %v4731_v6 = vrot.slane %v4730_v21, 1  ;;  %v6198_v20 = vadd.f32 %v9692_v12, %v8509_v30  ;;  %v4733_v49 = vadd.f32 %v4389_v37, %v4385_v13 }
 0x4e7   : > { %v4711_v8 = vadd.f32 %v4710_v33, %v4709_v19  ;;  %v4725_v35 = vadd.f32 %v4724_v38, %v4723_v36  ;;  %v4747_v22 = vadd.f32 %v4391_v11, %v4387_v26  ;;  %v4254_v29 = vmax.f32 %v6134_v2, 0.0  ;;  %v9693_v2 = vld [vmem:[#allocation27_spill] sm:$0xff] }
 0x4e8   : > { %v4718_v17 = vadd.f32 %v4717_v7, %v4716_v56  ;;  %v4732_v4 = vadd.f32 %v4731_v6, %v4730_v21  ;;  %v4256_v53 = vmax.f32 %v6198_v20, 0.0  ;;  %v4734_v5 = vrot.slane %v4733_v49, 4 }
 0x4e9   : > { %v4913_v62 = vpack.c.bf16 %v4711_v8, %v4711_v8  ;;  %v4915_v42 = vpack.c.bf16 %v4725_v35, %v4725_v35  ;;  %v4748_v57 = vrot.slane %v4747_v22, 4  ;;  %v4390_v0 = vmul.f32 %v9031_v31, %v4254_v29 }
 0x4ea   : > { %v4914_v14 = vpack.c.bf16 %v4718_v17, %v4718_v17  ;;  %v4916_v55 = vpack.c.bf16 %v4732_v4, %v4732_v4  ;;  %v4392_v18 = vmul.f32 %v9034_v51, %v4256_v53  ;;  %v4735_v19 = vadd.f32 %v4734_v5, %v4733_v49 }
 0x4eb   : > { %v5112_v47 = vunpack.c.l.b16 %v4913_v62  ;;  %v5114_v12 = vunpack.c.l.b16 %v4915_v42  ;;  %v4749_v36 = vadd.f32 %v4748_v57, %v4747_v22  ;;  %v4740_v56 = vadd.f32 %v4390_v0, %v4386_v25 }
 0x4ec   : > { %v9208_v13 = vunpack.c.l.b16 %v4914_v14  ;;  %v9210_v26 = vunpack.c.l.b16 %v4916_v55  ;;  %v4754_v21 = vadd.f32 %v4392_v18, %v4388_v23  ;;  %v4736_v37 = vrot.slane %v4735_v19, 2 }
 0x4ed   : > { %v5172_v33 = vsel %vm5138_vm6, %v5112_v47, %v9167_v32  ;;  %v5186_v38 = vsel %vm5138_vm6, %v5114_v12, %v9170_v50  ;;  %v4750_v11 = vrot.slane %v4749_v36, 2  ;;  %v4741_v7 = vrot.slane %v4740_v56, 4 }
 0x4ee   : > { %v4755_v6 = vrot.slane %v4754_v21, 4  ;;  %v6135_v20 = vadd.f32 %v9693_v2, %v8503_v52  ;;  %v6199_v8 = vadd.f32 %v8930_v39, %v8505_v45  ;;  %v4737_v35 = vadd.f32 %v4736_v37, %v4735_v19 }
 0x4ef   : > { %v4751_v49 = vadd.f32 %v4750_v11, %v4749_v36  ;;  %v6136_v25 = vadd.f32 %v8932_v9, %v8507_v41  ;;  %v6200_v32 = vadd.f32 %v8934_v44, %v8509_v30  ;;  %v4742_v23 = vadd.f32 %v4741_v7, %v4740_v56 }
 0x4f0   : > { %v4756_v50 = vadd.f32 %v4755_v6, %v4754_v21  ;;  %v4257_v22 = vmax.f32 %v6135_v20, 0.0  ;;  %v4259_v17 = vmax.f32 %v6199_v8, 0.0  ;;  %v4738_v4 = vrot.slane %v4737_v35, 1 }
 0x4f1   : > { %v4752_v29 = vrot.slane %v4751_v49, 1  ;;  %v4258_v53 = vmax.f32 %v6136_v25, 0.0  ;;  %v4260_v62 = vmax.f32 %v6200_v32, 0.0  ;;  %v4743_v42 = vrot.slane %v4742_v23, 2 }
 0x4f2   : > { %v4757_v5 = vrot.slane %v4756_v50, 2  ;;  %v4393_v39 = vmul.f32 %v8980_v54, %v4257_v22  ;;  %v4395_v57 = vmul.f32 %v8983_v63, %v4259_v17  ;;  %v4739_v14 = vadd.f32 %v4738_v4, %v4737_v35 }
 0x4f3   : > { %v4753_v55 = vadd.f32 %v4752_v29, %v4751_v49  ;;  %v4394_v9 = vmul.f32 %v8990_v60, %v4258_v53  ;;  %v4396_v44 = vmul.f32 %v8993_v16, %v4260_v62  ;;  %v4744_v0 = vadd.f32 %v4743_v42, %v4742_v23 }
 0x4f4   : > { %v4758_v18 = vadd.f32 %v4757_v5, %v4756_v50  ;;  %v6137_v47 = vadd.f32 %v8936_v48, %v8503_v52  ;;  %v6201_v12 = vadd.f32 %v8938_v40, %v8505_v45  ;;  %v4917_v19 = vpack.c.bf16 %v4739_v14, %v4739_v14 }
 0x4f5   : > { %v4919_v36 = vpack.c.bf16 %v4753_v55, %v4753_v55  ;;  %v6138_v56 = vadd.f32 %v8942_v46, %v8507_v41  ;;  %v6202_v21 = vadd.f32 %v8944_v59, %v8509_v30  ;;  %v4745_v37 = vrot.slane %v4744_v0, 1 }
 0x4f6   : > { %v4759_v11 = vrot.slane %v4758_v18, 1  ;;  %v4261_v7 = vmax.f32 %v6137_v47, 0.0  ;;  %v4263_v6 = vmax.f32 %v6201_v12, 0.0  ;;  %v5116_v2 = vunpack.c.l.b16 %v4917_v19 }
 0x4f7   : > { %v5118_v20 = vunpack.c.l.b16 %v4919_v36  ;;  %v4262_v8 = vmax.f32 %v6138_v56, 0.0  ;;  %v4264_v35 = vmax.f32 %v6202_v21, 0.0  ;;  %v4746_v48 = vadd.f32 %v4745_v37, %v4744_v0 }
 0x4f8   : > { %v4760_v49 = vadd.f32 %v4759_v11, %v4758_v18  ;;  %v4397_v40 = vmul.f32 %v9017_v61, %v4261_v7  ;;  %v4399_v25 = vmul.f32 %v9020_v10, %v4263_v6  ;;  %v9239_v32 = vsel %vm5140_vm7, %v5116_v2, %v5172_v33  ;;  %v9695_v2 = vld [vmem:[#allocation52_spill] sm:$0xff] }
 0x4f9   : > { %v9242_v46 = vsel %vm5140_vm7, %v5118_v20, %v5186_v38  ;;  %v4398_v59 = vmul.f32 %v9031_v31, %v4262_v8  ;;  %v4400_v23 = vmul.f32 %v9034_v51, %v4264_v35  ;;  %v4918_v50 = vpack.c.bf16 %v4746_v48, %v4746_v48 }
 0x4fa   : > { %v4920_v22 = vpack.c.bf16 %v4760_v49, %v4760_v49  ;;  %v4761_v17 = vadd.f32 %v4397_v40, %v4393_v39  ;;  %v4775_v4 = vadd.f32 %v4399_v25, %v4395_v57  ;;  %v6139_v62 = vadd.f32 %v8968_v43, %v8503_v52  ;;  %v9694_v43 = vld [vmem:[#allocation51_spill] sm:$0xff] }
 0x4fb   : > { %v4768_v29 = vadd.f32 %v4398_v59, %v4394_v9  ;;  %v4782_v53 = vadd.f32 %v4400_v23, %v4396_v44  ;;  %v6203_v33 = vadd.f32 %v8970_v3, %v8505_v45  ;;  %v9250_v42 = vunpack.c.l.b16 %v4918_v50 }
 0x4fc   : > { %v9252_v38 = vunpack.c.l.b16 %v4920_v22  ;;  %v4762_v5 = vrot.slane %v4761_v17, 4  ;;  %v4776_v14 = vrot.slane %v4775_v4, 4  ;;  %v4265_v18 = vmax.f32 %v6139_v62, 0.0 }
 0x4fd   : > { %v4769_v55 = vrot.slane %v4768_v29, 4  ;;  %v4783_v0 = vrot.slane %v4782_v53, 4  ;;  %v4267_v47 = vmax.f32 %v6203_v33, 0.0  ;;  %v6140_v9 = vadd.f32 %v8972_v24, %v8507_v41  ;;  %v9696_v24 = vld [vmem:[#allocation53_spill] sm:$0xff] }
 0x4fe   : > { %v4763_v39 = vadd.f32 %v4762_v5, %v4761_v17  ;;  %v4777_v57 = vadd.f32 %v4776_v14, %v4775_v4  ;;  %v6204_v44 = vadd.f32 %v9694_v43, %v8509_v30  ;;  %v4401_v19 = vmul.f32 %v8980_v54, %v4265_v18  ;;  %v9697_v4 = vld [vmem:[#allocation54_spill] sm:$0xff] }
 0x4ff   : > { %v4770_v12 = vadd.f32 %v4769_v55, %v4768_v29  ;;  %v4784_v3 = vadd.f32 %v4783_v0, %v4782_v53  ;;  %v4403_v36 = vmul.f32 %v8983_v63, %v4267_v47  ;;  %v4266_v37 = vmax.f32 %v6140_v9, 0.0  ;;  %v9698_v53 = vld [vmem:[#allocation55_spill] sm:$0xff] }
 0x500   : > { %v4764_v56 = vrot.slane %v4763_v39, 2  ;;  %v4778_v21 = vrot.slane %v4777_v57, 2  ;;  %v4268_v11 = vmax.f32 %v6204_v44, 0.0  ;;  %v6141_v20 = vadd.f32 %v9695_v2, %v8503_v52 }
 0x501   : > { %v4771_v7 = vrot.slane %v4770_v12, 2  ;;  %v4785_v6 = vrot.slane %v4784_v3, 2  ;;  %v6205_v8 = vadd.f32 %v9696_v24, %v8505_v45  ;;  %v4402_v49 = vmul.f32 %v8990_v60, %v4266_v37 }
 0x502   : > { %v4765_v35 = vadd.f32 %v4764_v56, %v4763_v39  ;;  %v4779_v48 = vadd.f32 %v4778_v21, %v4777_v57  ;;  %v4404_v40 = vmul.f32 %v8993_v16, %v4268_v11  ;;  %v4269_v23 = vmax.f32 %v6141_v20, 0.0 }
 0x503   : > { %v4772_v25 = vadd.f32 %v4771_v7, %v4770_v12  ;;  %v4786_v59 = vadd.f32 %v4785_v6, %v4784_v3  ;;  %v4271_v50 = vmax.f32 %v6205_v8, 0.0  ;;  %v6142_v29 = vadd.f32 %v9697_v4, %v8507_v41 }
 0x504   : > { %v4766_v22 = vrot.slane %v4765_v35, 1  ;;  %v4780_v17 = vrot.slane %v4779_v48, 1  ;;  %v6206_v62 = vadd.f32 %v9698_v53, %v8509_v30  ;;  %v4405_v14 = vmul.f32 %v9017_v61, %v4269_v23 }
 0x505   : > { %v4773_v33 = vrot.slane %v4772_v25, 1  ;;  %v4787_v5 = vrot.slane %v4786_v59, 1  ;;  %v4407_v55 = vmul.f32 %v9020_v10, %v4271_v50  ;;  %v4270_v47 = vmax.f32 %v6142_v29, 0.0 }
 0x506   : > { %v4767_v0 = vadd.f32 %v4766_v22, %v4765_v35  ;;  %v4781_v18 = vadd.f32 %v4780_v17, %v4779_v48  ;;  %v4272_v39 = vmax.f32 %v6206_v62, 0.0  ;;  %v4789_v43 = vadd.f32 %v4405_v14, %v4401_v19  ;;  %v9700_v62 = vld [vmem:[#allocation57_spill] sm:$0xff] }
 0x507   : > { %v4774_v57 = vadd.f32 %v4773_v33, %v4772_v25  ;;  %v4788_v9 = vadd.f32 %v4787_v5, %v4786_v59  ;;  %v4803_v44 = vadd.f32 %v4407_v55, %v4403_v36  ;;  %v4406_v56 = vmul.f32 %v9031_v31, %v4270_v47 }
 0x508   : > { %v4921_v12 = vpack.c.bf16 %v4767_v0, %v4767_v0  ;;  %v4923_v3 = vpack.c.bf16 %v4781_v18, %v4781_v18  ;;  %v4408_v21 = vmul.f32 %v9034_v51, %v4272_v39  ;;  %v4790_v7 = vrot.slane %v4789_v43, 4 }
 0x509   : > { %v4922_v37 = vpack.c.bf16 %v4774_v57, %v4774_v57  ;;  %v4924_v11 = vpack.c.bf16 %v4788_v9, %v4788_v9  ;;  %v4804_v6 = vrot.slane %v4803_v44, 4  ;;  %v4796_v24 = vadd.f32 %v4406_v56, %v4402_v49 }
 0x50a   : > { %v5120_v2 = vunpack.c.l.b16 %v4921_v12  ;;  %v5122_v20 = vunpack.c.l.b16 %v4923_v3  ;;  %v4810_v8 = vadd.f32 %v4408_v21, %v4404_v40  ;;  %v4791_v19 = vadd.f32 %v4790_v7, %v4789_v43  ;;  %v9699_v40 = vld [vmem:[#allocation56_spill] sm:$0xff]  ;;  %v9702_v7 = vld [vmem:[#allocation61_spill] sm:$0xff] }
 0x50b   : > { %v9274_v35 = vunpack.c.l.b16 %v4922_v37  ;;  %v9276_v48 = vunpack.c.l.b16 %v4924_v11  ;;  %v4805_v36 = vadd.f32 %v4804_v6, %v4803_v44  ;;  %v4797_v23 = vrot.slane %v4796_v24, 4 }
 0x50c   : > { %v5174_v25 = vsel %vm5142_vm8, %v5120_v2, %v9239_v32  ;;  %v5188_v59 = vsel %vm5142_vm8, %v5122_v20, %v9242_v46  ;;  %v4811_v50 = vrot.slane %v4810_v8, 4  ;;  %v4792_v22 = vrot.slane %v4791_v19, 2  ;;  %v9701_v32 = vld [vmem:[#allocation58_spill] sm:$0xff] }
 0x50d   : > { %v4806_v17 = vrot.slane %v4805_v36, 2  ;;  %v6143_v49 = vadd.f32 %v9013_v15, %v8503_v52  ;;  %v6207_v4 = vadd.f32 %v9699_v40, %v8505_v45  ;;  %v4798_v29 = vadd.f32 %v4797_v23, %v4796_v24 }
 0x50e   : > { %v4812_v53 = vadd.f32 %v4811_v50, %v4810_v8  ;;  %v6144_v33 = vadd.f32 %v9700_v62, %v8507_v41  ;;  %v6208_v5 = vadd.f32 %v9701_v32, %v8509_v30  ;;  %v4793_v14 = vadd.f32 %v4792_v22, %v4791_v19 }
 0x50f   : > { %v4807_v46 = vadd.f32 %v4806_v17, %v4805_v36  ;;  %v4273_v55 = vmax.f32 %v6143_v49, 0.0  ;;  %v4275_v0 = vmax.f32 %v6207_v4, 0.0  ;;  %v4799_v18 = vrot.slane %v4798_v29, 2 }
 0x510   : > { %v4813_v47 = vrot.slane %v4812_v53, 2  ;;  %v4274_v39 = vmax.f32 %v6144_v33, 0.0  ;;  %v4276_v57 = vmax.f32 %v6208_v5, 0.0  ;;  %v4794_v15 = vrot.slane %v4793_v14, 1 }
 0x511   : > { %v4808_v9 = vrot.slane %v4807_v46, 1  ;;  %v4409_v43 = vmul.f32 %v8980_v54, %v4273_v55  ;;  %v4411_v44 = vmul.f32 %v8983_v63, %v4275_v0  ;;  %v4800_v12 = vadd.f32 %v4799_v18, %v4798_v29 }
 0x512   : > { %v4814_v3 = vadd.f32 %v4813_v47, %v4812_v53  ;;  %v4410_v56 = vmul.f32 %v8990_v60, %v4274_v39  ;;  %v4412_v21 = vmul.f32 %v8993_v16, %v4276_v57  ;;  %v4795_v37 = vadd.f32 %v4794_v15, %v4793_v14  ;;  %v9703_v47 = vld [vmem:[#allocation64_spill] sm:$0xff]  ;;  %v9704_v57 = vld [vmem:[#allocation65_spill] sm:$0xff] }
 0x513   : > { %v4809_v11 = vadd.f32 %v4808_v9, %v4807_v46  ;;  %v6145_v6 = vadd.f32 %v9702_v7, %v8503_v52  ;;  %v6209_v2 = vadd.f32 %v9039_v1, %v8505_v45  ;;  %v4801_v20 = vrot.slane %v4800_v12, 1 }
 0x514   : > { %v4815_v24 = vrot.slane %v4814_v3, 1  ;;  %v6146_v54 = vadd.f32 %v9041_v58, %v8507_v41  ;;  %v6210_v63 = vadd.f32 %v9043_v28, %v8509_v30  ;;  %v4925_v8 = vpack.c.bf16 %v4795_v37, %v4795_v37 }
 0x515   : > { %v4927_v60 = vpack.c.bf16 %v4809_v11, %v4809_v11  ;;  %v4277_v19 = vmax.f32 %v6145_v6, 0.0  ;;  %v4279_v16 = vmax.f32 %v6209_v2, 0.0  ;;  %v4802_v36 = vadd.f32 %v4801_v20, %v4800_v12 }
 0x516   : > { %v4816_v23 = vadd.f32 %v4815_v24, %v4814_v3  ;;  %v4278_v50 = vmax.f32 %v6146_v54, 0.0  ;;  %v4280_v22 = vmax.f32 %v6210_v63, 0.0  ;;  %v5124_v17 = vunpack.c.l.b16 %v4925_v8  ;;  %v6922_v54 = vld [vmem:[#allocation8] sm:$0xff]  ;;  %v6923_v8 = vld [vmem:[#allocation8 + $0x10] sm:$0xff] }
 0x517   : > { %v5126_v49 = vunpack.c.l.b16 %v4927_v60  ;;  %v4413_v1 = vmul.f32 %v9017_v61, %v4277_v19  ;;  %v4415_v40 = vmul.f32 %v9020_v10, %v4279_v16  ;;  %v4926_v4 = vpack.c.bf16 %v4802_v36, %v4802_v36  ;;  %v6924_v36 = vld [vmem:[#allocation8 + $0x8] sm:$0xff] }
 0x518   : > { %v4928_v29 = vpack.c.bf16 %v4816_v23, %v4816_v23  ;;  %v4414_v58 = vmul.f32 %v9031_v31, %v4278_v50  ;;  %v4416_v28 = vmul.f32 %v9034_v51, %v4280_v22  ;;  %v9307_v53 = vsel %vm5144_vm9, %v5124_v17, %v5174_v25  ;;  %v6925_v50 = vld [vmem:[#allocation8 + $0x18] sm:$0xff] }
 0x519   : > { %v9310_v62 = vsel %vm5144_vm9, %v5126_v49, %v5188_v59  ;;  %v4817_v33 = vadd.f32 %v4413_v1, %v4409_v43  ;;  %v4831_v32 = vadd.f32 %v4415_v40, %v4411_v44  ;;  %v9312_v5 = vunpack.c.l.b16 %v4926_v4  ;;  %v9705_v59 = vld [vmem:[#allocation66_spill] sm:$0xff]  ;;  %v9706_v44 = vld [vmem:[#allocation67_spill] sm:$0xff]  ;;  %v9707_v1 = vld [vmem:[#allocation68_spill] sm:$0xff] }
 0x51a   : > { %v9314_v14 = vunpack.c.l.b16 %v4928_v29  ;;  %v4824_v46 = vadd.f32 %v4414_v58, %v4410_v56  ;;  %v4838_v55 = vadd.f32 %v4416_v28, %v4412_v21  ;;  %v6147_v39 = vadd.f32 %v9703_v47, %v8503_v52  ;;  %v9708_v4 = vld [vmem:[#allocation69_spill] sm:$0xff] }
 0x51b   : > { %v4818_v0 = vrot.slane %v4817_v33, 4  ;;  %v4832_v18 = vrot.slane %v4831_v32, 4  ;;  %v6211_v25 = vadd.f32 %v9704_v57, %v8505_v45  ;;  %v6148_v43 = vadd.f32 %v9705_v59, %v8507_v41 }
 0x51c   : > { %v4825_v15 = vrot.slane %v4824_v46, 4  ;;  %v4839_v9 = vrot.slane %v4838_v55, 4  ;;  %v6212_v12 = vadd.f32 %v9706_v44, %v8509_v30  ;;  %v4281_v56 = vmax.f32 %v6147_v39, 0.0 }
 0x51d   : > { %v4819_v3 = vadd.f32 %v4818_v0, %v4817_v33  ;;  %v4833_v37 = vadd.f32 %v4832_v18, %v4831_v32  ;;  %v4283_v21 = vmax.f32 %v6211_v25, 0.0  ;;  %v4282_v6 = vmax.f32 %v6148_v43, 0.0  ;;  %v9709_v33 = vld [vmem:[#allocation70_spill] sm:$0xff] }
 0x51e   : > { %v4826_v11 = vadd.f32 %v4825_v15, %v4824_v46  ;;  %v4840_v7 = vadd.f32 %v4839_v9, %v4838_v55  ;;  %v4284_v2 = vmax.f32 %v6212_v12, 0.0  ;;  %v4417_v63 = vmul.f32 %v6922_v54, %v4281_v56  ;;  %v9710_v46 = vld [vmem:[#allocation71_spill] sm:$0xff] }
 0x51f   : > { %v4820_v20 = vrot.slane %v4819_v3, 2  ;;  %v4834_v24 = vrot.slane %v4833_v37, 2  ;;  %v4419_v60 = vmul.f32 %v6923_v8, %v4283_v21  ;;  %v4418_v23 = vmul.f32 %v6924_v36, %v4282_v6 }
 0x520   : > { %v4827_v19 = vrot.slane %v4826_v11, 2  ;;  %v4841_v16 = vrot.slane %v4840_v7, 2  ;;  %v4420_v22 = vmul.f32 %v6925_v50, %v4284_v2  ;;  %v6149_v40 = vadd.f32 %v9707_v1, %v8503_v52 }
 0x521   : > { %v4821_v17 = vadd.f32 %v4820_v20, %v4819_v3  ;;  %v4835_v49 = vadd.f32 %v4834_v24, %v4833_v37  ;;  %v6213_v29 = vadd.f32 %v9708_v4, %v8505_v45  ;;  %v6150_v32 = vadd.f32 %v9709_v33, %v8507_v41  ;;  %v9715_v4 = vld [vmem:[#allocation22_spill] sm:$0xff] }
 0x522   : > { %v4828_v58 = vadd.f32 %v4827_v19, %v4826_v11  ;;  %v4842_v28 = vadd.f32 %v4841_v16, %v4840_v7  ;;  %v6214_v55 = vadd.f32 %v9710_v46, %v8509_v30  ;;  %v4285_v47 = vmax.f32 %v6149_v40, 0.0  ;;  %v9711_v19 = vld [vmem:[#allocation72_spill] sm:$0xff]  ;;  %v9713_v16 = vld [vmem:[#allocation59_spill] sm:$0xff] }
 0x523   : > { %v4822_v0 = vrot.slane %v4821_v17, 1  ;;  %v4836_v18 = vrot.slane %v4835_v49, 1  ;;  %v4287_v39 = vmax.f32 %v6213_v29, 0.0  ;;  %v4286_v15 = vmax.f32 %v6150_v32, 0.0  ;;  %v9716_v29 = vld [vmem:[#allocation31_spill] sm:$0xff] }
 0x524   : > { %v4829_v57 = vrot.slane %v4828_v58, 1  ;;  %v4843_v25 = vrot.slane %v4842_v28, 1  ;;  %v4288_v9 = vmax.f32 %v6214_v55, 0.0  ;;  %v4421_v45 = vmul.f32 %v9017_v61, %v4285_v47  ;;  %v9717_v55 = vld [vmem:[#allocation33_spill] sm:$0xff] }
 0x525   : > { %v4823_v52 = vadd.f32 %v4822_v0, %v4821_v17  ;;  %v4837_v59 = vadd.f32 %v4836_v18, %v4835_v49  ;;  %v4423_v43 = vmul.f32 %v9020_v10, %v4287_v39  ;;  %v4422_v41 = vmul.f32 %v9031_v31, %v4286_v15  ;;  %v9718_v39 = vld [vmem:[#allocation48_spill] sm:$0xff] }
 0x526   : > { %v4830_v44 = vadd.f32 %v4829_v57, %v4828_v58  ;;  %v4844_v12 = vadd.f32 %v4843_v25, %v4842_v28  ;;  %v4424_v30 = vmul.f32 %v9034_v51, %v4288_v9  ;;  %v4845_v56 = vadd.f32 %v4421_v45, %v4417_v63 }
 0x527   : > { %v4929_v3 = vpack.c.bf16 %v4823_v52, %v4823_v52  ;;  %v4931_v37 = vpack.c.bf16 %v4837_v59, %v4837_v59  ;;  %v4859_v21 = vadd.f32 %v4423_v43, %v4419_v60  ;;  %v4852_v6 = vadd.f32 %v4422_v41, %v4418_v23  ;;  %v9719_v52 = vld [vmem:[#allocation29_spill] sm:$0xff] }
 0x528   : > { %v4930_v11 = vpack.c.bf16 %v4830_v44, %v4830_v44  ;;  %v4932_v7 = vpack.c.bf16 %v4844_v12, %v4844_v12  ;;  %v4866_v2 = vadd.f32 %v4424_v30, %v4420_v22  ;;  %v4846_v61 = vrot.slane %v4845_v56, 4 }
 0x529   : > { %v9336_v20 = vunpack.c.l.b16 %v4929_v3  ;;  %v9338_v24 = vunpack.c.l.b16 %v4931_v37  ;;  %v4860_v10 = vrot.slane %v4859_v21, 4  ;;  %v4853_v54 = vrot.slane %v4852_v6, 4 }
 0x52a   : > { %v4867_v8 = vrot.slane %v4866_v2, 4  ;;  %v9712_v31 = vrot.slane %v9711_v19, 1  ;;  %v9714_v63 = vpack.c.bf16 %v9713_v16, %v9713_v16  ;;  %v4847_v36 = vadd.f32 %v4846_v61, %v4845_v56  ;;  %v9720_v56 = vld [vmem:[#allocation73_spill] sm:$0xff] }
 0x52b   : > { %v4861_v50 = vadd.f32 %v4860_v10, %v4859_v21  ;;  %v5129_v23 = vunpack.c.l.b16 %v4930_v11  ;;  %v4854_v22 = vadd.f32 %v4853_v54, %v4852_v6  ;;  %v5151_v58 = vsel %vm5138_vm6, %v9716_v29, %v9715_v4 }
 0x52c   : > { %v4634_v51 = vadd.f32 %v9712_v31, %v9711_v19  ;;  %v5097_v60 = vunpack.c.l.b16 %v9714_v63  ;;  %v4868_v17 = vadd.f32 %v4867_v8, %v4866_v2  ;;  %v4848_v1 = vrot.slane %v4847_v36, 2  ;;  %v9725_v8 = vld [vmem:[#allocation32_spill] sm:$0xff]  ;;  %v9726_v63 = vld [vmem:[#allocation34_spill] sm:$0xff] }
 0x52d   : > { %v4862_v40 = vrot.slane %v4861_v50, 2  ;;  %v5179_v28 = vsel %vm5138_vm6, %v9208_v13, %v9182_v34  ;;  %v4855_v33 = vrot.slane %v4854_v22, 2  ;;  %v5152_v0 = vsel %vm5140_vm7, %v9717_v55, %v5151_v58  ;;  %v9729_v55 = vld [vmem:[#allocation30_spill] sm:$0xff] }
 0x52e   : > { %v4902_v49 = vpack.c.bf16 %v4634_v51, %v4634_v51  ;;  %v4869_v32 = vrot.slane %v4868_v17, 2  ;;  %v4849_v18 = vadd.f32 %v4848_v1, %v4847_v36  ;;  %v5153_v57 = vsel %vm5142_vm8, %v9718_v39, %v5152_v0  ;;  %v9731_v39 = vld [vmem:[#allocation74_spill] sm:$0xff] }
 0x52f   : > { %v4863_v47 = vadd.f32 %v4862_v40, %v4861_v50  ;;  %v5180_v25 = vsel %vm5140_vm7, %v9250_v42, %v5179_v28  ;;  %v4856_v15 = vadd.f32 %v4855_v33, %v4854_v22  ;;  %v5154_v59 = vsel %vm5144_vm9, %v9719_v52, %v5153_v57  ;;  %v9728_v40 = vld [vmem:[#allocation28_spill] sm:$0xff]  ;;  %v9733_v52 = vld [vmem:[#allocation63_spill] sm:$0xff] }
 0x530   : > { %v5101_v46 = vunpack.c.l.b16 %v4902_v49  ;;  %v4870_v9 = vadd.f32 %v4869_v32, %v4868_v17  ;;  %v5181_v34 = vsel %vm5142_vm8, %v9274_v35, %v5180_v25  ;;  %v4850_v13 = vrot.slane %v4849_v18, 1  ;;  %v9722_v35 = vld [vmem:[#allocation60_spill] sm:$0xff] }
 0x531   : > { %v4864_v45 = vrot.slane %v4863_v47, 1  ;;  %v5155_v43 = vsel %vm5146_vm10, %v5097_v60, %v5154_v59  ;;  %v5182_v44 = vsel %vm5144_vm9, %v9312_v5, %v5181_v34  ;;  %v4857_v12 = vrot.slane %v4856_v15, 1  ;;  %v9724_v5 = vld [vmem:[#allocation24_spill] sm:$0xff] }
 0x532   : > { %v4871_v41 = vrot.slane %v4870_v9, 1  ;;  %v5156_v30 = vsel %vm5148_vm11, %v5101_v46, %v5155_v43  ;;  %v5183_v42 = vsel %vm5146_vm10, %v5129_v23, %v5182_v44  ;;  %v4851_v3 = vadd.f32 %v4850_v13, %v4849_v18  ;;  %v9727_v23 = vld [vmem:[#allocation49_spill] sm:$0xff] }
 0x533   : > { %v4865_v37 = vadd.f32 %v4864_v45, %v4863_v47  ;;  %v9721_v21 = vrot.slane %v9720_v56, 1  ;;  %v9723_v6 = vpack.c.bf16 %v9722_v35, %v9722_v35  ;;  %v4858_v61 = vadd.f32 %v4857_v12, %v4856_v15  ;;  %v5858_v12 = vld [vmem:[%s9478_s11] ss:$0 sm:$0xff] }
 0x534   : > { %v4872_v10 = vadd.f32 %v4871_v41, %v4870_v9  ;;  %v5131_v54 = vunpack.c.l.b16 %v4932_v7  ;;  %v5165_v19 = vsel %vm5138_vm6, %v9725_v8, %v9724_v5  ;;  %v4933_v31 = vpack.c.bf16 %v4851_v3, %v4851_v3  ;;  %v9732_v9 = vld [vmem:[#allocation50_spill] sm:$0xff] }
 0x535   : > { %v4648_v11 = vadd.f32 %v9721_v21, %v9720_v56  ;;  %v5099_v2 = vunpack.c.l.b16 %v9723_v6  ;;  %v4935_v51 = vpack.c.bf16 %v4865_v37, %v4865_v37  ;;  %v5166_v60 = vsel %vm5140_vm7, %v9726_v63, %v5165_v19 }
 0x536   : > { %v4934_v36 = vpack.c.bf16 %v4858_v61, %v4858_v61  ;;  %v4936_v50 = vpack.c.bf16 %v4872_v10, %v4872_v10  ;;  %v5167_v22 = vsel %vm5142_vm8, %v9727_v23, %v5166_v60  ;;  %v5193_v17 = vsel %vm5138_vm6, %v9210_v26, %v9186_v27  ;;  %v9730_v27 = vld [vmem:[#allocation62_spill] sm:$0xff] }
 0x537   : > { %v4904_v16 = vpack.c.bf16 %v4648_v11, %v4648_v11  ;;  %v5132_v7 = vunpack.c.l.b16 %v4933_v31  ;;  %v5134_v49 = vunpack.c.l.b16 %v4935_v51  ;;  %v5168_v4 = vsel %vm5144_vm9, %v9728_v40, %v5167_v22 }
 0x538   : > { %v5133_v29 = vunpack.c.l.b16 %v4934_v36  ;;  %v5135_v58 = vunpack.c.l.b16 %v4936_v50  ;;  %v5169_v28 = vsel %vm5146_vm10, %v5099_v2, %v5168_v4  ;;  %v5194_v33 = vsel %vm5140_vm7, %v9252_v38, %v5193_v17 }
 0x539   : > { %v5103_v1 = vunpack.c.l.b16 %v4904_v16  ;;  %v5195_v46 = vsel %vm5142_vm8, %v9276_v48, %v5194_v33  ;;  %v5147_v26 = vsel %vm5146_vm10, %v9730_v27, %v9729_v55  ;;  %v5176_v0 = vsel %vm5146_vm10, %v9336_v20, %v9307_v53  ;;  %v9734_v20 = vld [vmem:[#allocation75_spill] sm:$0xff] }
 0x53a   : > { %v5184_v18 = vsel %vm5148_vm11, %v5133_v29, %v5183_v42  ;;  %v5196_v47 = vsel %vm5144_vm9, %v9314_v14, %v5195_v46  ;;  %v5149_v38 = vsel %vm5148_vm11, %v9731_v39, %v5147_v26  ;;  %v5177_v57 = vsel %vm5148_vm11, %v5132_v7, %v5176_v0 }
 0x53b   : > { %v5170_v32 = vsel %vm5148_vm11, %v5103_v1, %v5169_v28  ;;  %v5200_v48 = vpack.c.b16 %v5184_v18, %v5156_v30  ;;  %v5197_v25 = vsel %vm5146_vm10, %v5131_v54, %v5196_v47  ;;  %v5199_v15 = vpack.c.b16 %v5177_v57, %v5149_v38 }
 0x53c   : > { %v5162_v59 = vsel %vm5146_vm10, %v9733_v52, %v9732_v9  ;;  %v5198_v53 = vsel %vm5148_vm11, %v5135_v58, %v5197_v25  ;;  %v5190_v14 = vsel %vm5146_vm10, %v9338_v24, %v9310_v62 }
 0x53d   : > { %v5163_v34 = vsel %vm5148_vm11, %v9734_v20, %v5162_v59  ;;  %5431 = vmatprep.mubr.bf16.mxu0 %v5200_v48  ;;  %v5202_v13 = vpack.c.b16 %v5198_v53, %v5170_v32  ;;  %v5191_v45 = vsel %vm5148_vm11, %v5134_v49, %v5190_v14 }
 0x53e   : > { %5432 = vmatmul.mubr.bf16.vlgmr.msra.gmra.mrb[96].mxu0 %v5199_v15  ;;  %v5201_v43 = vpack.c.b16 %v5191_v45, %v5163_v34 }
 0x53f   : > { %5472 = vmatprep.mubr.bf16.mxu1 %v5202_v13 }
 0x540   : > { %5473 = vmatmul.mubr.bf16.vlgmr.msra.gmra.mrb[96].mxu1 %v5201_v43 }
 0x611   : > { %v5963_v44 = vpop.f32.mrb[96].mxu0 }
 0x612   : > { %v5964_v41 = vpop.f32.mrb[97].mxu0 }
 0x613   : > { %v5985_v30 = vpop.f32.mrb[96].mxu1  ;;  %v5965_v42 = vadd.f32 %v5964_v41, %v5963_v44  ;;  %v5966_v62 = vpop.f32.mrb[98].mxu0 }
 0x614   : > { %v5986_v24 = vpop.f32.mrb[97].mxu1  ;;  %v5967_v3 = vpop.f32.mrb[99].mxu0 }
 0x615   : > { %v5434_v37 = vadd.f32 %v5965_v42, %v5858_v12  ;;  %v5987_v56 = vadd.f32 %v5986_v24, %v5985_v30  ;;  %v5988_v21 = vpop.f32.mrb[98].mxu1  ;;  %v5968_v11 = vadd.f32 %v5967_v3, %v5966_v62 }
 0x616   : > { %v5989_v35 = vpop.f32.mrb[99].mxu1 }
 0x617   : > { %v5475_v6 = vadd.f32 %v5987_v56, %v5434_v37  ;;  %v5437_v2 = vadd.f32 %v5968_v11, %v5858_v12  ;;  %v5990_v61 = vadd.f32 %v5989_v35, %v5988_v21 }
 0x619   : > { %5481 = vst [vmem:[%s486_s14] sm:$0xff] %v5475_v6  ;;  %v5478_v10 = vadd.f32 %v5990_v61, %v5437_v2 }
 0x61b   : > { %5482 = vst [vmem:[%s486_s14 + $0x8] sm:$0xff] %v5478_v10 }
 0x61c   : > { %7051 = shalt.err (!%p7048_p10)
}
 0x61d   : > { %s7052_s28 = scalar_lea.hbm %s9424_s16, 256  ;;  %s7056_s23 = scalar_lea.hbm %s9736_s29, 512 }
 0x61e   : > { %p7053_p0 = scmp.ne.s32.totalorder %s9424_s16, %s7052_s28  ;;  %p7057_p4 = scmp.lt.u32.totalorder %s9424_s16, %s9736_s29 }
 0x61f   : > { %p7058_p12 = scmp.lt.u32.totalorder %s7056_s23, %s7052_s28  ;;  %p7060_p8 = scmp.lt.u32.totalorder %s7052_s28, %s9424_s16 }
 0x620   : > { %p7054_p2 = pnand %p7053_p0, %p9737_p11 }
 0x621   : > { %p7059_p7 = por %p7058_p12, %p7057_p4 }
 0x622   : > { %p7055_p3 = pneg %p7054_p2 }
 0x623   : > { %p7061_p13 = por %p7060_p8, %p7059_p7 }
 0x625   : > { %p7062_p1 = pnand %p7061_p13, %p7055_p3 }
 0x627   : > { %7065 = shalt.err (!%p7062_p1)
}
 0x628   : > { %s7126_s21 = smov 128   ;;  %s7127_s24 = smov 8  }
 0x629   : > { %6487 = dma.vmem_to_hbm [thread:$0]  (%p9737_p11), %s9419_s15, 256, %s9424_s16, %s9426_s19, %s7126_s21, %s7126_s21, %s7127_s24  }
 0x62a PF: > { %s9738_s13 = sld [smem:[#allocation17_spill]]  ;;  %s9739_s26 = sld [smem:[#allocation15_spill]] }
 0x62b   : > { %s9740_s25 = sld [smem:[#allocation21_spill]] }
 0x630   : > { %p6514_p6 = scmp.ge.s32.totalorder %s9738_s13, 2  ;;  %s5512_s27 = sand.u32 1, %s9739_s26  }
 0x631   : > { %p9741_p9 = scmp.ne.s32.totalorder %s9740_s25, 0  ;;  %s5513_s17 = scalar_lea.sflag [#allocation4], %s5512_s27 }
 0x633   : > { %p6503_p5 = pnand %p6514_p6, %p9741_p9 }
 0x635   : > { %7095 = dma.done.wait (!%p6503_p5), %s5513_s17, 256  }
 0x636   : > { %7097 = vsyncadd (!%p6503_p5), %s5513_s17, 4294967040  ;;  %s9742_s24 = sld [smem:[#allocation18_spill]]  ;;  %s9743_s28 = sld [smem:[#allocation16_spill]] }
 0x637   : > { %s9744_s23 = sld [smem:[#allocation19_spill]]  ;;  %s9745_s21 = smov %s7104_s22 }
 0x63c   : > { %p25_p10 = scmp.ge.s32.totalorder %s9742_s24, 4   ;;  %s9746_s22 = smov %s9743_s28 }
 0x63e   :  { %27 = sbr.rel (!%p25_p10) target bundleno = 8 (0x8), region = 123 }
 0x645   :  { %5518 = vsyncpa [#allocation3], 1 }
 0x646   :  { %5520 = vsyncpa [#allocation3 + $0x1], 1 }
 0x647   :  { %5521 = vsyncpa [#allocation6], 1 }
 0x648   :  { %5522 = vsyncpa [#allocation9], 1 }
 0x649   :  { %5523 = vsyncpa [#allocation4], 1 }
 0x64a   :  { %5525 = vsyncpa [#allocation4 + $0x1], 1 }

</bundles_post_ra>
